<compile_context>
chip_gen: v5e
topology: v5e:2x2
jax: 0.10.0
libtpu: 0.0.40
codegen_flags: <defaults>
</compile_context>

<pallas_src>
import functools

import jax
import jax.numpy as jnp
import numpy as np
from jax import lax
from jax.experimental import pallas as pl

EPS = 1e-5  # PyTorch LayerNorm default eps


# --------------------------------------------------------------------------
# In-kernel helpers
# --------------------------------------------------------------------------
def _layernorm(x, gamma, beta):
    mean = jnp.mean(x, axis=-1, keepdims=True)
    var = jnp.mean((x - mean) ** 2, axis=-1, keepdims=True)
    return (x - mean) * lax.rsqrt(var + EPS) * gamma + beta


def _mm(a, b):
    return jnp.dot(a, b, preferred_element_type=jnp.float32)


# --------------------------------------------------------------------------
# Single fused kernel: fc1 -> L x (fused-QKV MHA + residual + LN) -> fc2 -> LN
# All arrays are whole-block resident in VMEM (gridless pallas_call).
# --------------------------------------------------------------------------
def fused_branch_kernel(x_ref, w1_ref, b1_ref, wqkv_ref, bqkv_ref, wo_ref,
                        lvec_ref, w2_ref, ovec_ref, o_ref,
                        *, bsz, n, num_heads):
    num_layers, hidden, _ = wqkv_ref.shape
    hd = hidden // num_heads
    bn = bsz * n

    # fc1 + ReLU  (dropout p=0.5 is identity in eval mode)
    h = jnp.maximum(_mm(x_ref[...], w1_ref[...]) + b1_ref[...], 0.0)      # (BN, H)

    for li in range(num_layers):       # static layer loop; weights stay in VMEM
        # Fused Q/K/V projection: ONE full-width MXU matmul per layer
        # (1/sqrt(hd) pre-folded into the q-part of W_qkv / b_qkv).
        qkv = (_mm(h, wqkv_ref[li]) + bqkv_ref[li]).reshape(bsz, n, 3 * hidden)
        ctx_heads = []
        for a in range(num_heads):     # static head loop, static 32-lane slices
            q = qkv[:, :, a * hd:(a + 1) * hd]                            # (B,N,hd)
            k = qkv[:, :, hidden + a * hd:hidden + (a + 1) * hd]
            v = qkv[:, :, 2 * hidden + a * hd:2 * hidden + (a + 1) * hd]
            # scores: contract the head dim directly (no materialized kT)
            s = jnp.einsum("bnd,bmd->bnm", q, k,
                           preferred_element_type=jnp.float32)            # (B,N,N)
            s = s - jnp.max(s, axis=-1, keepdims=True)
            p = jnp.exp(s)
            p = p * pl.reciprocal(jnp.sum(p, axis=-1, keepdims=True), approx=True)
            ctx_heads.append(jnp.einsum("bnm,bmd->bnd", p, v,
                                        preferred_element_type=jnp.float32))
        # lane-concat the head contexts -> ONE full-width output projection
        ctx = jnp.concatenate(ctx_heads, axis=-1).reshape(bn, hidden)     # (BN, H)
        lvec = lvec_ref[li]            # (3, H): rows = [bo, gamma, beta]
        out = _mm(ctx, wo_ref[li]) + lvec[0:1, :]
        h = _layernorm(out + h, lvec[1:2, :], lvec[2:3, :])               # res + LN

    # fc2 + ReLU + output LayerNorm  (dropout identity in eval mode)
    ovec = ovec_ref[...]               # (3, Dout): rows = [b2, g_out, b_out]
    y = jnp.maximum(_mm(h, w2_ref[...]) + ovec[0:1, :], 0.0)
    o_ref[...] = _layernorm(y, ovec[1:2, :], ovec[2:3, :])


# --------------------------------------------------------------------------
# Wrapper: fuse / stack weights at trace time, one gridless pallas_call
# --------------------------------------------------------------------------
def pattern_graph_branch_forward(x, params, *, num_heads):
    bsz, n, din = x.shape
    w1, b1 = params["fc1"]
    hidden = w1.shape[1]
    hd = hidden // num_heads
    scale = 1.0 / np.sqrt(float(hd))
    w2, b2 = params["fc2"]
    dout = w2.shape[1]
    g_out, b_out = params["norm_out"]

    wqkv_l, bqkv_l, wo_l, lvec_l = [], [], [], []
    for (wq, wk, wv, bq, bk, bv, wo, bo, g, be) in params["layers"]:
        wqkv_l.append(jnp.concatenate([wq * scale, wk, wv], axis=1))   # (H, 3H)
        bqkv_l.append(jnp.concatenate([bq * scale, bk, bv], axis=1))   # (1, 3H)
        wo_l.append(wo)                                                # (H, H)
        lvec_l.append(jnp.concatenate([bo, g, be], axis=0))            # (3, H)
    wqkv_s = jnp.stack(wqkv_l)                                         # (L, H, 3H)
    bqkv_s = jnp.stack(bqkv_l)                                         # (L, 1, 3H)
    wo_s = jnp.stack(wo_l)                                             # (L, H, H)
    lvec_s = jnp.stack(lvec_l)                                         # (L, 3, H)
    ovec = jnp.concatenate([b2, g_out, b_out], axis=0)                 # (3, Dout)

    kernel = functools.partial(fused_branch_kernel,
                               bsz=bsz, n=n, num_heads=num_heads)

    # Gridless call: every operand is a single whole-array VMEM block; the B
    # graphs are flattened into the sublane axis so every big matmul has B*N
    # rows and there is no per-grid-step overhead.
    out_flat = pl.pallas_call(
        kernel,
        out_shape=jax.ShapeDtypeStruct((bsz * n, dout), jnp.float32),
    )(x.reshape(bsz * n, din), w1, b1, wqkv_s, bqkv_s, wo_s, lvec_s, w2, ovec)
    return out_flat.reshape(bsz, n, dout)


# --------------------------------------------------------------------------
# Deterministic parameter init (mirrors the shapes in PatternGraphBranch)
# --------------------------------------------------------------------------
def init_params(key, input_dim, hidden_dim, output_dim, num_layers):
    def dense(k, fan_in, fan_out):
        kw, kb = jax.random.split(k)
        w = jax.random.normal(kw, (fan_in, fan_out), jnp.float32) / np.sqrt(fan_in)
        b = 0.1 * jax.random.normal(kb, (1, fan_out), jnp.float32)
        return w, b

    keys = jax.random.split(key, 3 + num_layers)
    params = {"fc1": dense(keys[0], input_dim, hidden_dim),
              "fc2": dense(keys[1], hidden_dim, output_dim),
              "norm_out": (jnp.ones((1, output_dim), jnp.float32),
                           jnp.zeros((1, output_dim), jnp.float32)),
              "layers": []}
    for li in range(num_layers):
        lk = jax.random.split(keys[3 + li], 4)
        wq, bq = dense(lk[0], hidden_dim, hidden_dim)
        wk, bk = dense(lk[1], hidden_dim, hidden_dim)
        wv, bv = dense(lk[2], hidden_dim, hidden_dim)
        wo, bo = dense(lk[3], hidden_dim, hidden_dim)
        gamma = jnp.ones((1, hidden_dim), jnp.float32)
        beta = jnp.zeros((1, hidden_dim), jnp.float32)
        params["layers"].append((wq, wk, wv, bq, bk, bv, wo, bo, gamma, beta))
    return params


# --------------------------------------------------------------------------
# Pure-JAX reference (uses the raw, un-stacked parameters)
# --------------------------------------------------------------------------
def reference_forward(x, params, *, num_heads):
    def ln(v, g, b):
        m = jnp.mean(v, axis=-1, keepdims=True)
        var = jnp.mean((v - m) ** 2, axis=-1, keepdims=True)
        return (v - m) * lax.rsqrt(var + EPS) * g + b

    def single(xg):
        w1, b1 = params["fc1"]
        h = jax.nn.relu(xg @ w1 + b1)
        n, hdim = h.shape
        hd = hdim // num_heads
        for (wq, wk, wv, bq, bk, bv, wo, bo, g, be) in params["layers"]:
            q = (h @ wq + bq).reshape(n, num_heads, hd).transpose(1, 0, 2)
            k = (h @ wk + bk).reshape(n, num_heads, hd).transpose(1, 0, 2)
            v = (h @ wv + bv).reshape(n, num_heads, hd).transpose(1, 0, 2)
            s = jnp.einsum("hnd,hmd->hnm", q, k) / np.sqrt(float(hd))
            p = jax.nn.softmax(s, axis=-1)
            att = jnp.einsum("hnm,hmd->hnd", p, v).transpose(1, 0, 2).reshape(n, hdim)
            h = ln(att @ wo + bo + h, g, be)
        w2, b2 = params["fc2"]
        g_out, b_out = params["norm_out"]
        return ln(jax.nn.relu(h @ w2 + b2), g_out, b_out)

    return jax.vmap(single)(x)


# --------------------------------------------------------------------------
if __name__ == "__main__":
    B = 2             # graphs; flattened into the sublane axis (B*N = 32 rows)
    N = 16            # graph nodes (attention sequence length), multiple of 8
    INPUT_DIM = 8
    HIDDEN_DIM = 128  # lane-dense hidden dim (full 128-lane vregs)
    OUTPUT_DIM = 128  # lane-dense output -> unmasked vector stores
    NUM_HEADS = 4
    NUM_LAYERS = 2

    key = jax.random.PRNGKey(0)
    kx, kp = jax.random.split(key)
    x = jax.random.normal(kx, (B, N, INPUT_DIM), jnp.float32)
    params = init_params(kp, INPUT_DIM, HIDDEN_DIM, OUTPUT_DIM, NUM_LAYERS)

    out = pattern_graph_branch_forward(x, params, num_heads=NUM_HEADS)
    out = jax.block_until_ready(out)

    ref = reference_forward(x, params, num_heads=NUM_HEADS)
    assert out.shape == (B, N, OUTPUT_DIM)
    assert bool(jnp.all(jnp.isfinite(out)))
    np.testing.assert_allclose(np.asarray(out), np.asarray(ref),
                               rtol=1e-2, atol=1e-2)
    print("KERNEL_OK")
</pallas_src>

<mosaic_0001>
module attributes {stable_mosaic.version = 11 : i64} {
  func.func @fused_branch_kernel(%arg0: memref<32x8xf32, #tpu.memory_space<vmem>>, %arg1: memref<8x128xf32, #tpu.memory_space<vmem>>, %arg2: memref<1x128xf32, #tpu.memory_space<vmem>>, %arg3: memref<2x128x384xf32, #tpu.memory_space<vmem>>, %arg4: memref<2x1x384xf32, #tpu.memory_space<vmem>>, %arg5: memref<2x128x128xf32, #tpu.memory_space<vmem>>, %arg6: memref<2x3x128xf32, #tpu.memory_space<vmem>>, %arg7: memref<128x128xf32, #tpu.memory_space<vmem>>, %arg8: memref<3x128xf32, #tpu.memory_space<vmem>>, %arg9: memref<32x128xf32, #tpu.memory_space<vmem>>) attributes {dimension_semantics = [], scalar_prefetch = 0 : i64, scratch_operands = 0 : i64, tpu.core_type = #tpu.core_type<tc>} {
    %c0 = arith.constant 0 : index
    %c0_0 = arith.constant 0 : index
    %0 = vector.load %arg0[%c0, %c0_0] : memref<32x8xf32, #tpu.memory_space<vmem>>, vector<32x8xf32>
    %c0_1 = arith.constant 0 : index
    %c0_2 = arith.constant 0 : index
    %1 = vector.load %arg1[%c0_1, %c0_2] : memref<8x128xf32, #tpu.memory_space<vmem>>, vector<8x128xf32>
    %cst = arith.constant dense<0.000000e+00> : vector<32x128xf32>
    %2 = tpu.matmul %0, %1, %cst {dimension_numbers = #tpu.dot_dimension_numbers<[1], [0], [0], [1], [0, 0, 1, 1], [], []>} : vector<32x8xf32>, vector<8x128xf32>, vector<32x128xf32> -> vector<32x128xf32>
    %c0_3 = arith.constant 0 : index
    %c0_4 = arith.constant 0 : index
    %3 = vector.load %arg2[%c0_3, %c0_4] : memref<1x128xf32, #tpu.memory_space<vmem>>, vector<1x128xf32>
    %4 = vector.broadcast %3 : vector<1x128xf32> to vector<32x128xf32>
    %5 = arith.addf %2, %4 : vector<32x128xf32>
    %cst_5 = arith.constant 0.000000e+00 : f32
    %6 = vector.broadcast %cst_5 : f32 to vector<32x128xf32>
    %7 = arith.maximumf %5, %6 : vector<32x128xf32>
    %c0_6 = arith.constant 0 : index
    %c0_7 = arith.constant 0 : index
    %c0_8 = arith.constant 0 : index
    %8 = vector.load %arg3[%c0_6, %c0_7, %c0_8] : memref<2x128x384xf32, #tpu.memory_space<vmem>>, vector<1x128x384xf32>
    %9 = vector.shape_cast %8 : vector<1x128x384xf32> to vector<128x384xf32>
    %cst_9 = arith.constant dense<0.000000e+00> : vector<32x384xf32>
    %10 = tpu.matmul %7, %9, %cst_9 {dimension_numbers = #tpu.dot_dimension_numbers<[1], [0], [0], [1], [0, 0, 1, 1], [], []>} : vector<32x128xf32>, vector<128x384xf32>, vector<32x384xf32> -> vector<32x384xf32>
    %c0_10 = arith.constant 0 : index
    %c0_11 = arith.constant 0 : index
    %c0_12 = arith.constant 0 : index
    %11 = vector.load %arg4[%c0_10, %c0_11, %c0_12] : memref<2x1x384xf32, #tpu.memory_space<vmem>>, vector<1x1x384xf32>
    %12 = vector.shape_cast %11 : vector<1x1x384xf32> to vector<1x384xf32>
    %13 = vector.broadcast %12 : vector<1x384xf32> to vector<32x384xf32>
    %14 = arith.addf %10, %13 : vector<32x384xf32>
    %15 = vector.shape_cast %14 : vector<32x384xf32> to vector<2x16x384xf32>
    %16 = vector.extract_strided_slice %15 {offsets = [0, 0, 0], sizes = [2, 16, 32], strides = [1, 1, 1]} : vector<2x16x384xf32> to vector<2x16x32xf32>
    %17 = vector.extract_strided_slice %15 {offsets = [0, 0, 128], sizes = [2, 16, 32], strides = [1, 1, 1]} : vector<2x16x384xf32> to vector<2x16x32xf32>
    %18 = vector.extract_strided_slice %15 {offsets = [0, 0, 256], sizes = [2, 16, 32], strides = [1, 1, 1]} : vector<2x16x384xf32> to vector<2x16x32xf32>
    "tpu.trace_start"() <{level = 10 : i32, message = "bnd,bmd->bnm"}> : () -> ()
    %cst_13 = arith.constant dense<0.000000e+00> : vector<2x16x16xf32>
    %19 = tpu.matmul %16, %17, %cst_13 {dimension_numbers = #tpu.dot_dimension_numbers<[2], [2], [1], [1], [0, 0, 0, 1, 1, 1], [0], [0]>} : vector<2x16x32xf32>, vector<2x16x32xf32>, vector<2x16x16xf32> -> vector<2x16x16xf32>
    "tpu.trace_stop"() : () -> ()
    %cst_14 = arith.constant dense<0xFF800000> : vector<2x16xf32>
    %20 = vector.multi_reduction <maximumf>, %19, %cst_14 [2] : vector<2x16x16xf32> to vector<2x16xf32>
    %21 = vector.shape_cast %20 : vector<2x16xf32> to vector<2x16x1xf32>
    %22 = vector.broadcast %21 : vector<2x16x1xf32> to vector<2x16x16xf32>
    %23 = arith.subf %19, %22 : vector<2x16x16xf32>
    %24 = math.exp %23 : vector<2x16x16xf32>
    %cst_15 = arith.constant dense<0.000000e+00> : vector<2x16xf32>
    %25 = vector.multi_reduction <add>, %24, %cst_15 [2] : vector<2x16x16xf32> to vector<2x16xf32>
    %26 = vector.shape_cast %25 : vector<2x16xf32> to vector<2x16x1xf32>
    %27 = tpu.reciprocal %26 {approx = true} : vector<2x16x1xf32> -> vector<2x16x1xf32>
    %28 = vector.broadcast %27 : vector<2x16x1xf32> to vector<2x16x16xf32>
    %29 = arith.mulf %24, %28 : vector<2x16x16xf32>
    "tpu.trace_start"() <{level = 10 : i32, message = "bnm,bmd->bnd"}> : () -> ()
    %cst_16 = arith.constant dense<0.000000e+00> : vector<2x16x32xf32>
    %30 = tpu.matmul %29, %18, %cst_16 {dimension_numbers = #tpu.dot_dimension_numbers<[2], [1], [1], [2], [0, 0, 0, 1, 1, 2], [0], [0]>} : vector<2x16x16xf32>, vector<2x16x32xf32>, vector<2x16x32xf32> -> vector<2x16x32xf32>
    "tpu.trace_stop"() : () -> ()
    %31 = vector.extract_strided_slice %15 {offsets = [0, 0, 32], sizes = [2, 16, 32], strides = [1, 1, 1]} : vector<2x16x384xf32> to vector<2x16x32xf32>
    %32 = vector.extract_strided_slice %15 {offsets = [0, 0, 160], sizes = [2, 16, 32], strides = [1, 1, 1]} : vector<2x16x384xf32> to vector<2x16x32xf32>
    %33 = vector.extract_strided_slice %15 {offsets = [0, 0, 288], sizes = [2, 16, 32], strides = [1, 1, 1]} : vector<2x16x384xf32> to vector<2x16x32xf32>
    "tpu.trace_start"() <{level = 10 : i32, message = "bnd,bmd->bnm"}> : () -> ()
    %cst_17 = arith.constant dense<0.000000e+00> : vector<2x16x16xf32>
    %34 = tpu.matmul %31, %32, %cst_17 {dimension_numbers = #tpu.dot_dimension_numbers<[2], [2], [1], [1], [0, 0, 0, 1, 1, 1], [0], [0]>} : vector<2x16x32xf32>, vector<2x16x32xf32>, vector<2x16x16xf32> -> vector<2x16x16xf32>
    "tpu.trace_stop"() : () -> ()
    %cst_18 = arith.constant dense<0xFF800000> : vector<2x16xf32>
    %35 = vector.multi_reduction <maximumf>, %34, %cst_18 [2] : vector<2x16x16xf32> to vector<2x16xf32>
    %36 = vector.shape_cast %35 : vector<2x16xf32> to vector<2x16x1xf32>
    %37 = vector.broadcast %36 : vector<2x16x1xf32> to vector<2x16x16xf32>
    %38 = arith.subf %34, %37 : vector<2x16x16xf32>
    %39 = math.exp %38 : vector<2x16x16xf32>
    %cst_19 = arith.constant dense<0.000000e+00> : vector<2x16xf32>
    %40 = vector.multi_reduction <add>, %39, %cst_19 [2] : vector<2x16x16xf32> to vector<2x16xf32>
    %41 = vector.shape_cast %40 : vector<2x16xf32> to vector<2x16x1xf32>
    %42 = tpu.reciprocal %41 {approx = true} : vector<2x16x1xf32> -> vector<2x16x1xf32>
    %43 = vector.broadcast %42 : vector<2x16x1xf32> to vector<2x16x16xf32>
    %44 = arith.mulf %39, %43 : vector<2x16x16xf32>
    "tpu.trace_start"() <{level = 10 : i32, message = "bnm,bmd->bnd"}> : () -> ()
    %cst_20 = arith.constant dense<0.000000e+00> : vector<2x16x32xf32>
    %45 = tpu.matmul %44, %33, %cst_20 {dimension_numbers = #tpu.dot_dimension_numbers<[2], [1], [1], [2], [0, 0, 0, 1, 1, 2], [0], [0]>} : vector<2x16x16xf32>, vector<2x16x32xf32>, vector<2x16x32xf32> -> vector<2x16x32xf32>
    "tpu.trace_stop"() : () -> ()
    %46 = vector.extract_strided_slice %15 {offsets = [0, 0, 64], sizes = [2, 16, 32], strides = [1, 1, 1]} : vector<2x16x384xf32> to vector<2x16x32xf32>
    %47 = vector.extract_strided_slice %15 {offsets = [0, 0, 192], sizes = [2, 16, 32], strides = [1, 1, 1]} : vector<2x16x384xf32> to vector<2x16x32xf32>
    %48 = vector.extract_strided_slice %15 {offsets = [0, 0, 320], sizes = [2, 16, 32], strides = [1, 1, 1]} : vector<2x16x384xf32> to vector<2x16x32xf32>
    "tpu.trace_start"() <{level = 10 : i32, message = "bnd,bmd->bnm"}> : () -> ()
    %cst_21 = arith.constant dense<0.000000e+00> : vector<2x16x16xf32>
    %49 = tpu.matmul %46, %47, %cst_21 {dimension_numbers = #tpu.dot_dimension_numbers<[2], [2], [1], [1], [0, 0, 0, 1, 1, 1], [0], [0]>} : vector<2x16x32xf32>, vector<2x16x32xf32>, vector<2x16x16xf32> -> vector<2x16x16xf32>
    "tpu.trace_stop"() : () -> ()
    %cst_22 = arith.constant dense<0xFF800000> : vector<2x16xf32>
    %50 = vector.multi_reduction <maximumf>, %49, %cst_22 [2] : vector<2x16x16xf32> to vector<2x16xf32>
    %51 = vector.shape_cast %50 : vector<2x16xf32> to vector<2x16x1xf32>
    %52 = vector.broadcast %51 : vector<2x16x1xf32> to vector<2x16x16xf32>
    %53 = arith.subf %49, %52 : vector<2x16x16xf32>
    %54 = math.exp %53 : vector<2x16x16xf32>
    %cst_23 = arith.constant dense<0.000000e+00> : vector<2x16xf32>
    %55 = vector.multi_reduction <add>, %54, %cst_23 [2] : vector<2x16x16xf32> to vector<2x16xf32>
    %56 = vector.shape_cast %55 : vector<2x16xf32> to vector<2x16x1xf32>
    %57 = tpu.reciprocal %56 {approx = true} : vector<2x16x1xf32> -> vector<2x16x1xf32>
    %58 = vector.broadcast %57 : vector<2x16x1xf32> to vector<2x16x16xf32>
    %59 = arith.mulf %54, %58 : vector<2x16x16xf32>
    "tpu.trace_start"() <{level = 10 : i32, message = "bnm,bmd->bnd"}> : () -> ()
    %cst_24 = arith.constant dense<0.000000e+00> : vector<2x16x32xf32>
    %60 = tpu.matmul %59, %48, %cst_24 {dimension_numbers = #tpu.dot_dimension_numbers<[2], [1], [1], [2], [0, 0, 0, 1, 1, 2], [0], [0]>} : vector<2x16x16xf32>, vector<2x16x32xf32>, vector<2x16x32xf32> -> vector<2x16x32xf32>
    "tpu.trace_stop"() : () -> ()
    %61 = vector.extract_strided_slice %15 {offsets = [0, 0, 96], sizes = [2, 16, 32], strides = [1, 1, 1]} : vector<2x16x384xf32> to vector<2x16x32xf32>
    %62 = vector.extract_strided_slice %15 {offsets = [0, 0, 224], sizes = [2, 16, 32], strides = [1, 1, 1]} : vector<2x16x384xf32> to vector<2x16x32xf32>
    %63 = vector.extract_strided_slice %15 {offsets = [0, 0, 352], sizes = [2, 16, 32], strides = [1, 1, 1]} : vector<2x16x384xf32> to vector<2x16x32xf32>
    "tpu.trace_start"() <{level = 10 : i32, message = "bnd,bmd->bnm"}> : () -> ()
    %cst_25 = arith.constant dense<0.000000e+00> : vector<2x16x16xf32>
    %64 = tpu.matmul %61, %62, %cst_25 {dimension_numbers = #tpu.dot_dimension_numbers<[2], [2], [1], [1], [0, 0, 0, 1, 1, 1], [0], [0]>} : vector<2x16x32xf32>, vector<2x16x32xf32>, vector<2x16x16xf32> -> vector<2x16x16xf32>
    "tpu.trace_stop"() : () -> ()
    %cst_26 = arith.constant dense<0xFF800000> : vector<2x16xf32>
    %65 = vector.multi_reduction <maximumf>, %64, %cst_26 [2] : vector<2x16x16xf32> to vector<2x16xf32>
    %66 = vector.shape_cast %65 : vector<2x16xf32> to vector<2x16x1xf32>
    %67 = vector.broadcast %66 : vector<2x16x1xf32> to vector<2x16x16xf32>
    %68 = arith.subf %64, %67 : vector<2x16x16xf32>
    %69 = math.exp %68 : vector<2x16x16xf32>
    %cst_27 = arith.constant dense<0.000000e+00> : vector<2x16xf32>
    %70 = vector.multi_reduction <add>, %69, %cst_27 [2] : vector<2x16x16xf32> to vector<2x16xf32>
    %71 = vector.shape_cast %70 : vector<2x16xf32> to vector<2x16x1xf32>
    %72 = tpu.reciprocal %71 {approx = true} : vector<2x16x1xf32> -> vector<2x16x1xf32>
    %73 = vector.broadcast %72 : vector<2x16x1xf32> to vector<2x16x16xf32>
    %74 = arith.mulf %69, %73 : vector<2x16x16xf32>
    "tpu.trace_start"() <{level = 10 : i32, message = "bnm,bmd->bnd"}> : () -> ()
    %cst_28 = arith.constant dense<0.000000e+00> : vector<2x16x32xf32>
    %75 = tpu.matmul %74, %63, %cst_28 {dimension_numbers = #tpu.dot_dimension_numbers<[2], [1], [1], [2], [0, 0, 0, 1, 1, 2], [0], [0]>} : vector<2x16x16xf32>, vector<2x16x32xf32>, vector<2x16x32xf32> -> vector<2x16x32xf32>
    "tpu.trace_stop"() : () -> ()
    %76 = tpu.concatenate %30, %45, %60, %75 in 2 : vector<2x16x32xf32>, vector<2x16x32xf32>, vector<2x16x32xf32>, vector<2x16x32xf32> -> vector<2x16x128xf32>
    %77 = vector.shape_cast %76 : vector<2x16x128xf32> to vector<32x128xf32>
    %c0_29 = arith.constant 0 : index
    %c0_30 = arith.constant 0 : index
    %c0_31 = arith.constant 0 : index
    %78 = vector.load %arg6[%c0_29, %c0_30, %c0_31] : memref<2x3x128xf32, #tpu.memory_space<vmem>>, vector<1x3x128xf32>
    %79 = vector.shape_cast %78 : vector<1x3x128xf32> to vector<3x128xf32>
    %c0_32 = arith.constant 0 : index
    %c0_33 = arith.constant 0 : index
    %c0_34 = arith.constant 0 : index
    %80 = vector.load %arg5[%c0_32, %c0_33, %c0_34] : memref<2x128x128xf32, #tpu.memory_space<vmem>>, vector<1x128x128xf32>
    %81 = vector.shape_cast %80 : vector<1x128x128xf32> to vector<128x128xf32>
    %cst_35 = arith.constant dense<0.000000e+00> : vector<32x128xf32>
    %82 = tpu.matmul %77, %81, %cst_35 {dimension_numbers = #tpu.dot_dimension_numbers<[1], [0], [0], [1], [0, 0, 1, 1], [], []>} : vector<32x128xf32>, vector<128x128xf32>, vector<32x128xf32> -> vector<32x128xf32>
    %83 = vector.extract_strided_slice %79 {offsets = [0, 0], sizes = [1, 128], strides = [1, 1]} : vector<3x128xf32> to vector<1x128xf32>
    %84 = vector.broadcast %83 : vector<1x128xf32> to vector<32x128xf32>
    %85 = arith.addf %82, %84 : vector<32x128xf32>
    %86 = arith.addf %85, %7 : vector<32x128xf32>
    %87 = vector.extract_strided_slice %79 {offsets = [1, 0], sizes = [1, 128], strides = [1, 1]} : vector<3x128xf32> to vector<1x128xf32>
    %88 = vector.extract_strided_slice %79 {offsets = [2, 0], sizes = [1, 128], strides = [1, 1]} : vector<3x128xf32> to vector<1x128xf32>
    %cst_36 = arith.constant dense<0.000000e+00> : vector<32xf32>
    %89 = vector.multi_reduction <add>, %86, %cst_36 [1] : vector<32x128xf32> to vector<32xf32>
    %90 = vector.shape_cast %89 : vector<32xf32> to vector<32x1xf32>
    %cst_37 = arith.constant 1.280000e+02 : f32
    %91 = vector.broadcast %cst_37 : f32 to vector<32x1xf32>
    %92 = arith.divf %90, %91 : vector<32x1xf32>
    %93 = vector.broadcast %92 : vector<32x1xf32> to vector<32x128xf32>
    %94 = arith.subf %86, %93 : vector<32x128xf32>
    %95 = arith.mulf %94, %94 : vector<32x128xf32>
    %cst_38 = arith.constant dense<0.000000e+00> : vector<32xf32>
    %96 = vector.multi_reduction <add>, %95, %cst_38 [1] : vector<32x128xf32> to vector<32xf32>
    %97 = vector.shape_cast %96 : vector<32xf32> to vector<32x1xf32>
    %cst_39 = arith.constant 1.280000e+02 : f32
    %98 = vector.broadcast %cst_39 : f32 to vector<32x1xf32>
    %99 = arith.divf %97, %98 : vector<32x1xf32>
    %100 = vector.broadcast %92 : vector<32x1xf32> to vector<32x128xf32>
    %101 = arith.subf %86, %100 : vector<32x128xf32>
    %cst_40 = arith.constant 9.99999974E-6 : f32
    %102 = vector.broadcast %cst_40 : f32 to vector<32x1xf32>
    %103 = arith.addf %99, %102 : vector<32x1xf32>
    %104 = math.rsqrt %103 : vector<32x1xf32>
    %105 = vector.broadcast %104 : vector<32x1xf32> to vector<32x128xf32>
    %106 = arith.mulf %101, %105 : vector<32x128xf32>
    %107 = vector.broadcast %87 : vector<1x128xf32> to vector<32x128xf32>
    %108 = arith.mulf %106, %107 : vector<32x128xf32>
    %109 = vector.broadcast %88 : vector<1x128xf32> to vector<32x128xf32>
    %110 = arith.addf %108, %109 : vector<32x128xf32>
    %c1 = arith.constant 1 : index
    %c0_41 = arith.constant 0 : index
    %c0_42 = arith.constant 0 : index
    %111 = vector.load %arg3[%c1, %c0_41, %c0_42] : memref<2x128x384xf32, #tpu.memory_space<vmem>>, vector<1x128x384xf32>
    %112 = vector.shape_cast %111 : vector<1x128x384xf32> to vector<128x384xf32>
    %cst_43 = arith.constant dense<0.000000e+00> : vector<32x384xf32>
    %113 = tpu.matmul %110, %112, %cst_43 {dimension_numbers = #tpu.dot_dimension_numbers<[1], [0], [0], [1], [0, 0, 1, 1], [], []>} : vector<32x128xf32>, vector<128x384xf32>, vector<32x384xf32> -> vector<32x384xf32>
    %c1_44 = arith.constant 1 : index
    %c0_45 = arith.constant 0 : index
    %c0_46 = arith.constant 0 : index
    %114 = vector.load %arg4[%c1_44, %c0_45, %c0_46] : memref<2x1x384xf32, #tpu.memory_space<vmem>>, vector<1x1x384xf32>
    %115 = vector.shape_cast %114 : vector<1x1x384xf32> to vector<1x384xf32>
    %116 = vector.broadcast %115 : vector<1x384xf32> to vector<32x384xf32>
    %117 = arith.addf %113, %116 : vector<32x384xf32>
    %118 = vector.shape_cast %117 : vector<32x384xf32> to vector<2x16x384xf32>
    %119 = vector.extract_strided_slice %118 {offsets = [0, 0, 0], sizes = [2, 16, 32], strides = [1, 1, 1]} : vector<2x16x384xf32> to vector<2x16x32xf32>
    %120 = vector.extract_strided_slice %118 {offsets = [0, 0, 128], sizes = [2, 16, 32], strides = [1, 1, 1]} : vector<2x16x384xf32> to vector<2x16x32xf32>
    %121 = vector.extract_strided_slice %118 {offsets = [0, 0, 256], sizes = [2, 16, 32], strides = [1, 1, 1]} : vector<2x16x384xf32> to vector<2x16x32xf32>
    "tpu.trace_start"() <{level = 10 : i32, message = "bnd,bmd->bnm"}> : () -> ()
    %cst_47 = arith.constant dense<0.000000e+00> : vector<2x16x16xf32>
    %122 = tpu.matmul %119, %120, %cst_47 {dimension_numbers = #tpu.dot_dimension_numbers<[2], [2], [1], [1], [0, 0, 0, 1, 1, 1], [0], [0]>} : vector<2x16x32xf32>, vector<2x16x32xf32>, vector<2x16x16xf32> -> vector<2x16x16xf32>
    "tpu.trace_stop"() : () -> ()
    %cst_48 = arith.constant dense<0xFF800000> : vector<2x16xf32>
    %123 = vector.multi_reduction <maximumf>, %122, %cst_48 [2] : vector<2x16x16xf32> to vector<2x16xf32>
    %124 = vector.shape_cast %123 : vector<2x16xf32> to vector<2x16x1xf32>
    %125 = vector.broadcast %124 : vector<2x16x1xf32> to vector<2x16x16xf32>
    %126 = arith.subf %122, %125 : vector<2x16x16xf32>
    %127 = math.exp %126 : vector<2x16x16xf32>
    %cst_49 = arith.constant dense<0.000000e+00> : vector<2x16xf32>
    %128 = vector.multi_reduction <add>, %127, %cst_49 [2] : vector<2x16x16xf32> to vector<2x16xf32>
    %129 = vector.shape_cast %128 : vector<2x16xf32> to vector<2x16x1xf32>
    %130 = tpu.reciprocal %129 {approx = true} : vector<2x16x1xf32> -> vector<2x16x1xf32>
    %131 = vector.broadcast %130 : vector<2x16x1xf32> to vector<2x16x16xf32>
    %132 = arith.mulf %127, %131 : vector<2x16x16xf32>
    "tpu.trace_start"() <{level = 10 : i32, message = "bnm,bmd->bnd"}> : () -> ()
    %cst_50 = arith.constant dense<0.000000e+00> : vector<2x16x32xf32>
    %133 = tpu.matmul %132, %121, %cst_50 {dimension_numbers = #tpu.dot_dimension_numbers<[2], [1], [1], [2], [0, 0, 0, 1, 1, 2], [0], [0]>} : vector<2x16x16xf32>, vector<2x16x32xf32>, vector<2x16x32xf32> -> vector<2x16x32xf32>
    "tpu.trace_stop"() : () -> ()
    %134 = vector.extract_strided_slice %118 {offsets = [0, 0, 32], sizes = [2, 16, 32], strides = [1, 1, 1]} : vector<2x16x384xf32> to vector<2x16x32xf32>
    %135 = vector.extract_strided_slice %118 {offsets = [0, 0, 160], sizes = [2, 16, 32], strides = [1, 1, 1]} : vector<2x16x384xf32> to vector<2x16x32xf32>
    %136 = vector.extract_strided_slice %118 {offsets = [0, 0, 288], sizes = [2, 16, 32], strides = [1, 1, 1]} : vector<2x16x384xf32> to vector<2x16x32xf32>
    "tpu.trace_start"() <{level = 10 : i32, message = "bnd,bmd->bnm"}> : () -> ()
    %cst_51 = arith.constant dense<0.000000e+00> : vector<2x16x16xf32>
    %137 = tpu.matmul %134, %135, %cst_51 {dimension_numbers = #tpu.dot_dimension_numbers<[2], [2], [1], [1], [0, 0, 0, 1, 1, 1], [0], [0]>} : vector<2x16x32xf32>, vector<2x16x32xf32>, vector<2x16x16xf32> -> vector<2x16x16xf32>
    "tpu.trace_stop"() : () -> ()
    %cst_52 = arith.constant dense<0xFF800000> : vector<2x16xf32>
    %138 = vector.multi_reduction <maximumf>, %137, %cst_52 [2] : vector<2x16x16xf32> to vector<2x16xf32>
    %139 = vector.shape_cast %138 : vector<2x16xf32> to vector<2x16x1xf32>
    %140 = vector.broadcast %139 : vector<2x16x1xf32> to vector<2x16x16xf32>
    %141 = arith.subf %137, %140 : vector<2x16x16xf32>
    %142 = math.exp %141 : vector<2x16x16xf32>
    %cst_53 = arith.constant dense<0.000000e+00> : vector<2x16xf32>
    %143 = vector.multi_reduction <add>, %142, %cst_53 [2] : vector<2x16x16xf32> to vector<2x16xf32>
    %144 = vector.shape_cast %143 : vector<2x16xf32> to vector<2x16x1xf32>
    %145 = tpu.reciprocal %144 {approx = true} : vector<2x16x1xf32> -> vector<2x16x1xf32>
    %146 = vector.broadcast %145 : vector<2x16x1xf32> to vector<2x16x16xf32>
    %147 = arith.mulf %142, %146 : vector<2x16x16xf32>
    "tpu.trace_start"() <{level = 10 : i32, message = "bnm,bmd->bnd"}> : () -> ()
    %cst_54 = arith.constant dense<0.000000e+00> : vector<2x16x32xf32>
    %148 = tpu.matmul %147, %136, %cst_54 {dimension_numbers = #tpu.dot_dimension_numbers<[2], [1], [1], [2], [0, 0, 0, 1, 1, 2], [0], [0]>} : vector<2x16x16xf32>, vector<2x16x32xf32>, vector<2x16x32xf32> -> vector<2x16x32xf32>
    "tpu.trace_stop"() : () -> ()
    %149 = vector.extract_strided_slice %118 {offsets = [0, 0, 64], sizes = [2, 16, 32], strides = [1, 1, 1]} : vector<2x16x384xf32> to vector<2x16x32xf32>
    %150 = vector.extract_strided_slice %118 {offsets = [0, 0, 192], sizes = [2, 16, 32], strides = [1, 1, 1]} : vector<2x16x384xf32> to vector<2x16x32xf32>
    %151 = vector.extract_strided_slice %118 {offsets = [0, 0, 320], sizes = [2, 16, 32], strides = [1, 1, 1]} : vector<2x16x384xf32> to vector<2x16x32xf32>
    "tpu.trace_start"() <{level = 10 : i32, message = "bnd,bmd->bnm"}> : () -> ()
    %cst_55 = arith.constant dense<0.000000e+00> : vector<2x16x16xf32>
    %152 = tpu.matmul %149, %150, %cst_55 {dimension_numbers = #tpu.dot_dimension_numbers<[2], [2], [1], [1], [0, 0, 0, 1, 1, 1], [0], [0]>} : vector<2x16x32xf32>, vector<2x16x32xf32>, vector<2x16x16xf32> -> vector<2x16x16xf32>
    "tpu.trace_stop"() : () -> ()
    %cst_56 = arith.constant dense<0xFF800000> : vector<2x16xf32>
    %153 = vector.multi_reduction <maximumf>, %152, %cst_56 [2] : vector<2x16x16xf32> to vector<2x16xf32>
    %154 = vector.shape_cast %153 : vector<2x16xf32> to vector<2x16x1xf32>
    %155 = vector.broadcast %154 : vector<2x16x1xf32> to vector<2x16x16xf32>
    %156 = arith.subf %152, %155 : vector<2x16x16xf32>
    %157 = math.exp %156 : vector<2x16x16xf32>
    %cst_57 = arith.constant dense<0.000000e+00> : vector<2x16xf32>
    %158 = vector.multi_reduction <add>, %157, %cst_57 [2] : vector<2x16x16xf32> to vector<2x16xf32>
    %159 = vector.shape_cast %158 : vector<2x16xf32> to vector<2x16x1xf32>
    %160 = tpu.reciprocal %159 {approx = true} : vector<2x16x1xf32> -> vector<2x16x1xf32>
    %161 = vector.broadcast %160 : vector<2x16x1xf32> to vector<2x16x16xf32>
    %162 = arith.mulf %157, %161 : vector<2x16x16xf32>
    "tpu.trace_start"() <{level = 10 : i32, message = "bnm,bmd->bnd"}> : () -> ()
    %cst_58 = arith.constant dense<0.000000e+00> : vector<2x16x32xf32>
    %163 = tpu.matmul %162, %151, %cst_58 {dimension_numbers = #tpu.dot_dimension_numbers<[2], [1], [1], [2], [0, 0, 0, 1, 1, 2], [0], [0]>} : vector<2x16x16xf32>, vector<2x16x32xf32>, vector<2x16x32xf32> -> vector<2x16x32xf32>
    "tpu.trace_stop"() : () -> ()
    %164 = vector.extract_strided_slice %118 {offsets = [0, 0, 96], sizes = [2, 16, 32], strides = [1, 1, 1]} : vector<2x16x384xf32> to vector<2x16x32xf32>
    %165 = vector.extract_strided_slice %118 {offsets = [0, 0, 224], sizes = [2, 16, 32], strides = [1, 1, 1]} : vector<2x16x384xf32> to vector<2x16x32xf32>
    %166 = vector.extract_strided_slice %118 {offsets = [0, 0, 352], sizes = [2, 16, 32], strides = [1, 1, 1]} : vector<2x16x384xf32> to vector<2x16x32xf32>
    "tpu.trace_start"() <{level = 10 : i32, message = "bnd,bmd->bnm"}> : () -> ()
    %cst_59 = arith.constant dense<0.000000e+00> : vector<2x16x16xf32>
    %167 = tpu.matmul %164, %165, %cst_59 {dimension_numbers = #tpu.dot_dimension_numbers<[2], [2], [1], [1], [0, 0, 0, 1, 1, 1], [0], [0]>} : vector<2x16x32xf32>, vector<2x16x32xf32>, vector<2x16x16xf32> -> vector<2x16x16xf32>
    "tpu.trace_stop"() : () -> ()
    %cst_60 = arith.constant dense<0xFF800000> : vector<2x16xf32>
    %168 = vector.multi_reduction <maximumf>, %167, %cst_60 [2] : vector<2x16x16xf32> to vector<2x16xf32>
    %169 = vector.shape_cast %168 : vector<2x16xf32> to vector<2x16x1xf32>
    %170 = vector.broadcast %169 : vector<2x16x1xf32> to vector<2x16x16xf32>
    %171 = arith.subf %167, %170 : vector<2x16x16xf32>
    %172 = math.exp %171 : vector<2x16x16xf32>
    %cst_61 = arith.constant dense<0.000000e+00> : vector<2x16xf32>
    %173 = vector.multi_reduction <add>, %172, %cst_61 [2] : vector<2x16x16xf32> to vector<2x16xf32>
    %174 = vector.shape_cast %173 : vector<2x16xf32> to vector<2x16x1xf32>
    %175 = tpu.reciprocal %174 {approx = true} : vector<2x16x1xf32> -> vector<2x16x1xf32>
    %176 = vector.broadcast %175 : vector<2x16x1xf32> to vector<2x16x16xf32>
    %177 = arith.mulf %172, %176 : vector<2x16x16xf32>
    "tpu.trace_start"() <{level = 10 : i32, message = "bnm,bmd->bnd"}> : () -> ()
    %cst_62 = arith.constant dense<0.000000e+00> : vector<2x16x32xf32>
    %178 = tpu.matmul %177, %166, %cst_62 {dimension_numbers = #tpu.dot_dimension_numbers<[2], [1], [1], [2], [0, 0, 0, 1, 1, 2], [0], [0]>} : vector<2x16x16xf32>, vector<2x16x32xf32>, vector<2x16x32xf32> -> vector<2x16x32xf32>
    "tpu.trace_stop"() : () -> ()
    %179 = tpu.concatenate %133, %148, %163, %178 in 2 : vector<2x16x32xf32>, vector<2x16x32xf32>, vector<2x16x32xf32>, vector<2x16x32xf32> -> vector<2x16x128xf32>
    %180 = vector.shape_cast %179 : vector<2x16x128xf32> to vector<32x128xf32>
    %c1_63 = arith.constant 1 : index
    %c0_64 = arith.constant 0 : index
    %c0_65 = arith.constant 0 : index
    %181 = vector.load %arg6[%c1_63, %c0_64, %c0_65] : memref<2x3x128xf32, #tpu.memory_space<vmem>>, vector<1x3x128xf32>
    %182 = vector.shape_cast %181 : vector<1x3x128xf32> to vector<3x128xf32>
    %c1_66 = arith.constant 1 : index
    %c0_67 = arith.constant 0 : index
    %c0_68 = arith.constant 0 : index
    %183 = vector.load %arg5[%c1_66, %c0_67, %c0_68] : memref<2x128x128xf32, #tpu.memory_space<vmem>>, vector<1x128x128xf32>
    %184 = vector.shape_cast %183 : vector<1x128x128xf32> to vector<128x128xf32>
    %cst_69 = arith.constant dense<0.000000e+00> : vector<32x128xf32>
    %185 = tpu.matmul %180, %184, %cst_69 {dimension_numbers = #tpu.dot_dimension_numbers<[1], [0], [0], [1], [0, 0, 1, 1], [], []>} : vector<32x128xf32>, vector<128x128xf32>, vector<32x128xf32> -> vector<32x128xf32>
    %186 = vector.extract_strided_slice %182 {offsets = [0, 0], sizes = [1, 128], strides = [1, 1]} : vector<3x128xf32> to vector<1x128xf32>
    %187 = vector.broadcast %186 : vector<1x128xf32> to vector<32x128xf32>
    %188 = arith.addf %185, %187 : vector<32x128xf32>
    %189 = arith.addf %188, %110 : vector<32x128xf32>
    %190 = vector.extract_strided_slice %182 {offsets = [1, 0], sizes = [1, 128], strides = [1, 1]} : vector<3x128xf32> to vector<1x128xf32>
    %191 = vector.extract_strided_slice %182 {offsets = [2, 0], sizes = [1, 128], strides = [1, 1]} : vector<3x128xf32> to vector<1x128xf32>
    %cst_70 = arith.constant dense<0.000000e+00> : vector<32xf32>
    %192 = vector.multi_reduction <add>, %189, %cst_70 [1] : vector<32x128xf32> to vector<32xf32>
    %193 = vector.shape_cast %192 : vector<32xf32> to vector<32x1xf32>
    %cst_71 = arith.constant 1.280000e+02 : f32
    %194 = vector.broadcast %cst_71 : f32 to vector<32x1xf32>
    %195 = arith.divf %193, %194 : vector<32x1xf32>
    %196 = vector.broadcast %195 : vector<32x1xf32> to vector<32x128xf32>
    %197 = arith.subf %189, %196 : vector<32x128xf32>
    %198 = arith.mulf %197, %197 : vector<32x128xf32>
    %cst_72 = arith.constant dense<0.000000e+00> : vector<32xf32>
    %199 = vector.multi_reduction <add>, %198, %cst_72 [1] : vector<32x128xf32> to vector<32xf32>
    %200 = vector.shape_cast %199 : vector<32xf32> to vector<32x1xf32>
    %cst_73 = arith.constant 1.280000e+02 : f32
    %201 = vector.broadcast %cst_73 : f32 to vector<32x1xf32>
    %202 = arith.divf %200, %201 : vector<32x1xf32>
    %203 = vector.broadcast %195 : vector<32x1xf32> to vector<32x128xf32>
    %204 = arith.subf %189, %203 : vector<32x128xf32>
    %cst_74 = arith.constant 9.99999974E-6 : f32
    %205 = vector.broadcast %cst_74 : f32 to vector<32x1xf32>
    %206 = arith.addf %202, %205 : vector<32x1xf32>
    %207 = math.rsqrt %206 : vector<32x1xf32>
    %208 = vector.broadcast %207 : vector<32x1xf32> to vector<32x128xf32>
    %209 = arith.mulf %204, %208 : vector<32x128xf32>
    %210 = vector.broadcast %190 : vector<1x128xf32> to vector<32x128xf32>
    %211 = arith.mulf %209, %210 : vector<32x128xf32>
    %212 = vector.broadcast %191 : vector<1x128xf32> to vector<32x128xf32>
    %213 = arith.addf %211, %212 : vector<32x128xf32>
    %c0_75 = arith.constant 0 : index
    %c0_76 = arith.constant 0 : index
    %214 = vector.load %arg8[%c0_75, %c0_76] : memref<3x128xf32, #tpu.memory_space<vmem>>, vector<3x128xf32>
    %c0_77 = arith.constant 0 : index
    %c0_78 = arith.constant 0 : index
    %215 = vector.load %arg7[%c0_77, %c0_78] : memref<128x128xf32, #tpu.memory_space<vmem>>, vector<128x128xf32>
    %cst_79 = arith.constant dense<0.000000e+00> : vector<32x128xf32>
    %216 = tpu.matmul %213, %215, %cst_79 {dimension_numbers = #tpu.dot_dimension_numbers<[1], [0], [0], [1], [0, 0, 1, 1], [], []>} : vector<32x128xf32>, vector<128x128xf32>, vector<32x128xf32> -> vector<32x128xf32>
    %217 = vector.extract_strided_slice %214 {offsets = [0, 0], sizes = [1, 128], strides = [1, 1]} : vector<3x128xf32> to vector<1x128xf32>
    %218 = vector.broadcast %217 : vector<1x128xf32> to vector<32x128xf32>
    %219 = arith.addf %216, %218 : vector<32x128xf32>
    %cst_80 = arith.constant 0.000000e+00 : f32
    %220 = vector.broadcast %cst_80 : f32 to vector<32x128xf32>
    %221 = arith.maximumf %219, %220 : vector<32x128xf32>
    %222 = vector.extract_strided_slice %214 {offsets = [1, 0], sizes = [1, 128], strides = [1, 1]} : vector<3x128xf32> to vector<1x128xf32>
    %223 = vector.extract_strided_slice %214 {offsets = [2, 0], sizes = [1, 128], strides = [1, 1]} : vector<3x128xf32> to vector<1x128xf32>
    %cst_81 = arith.constant dense<0.000000e+00> : vector<32xf32>
    %224 = vector.multi_reduction <add>, %221, %cst_81 [1] : vector<32x128xf32> to vector<32xf32>
    %225 = vector.shape_cast %224 : vector<32xf32> to vector<32x1xf32>
    %cst_82 = arith.constant 1.280000e+02 : f32
    %226 = vector.broadcast %cst_82 : f32 to vector<32x1xf32>
    %227 = arith.divf %225, %226 : vector<32x1xf32>
    %228 = vector.broadcast %227 : vector<32x1xf32> to vector<32x128xf32>
    %229 = arith.subf %221, %228 : vector<32x128xf32>
    %230 = arith.mulf %229, %229 : vector<32x128xf32>
    %cst_83 = arith.constant dense<0.000000e+00> : vector<32xf32>
    %231 = vector.multi_reduction <add>, %230, %cst_83 [1] : vector<32x128xf32> to vector<32xf32>
    %232 = vector.shape_cast %231 : vector<32xf32> to vector<32x1xf32>
    %cst_84 = arith.constant 1.280000e+02 : f32
    %233 = vector.broadcast %cst_84 : f32 to vector<32x1xf32>
    %234 = arith.divf %232, %233 : vector<32x1xf32>
    %235 = vector.broadcast %227 : vector<32x1xf32> to vector<32x128xf32>
    %236 = arith.subf %221, %235 : vector<32x128xf32>
    %cst_85 = arith.constant 9.99999974E-6 : f32
    %237 = vector.broadcast %cst_85 : f32 to vector<32x1xf32>
    %238 = arith.addf %234, %237 : vector<32x1xf32>
    %239 = math.rsqrt %238 : vector<32x1xf32>
    %240 = vector.broadcast %239 : vector<32x1xf32> to vector<32x128xf32>
    %241 = arith.mulf %236, %240 : vector<32x128xf32>
    %242 = vector.broadcast %222 : vector<1x128xf32> to vector<32x128xf32>
    %243 = arith.mulf %241, %242 : vector<32x128xf32>
    %244 = vector.broadcast %223 : vector<1x128xf32> to vector<32x128xf32>
    %245 = arith.addf %243, %244 : vector<32x128xf32>
    %c0_86 = arith.constant 0 : index
    %c0_87 = arith.constant 0 : index
    %246 = vector.load %arg9[%c0_86, %c0_87] : memref<32x128xf32, #tpu.memory_space<vmem>>, vector<32x128xf32>
    tpu.vector_store %arg9[%c0_86, %c0_87], %245 {strides = array<i32>} : memref<32x128xf32, #tpu.memory_space<vmem>>, vector<32x128xf32>,
    return
  }
}

</mosaic_0001>

<bundles_post_ra>
// kernel: tpu_custom_call.1
= control target key start
LH: loop header
LB: loop body
LE: loop exit
PB: predicated region body
PF: predicated region fallthrough
CT: control target
= control target key end

     0   :  { %14 = vsyncpa [#allocation3], 0  ;;  %s3784_s0 = inlined_call_operand.vmem [shape: f32[32,8], index: 0, kind: input, shape index: {}]   ;;  %s3785_s1 = inlined_call_operand.vmem [shape: f32[8,128], index: 1, kind: input, shape index: {}]   ;;  %s3786_s2 = inlined_call_operand.vmem [shape: f32[1,128], index: 2, kind: input, shape index: {}]   ;;  %s3787_s3 = inlined_call_operand.hbm [shape: f32[2,128,384], index: 3, kind: input, shape index: {}]   ;;  %s3788_s4 = inlined_call_operand.vmem [shape: f32[2,1,384], index: 4, kind: input, shape index: {}]   ;;  %s3789_s5 = inlined_call_operand.hbm [shape: f32[2,128,128], index: 5, kind: input, shape index: {}]   ;;  %s3790_s6 = inlined_call_operand.vmem [shape: f32[2,3,128], index: 6, kind: input, shape index: {}]   ;;  %s3791_s7 = inlined_call_operand.hbm [shape: f32[128,128], index: 7, kind: input, shape index: {}]   ;;  %s3792_s8 = inlined_call_operand.vmem [shape: f32[3,128], index: 8, kind: input, shape index: {}]   ;;  %s3793_s9 = inlined_call_operand.hbm [shape: f32[32,128], index: 9, kind: output, shape index: {}]  }
   0x1   :  { %15 = vsyncpa [#allocation6], 0  ;;  %s42_s11 = sshll.u32 %s3789_s5, 4  ;;  %s43_s11 = int_to_ptr.hbm [resolvable:$true] %s42_s11 }
   0x2   :  { %16 = vsyncpa [#allocation4], 0  ;;  %s2980_s12 = smov [#allocation5]   ;;  %s27_s16 = sshll.u32 %s3787_s3, 4  ;;  %s28_s16 = int_to_ptr.hbm [resolvable:$true] %s27_s16 }
   0x3   :  { %s44_s13 = sshll.u32 %s2980_s12, 4  ;;  %s2981_s17 = smov 128   ;;  %s45_s13 = int_to_ptr.vmem [resolvable:$true] %s44_s13 }
   0x4   :  { %s2982_s18 = smov 8   ;;  %s2983_s19 = smov [#allocation2]  }
   0x5   :  { %50 = dma.hbm_to_vmem [thread:$0]  %s43_s11, 4096, %s45_s13, [#allocation6], %s2981_s17, %s2981_s17, %s2982_s18  }
   0x6   :  { %s29_s20 = sshll.u32 %s2983_s19, 4  ;;  %s2984_s5 = smov 384   ;;  %s30_s20 = int_to_ptr.vmem [resolvable:$true] %s29_s20 }
   0x7   :  { %s2985_s21 = smov 24   ;;  %s57_s24 = sshll.u32 %s3791_s7, 4  ;;  %s58_s24 = int_to_ptr.hbm [resolvable:$true] %s57_s24 }
   0x8   :  { %35 = dma.hbm_to_vmem [thread:$0]  %s28_s16, 12288, %s30_s20, [#allocation3], %s2984_s5, %s2984_s5, %s2985_s21  }
   0x9   :  { %s2986_s25 = smov [#allocation7]  }
   0xa   :  { %s59_s3 = sshll.u32 %s2986_s25, 4  ;;  %s60_s3 = int_to_ptr.vmem [resolvable:$true] %s59_s3 }
   0xb   :  { %65 = dma.hbm_to_vmem [thread:$0]  %s58_s24, 2048, %s60_s3, [#allocation6], %s2981_s17, %s2981_s17, %s2982_s18  }
   0xc   :  { %2974 = dma.done.wait [#allocation3], 12288  }
   0xd   :  { %2975 = vsyncadd [#allocation3], 4294955008 }
   0xe   :  { %2976 = dma.done.wait [#allocation6], 6144  }
   0xf   :  { %2977 = vsyncadd [#allocation6], 4294961152  ;;  %vm89_vm0 = vcmask 64512   ;;  %v84_v0 = vld [vmem:[%s3785_s1] sm:$0xff]  ;;  %v180_v2 = vld [vmem:[#allocation2 + $0x168] sm:$0xff]  ;;  %s2987_s15 = smov 96  }
  0x10   :  { %v80_v1 = vld [vmem:[%s3784_s0] sm:$0xff]  ;;  %117 = vmatpush.msra.mxu1 %v84_v0  ;;  %v181_v3 = vld [vmem:[#allocation2 + $0x170] sm:$0xff]  ;;  %v178_v5 = vld [vmem:[#allocation2 + $0x158] sm:$0xff]  ;;  %vm278_vm1 = vcmask 261120   ;;  %s2988_s16 = smov 64   ;;  %s2989_s19 = smov 32  }
  0x11   :  { %2507 = vmatmul.msk.f32.vlgmr.msra.gmra.mxu1 %vm89_vm0, %v80_v1  ;;  %v177_v4 = vld [vmem:[#allocation2 + $0x150] sm:$0xff]  ;;  %220 = vmatpush.msra.mxu2 %v181_v3  ;;  %v174_v6 = vld [vmem:[#allocation2 + $0x138] sm:$0xff]  ;;  %v175_v7 = vld [vmem:[#allocation2 + $0x140] sm:$0xff]  ;;  %vm349_vm2 = vcmask 130048   ;;  %vm1084_vm3 = vcmask 523264   ;;  %vm1089_vm4 = vcmask 785408  }
  0x12   :  { %191 = vmatpush.msrb.mxu1 %v180_v2  ;;  %v171_v8 = vld [vmem:[#allocation2 + $0x120] sm:$0xff]  ;;  %v172_v9 = vld [vmem:[#allocation2 + $0x128] sm:$0xff]  ;;  %v3067_v11 = vld [vmem:[#allocation2 + $0x178] sm:$0xff]  ;;  %s2493_s27 = sshll.u32 %s3793_s9, 4  ;;  %s2494_s27 = int_to_ptr.hbm [resolvable:$true] %s2493_s27 }
  0x13   :  { %221 = vmatpush.msra.mxu2 %v178_v5  ;;  %v81_v10 = vld [vmem:[%s3784_s0 + $0x8] sm:$0xff]  ;;  %v169_v13 = vld [vmem:[#allocation2 + $0x110] sm:$0xff]  ;;  %2610 = vmatpush.msra.mxu3 %v3067_v11  ;;  %v3070_v14 = vld [vmem:[#allocation2 + $0x160] sm:$0xff] }
  0x14   :  { %192 = vmatpush.msrb.mxu1 %v177_v4  ;;  %v168_v12 = vld [vmem:[#allocation2 + $0x108] sm:$0xff]  ;;  %v165_v16 = vld [vmem:[#allocation2 + $0xf0] sm:$0xff]  ;;  %v166_v17 = vld [vmem:[#allocation2 + $0xf8] sm:$0xff] }
  0x15   :  { %222 = vmatpush.msra.mxu2 %v175_v7  ;;  %v3072_v15 = vld [vmem:[#allocation2 + $0x148] sm:$0xff]  ;;  %2612 = vmatpush.msra.mxu3 %v3070_v14  ;;  %v3076_v18 = vld [vmem:[#allocation2 + $0x130] sm:$0xff]  ;;  %v162_v19 = vld [vmem:[#allocation2 + $0xd8] sm:$0xff] }
  0x16   :  { %193 = vmatpush.msrb.mxu1 %v174_v6  ;;  %v163_v20 = vld [vmem:[#allocation2 + $0xe0] sm:$0xff]  ;;  %v3079_v21 = vld [vmem:[#allocation2 + $0x118] sm:$0xff]  ;;  %v160_v23 = vld [vmem:[#allocation2 + $0xc8] sm:$0xff] }
  0x17   :  { %223 = vmatpush.msra.mxu2 %v172_v9  ;;  %2614 = vmatpush.msra.mxu3 %v3072_v15  ;;  %v159_v22 = vld [vmem:[#allocation2 + $0xc0] sm:$0xff]  ;;  %v82_v24 = vld [vmem:[%s3784_s0 + $0x10] sm:$0xff]  ;;  %v156_v25 = vld [vmem:[#allocation2 + $0xa8] sm:$0xff] }
  0x18   :  { %194 = vmatpush.msrb.mxu1 %v171_v8  ;;  %v157_v26 = vld [vmem:[#allocation2 + $0xb0] sm:$0xff]  ;;  %v154_v28 = vld [vmem:[#allocation2 + $0x98] sm:$0xff]  ;;  %v151_v30 = vld [vmem:[#allocation2 + $0x80] sm:$0xff] }
  0x19   :  { %2508 = vmatmul.msk.f32.gmra.mxu1 %vm89_vm0, %v81_v10  ;;  %224 = vmatpush.msra.mxu2 %v169_v13  ;;  %v153_v27 = vld [vmem:[#allocation2 + $0x90] sm:$0xff]  ;;  %v150_v29 = vld [vmem:[#allocation2 + $0x78] sm:$0xff]  ;;  %v147_v31 = vld [vmem:[#allocation2 + $0x60] sm:$0xff] }
  0x1a   :  { %195 = vmatpush.msrb.mxu1 %v168_v12  ;;  %2616 = vmatpush.msra.mxu3 %v3076_v18  ;;  %v148_v32 = vld [vmem:[#allocation2 + $0x68] sm:$0xff]  ;;  %v83_v33 = vld [vmem:[%s3784_s0 + $0x18] sm:$0xff]  ;;  %v145_v35 = vld [vmem:[#allocation2 + $0x50] sm:$0xff] }
  0x1b   :  { %225 = vmatpush.msra.mxu2 %v166_v17  ;;  %v144_v34 = vld [vmem:[#allocation2 + $0x48] sm:$0xff]  ;;  %v141_v36 = vld [vmem:[#allocation2 + $0x30] sm:$0xff]  ;;  %v142_v37 = vld [vmem:[#allocation2 + $0x38] sm:$0xff] }
  0x1c   :  { %196 = vmatpush.msrb.mxu1 %v165_v16  ;;  %2618 = vmatpush.msra.mxu3 %v3079_v21  ;;  %v167_v38 = vld [vmem:[#allocation2 + $0x100] sm:$0xff]  ;;  %v138_v39 = vld [vmem:[#allocation2 + $0x18] sm:$0xff]  ;;  %v164_v41 = vld [vmem:[#allocation2 + $0xe8] sm:$0xff] }
  0x1d   :  { %226 = vmatpush.msra.mxu2 %v163_v20  ;;  %v139_v40 = vld [vmem:[#allocation2 + $0x20] sm:$0xff]  ;;  %v136_v43 = vld [vmem:[#allocation2 + $0x8] sm:$0xff]  ;;  %v161_v44 = vld [vmem:[#allocation2 + $0xd0] sm:$0xff] }
  0x1e   :  { %197 = vmatpush.msrb.mxu1 %v162_v19  ;;  %2620 = vmatpush.msra.mxu3 %v167_v38  ;;  %v135_v42 = vld [vmem:[#allocation2] sm:$0xff]  ;;  %v158_v45 = vld [vmem:[#allocation2 + $0xb8] sm:$0xff]  ;;  %v152_v47 = vld [vmem:[#allocation2 + $0x88] sm:$0xff] }
  0x1f   :  { %227 = vmatpush.msra.mxu2 %v160_v23  ;;  %v155_v46 = vld [vmem:[#allocation2 + $0xa0] sm:$0xff]  ;;  %v149_v48 = vld [vmem:[#allocation2 + $0x70] sm:$0xff]  ;;  %v146_v49 = vld [vmem:[#allocation2 + $0x58] sm:$0xff] }
  0x20   :  { %198 = vmatpush.msrb.mxu1 %v159_v22  ;;  %2622 = vmatpush.msra.mxu3 %v164_v41  ;;  %v143_v50 = vld [vmem:[#allocation2 + $0x40] sm:$0xff]  ;;  %v140_v51 = vld [vmem:[#allocation2 + $0x28] sm:$0xff]  ;;  %v137_v52 = vld [vmem:[#allocation2 + $0x10] sm:$0xff] }
  0x21   :  { %2509 = vmatmul.msk.f32.gmra.mxu1 %vm89_vm0, %v82_v24  ;;  %228 = vmatpush.msra.mxu2 %v157_v26  ;;  %v2723_v53 = vld [vmem:[%s3786_s2] ss:$0 sm:$0xff] }
  0x22   :  { %199 = vmatpush.msrb.mxu1 %v156_v25  ;;  %2624 = vmatpush.msra.mxu3 %v161_v44  ;;  %v183_v2 = vld [vmem:[%s3788_s4] sm:$0x7] }
  0x23   :  { %229 = vmatpush.msra.mxu2 %v154_v28  ;;  %v185_v3 = vperm.slane %v183_v2, 0  ;;  %v186_v9 = vperm.slane %v183_v2, 1  ;;  %v187_v19 = vperm.slane %v183_v2, 2 }
  0x24   :  { %200 = vmatpush.msrb.mxu1 %v153_v27  ;;  %2626 = vmatpush.msra.mxu3 %v158_v45 }
  0x25   :  { %230 = vmatpush.msra.mxu2 %v151_v30 }
  0x26   :  { %201 = vmatpush.msrb.mxu1 %v150_v29  ;;  %2628 = vmatpush.msra.mxu3 %v155_v46 }
  0x27   :  { %231 = vmatpush.msra.mxu2 %v148_v32 }
  0x28   :  { %202 = vmatpush.msrb.mxu1 %v147_v31  ;;  %2630 = vmatpush.msra.mxu3 %v152_v47 }
  0x29   :  { %2510 = vmatmul.msk.f32.gmra.mxu1 %vm89_vm0, %v83_v33  ;;  %232 = vmatpush.msra.mxu2 %v145_v35 }
  0x2a   :  { %203 = vmatpush.msrb.mxu1 %v144_v34  ;;  %2632 = vmatpush.msra.mxu3 %v149_v48 }
  0x2b   :  { %233 = vmatpush.msra.mxu2 %v142_v37 }
  0x2c   :  { %204 = vmatpush.msrb.mxu1 %v141_v36  ;;  %2634 = vmatpush.msra.mxu3 %v146_v49 }
  0x2d   :  { %234 = vmatpush.msra.mxu2 %v139_v40 }
  0x2e   :  { %205 = vmatpush.msrb.mxu1 %v138_v39  ;;  %2636 = vmatpush.msra.mxu3 %v143_v50 }
  0x2f   :  { %235 = vmatpush.msra.mxu2 %v136_v43 }
  0x30   :  { %206 = vmatpush.msrb.mxu1 %v135_v42  ;;  %2638 = vmatpush.msra.mxu3 %v140_v51 }
  0x31   :  { %2609 = vmatpush.msrb.mxu2 %v3067_v11 }
  0x32   :  { %249 = vmatpush.msra.mxu1 %v3067_v11  ;;  %2640 = vmatpush.msra.mxu3 %v137_v52 }
  0x33   :  { %2611 = vmatpush.msrb.mxu2 %v3070_v14 }
  0x34   :  { %250 = vmatpush.msra.mxu1 %v3070_v14 }
  0x35   :  { %2613 = vmatpush.msrb.mxu2 %v3072_v15 }
  0x36   :  { %251 = vmatpush.msra.mxu1 %v3072_v15 }
  0x37   :  { %2615 = vmatpush.msrb.mxu2 %v3076_v18 }
  0x38   :  { %252 = vmatpush.msra.mxu1 %v3076_v18 }
  0x39   :  { %2617 = vmatpush.msrb.mxu2 %v3079_v21 }
  0x3a   :  { %253 = vmatpush.msra.mxu1 %v3079_v21 }
  0x3b   :  { %2619 = vmatpush.msrb.mxu2 %v167_v38 }
  0x3c   :  { %254 = vmatpush.msra.mxu1 %v167_v38 }
  0x3d   :  { %2621 = vmatpush.msrb.mxu2 %v164_v41 }
  0x3e   :  { %255 = vmatpush.msra.mxu1 %v164_v41 }
  0x3f   :  { %2623 = vmatpush.msrb.mxu2 %v161_v44 }
  0x40   :  { %256 = vmatpush.msra.mxu1 %v161_v44 }
  0x41   :  { %2625 = vmatpush.msrb.mxu2 %v158_v45 }
  0x42   :  { %257 = vmatpush.msra.mxu1 %v158_v45 }
  0x43   :  { %2627 = vmatpush.msrb.mxu2 %v155_v46 }
  0x44   :  { %258 = vmatpush.msra.mxu1 %v155_v46 }
  0x45   :  { %2629 = vmatpush.msrb.mxu2 %v152_v47 }
  0x46   :  { %259 = vmatpush.msra.mxu1 %v152_v47 }
  0x47   :  { %2631 = vmatpush.msrb.mxu2 %v149_v48 }
  0x48   :  { %260 = vmatpush.msra.mxu1 %v149_v48 }
  0x49   :  { %2633 = vmatpush.msrb.mxu2 %v146_v49 }
  0x4a   :  { %261 = vmatpush.msra.mxu1 %v146_v49 }
  0x4b   :  { %2635 = vmatpush.msrb.mxu2 %v143_v50 }
  0x4c   :  { %262 = vmatpush.msra.mxu1 %v143_v50 }
  0x4d   :  { %2637 = vmatpush.msrb.mxu2 %v140_v51 }
  0x4e   :  { %263 = vmatpush.msra.mxu1 %v140_v51 }
  0x4f   :  { %2639 = vmatpush.msrb.mxu2 %v137_v52 }
  0x50   :  { %264 = vmatpush.msra.mxu1 %v137_v52 }
  0x8e   :  { %v119_v54 = vpop.f32.mrf.mxu1 }
  0x8f   :  { %v120_v55 = vadd.f32 %v2723_v53, %v119_v54 }
  0x91   :  { %v3104_v56 = vmax.f32 %v120_v55, 0.0 }
  0x93   :  { %207 = vmatmul.f32.vlgmr.msrb.gmra.mxu1 %v3104_v56  ;;  %236 = vmatmul.f32.vlgmr.msra.gmra.mxu2 %v3104_v56 }
  0x96   :  { %v122_v57 = vpop.f32.mrf.mxu1 }
  0x97   :  { %v123_v58 = vadd.f32 %v2723_v53, %v122_v57 }
  0x99   :  { %v3108_v59 = vmax.f32 %v123_v58, 0.0 }
  0x9b   :  { %210 = vmatmul.f32.gmra.mxu1 %v3108_v59  ;;  %239 = vmatmul.f32.gmra.mxu2 %v3108_v59 }
  0x9e   :  { %v125_v60 = vpop.f32.mrf.mxu1 }
  0x9f   :  { %v126_v61 = vadd.f32 %v2723_v53, %v125_v60 }
  0xa1   :  { %v3112_v62 = vmax.f32 %v126_v61, 0.0 }
  0xa3   :  { %213 = vmatmul.f32.gmra.mxu1 %v3112_v62  ;;  %242 = vmatmul.f32.gmra.mxu2 %v3112_v62 }
  0xa4   :  { %271 = vmatmul.f32.vlgmr.msra.gmra.mxu3 %v3112_v62 }
  0xa6   :  { %v128_v63 = vpop.f32.mrf.mxu1 }
  0xa7   :  { %v129_v0 = vadd.f32 %v2723_v53, %v128_v63 }
  0xa9   :  { %v3117_v1 = vmax.f32 %v129_v0, 0.0 }
  0xab   :  { %216 = vmatmul.f32.gmra.mxu1 %v3117_v1  ;;  %245 = vmatmul.f32.gmra.mxu2 %v3117_v1 }
  0xac   :  { %274 = vmatmul.f32.gmra.mxu3 %v3117_v1 }
  0xb3   :  { %265 = vmatmul.f32.vlgmr.msra.gmra.mxu1 %v3104_v56  ;;  %268 = vmatmul.f32.vlgmr.msrb.gmra.mxu2 %v3108_v59 }
 0x110   :  { %v208_v4 = vpop.f32.mrf.mxu1 }
 0x111   :  { %v209_v5 = vadd.f32 %v208_v4, %v185_v3 }
 0x113   :  { %452 = vrot.lane.b32.xlu1 %v209_v5, %s2987_s15 }
 0x116   :  { %v237_v6 = vpop.f32.mrf.mxu2 }
 0x117   :  { %v238_v13 = vadd.f32 %v237_v6, %v186_v9 }
 0x118   :  { %v211_v7 = vpop.f32.mrf.mxu1 }
 0x119   :  { %v212_v8 = vadd.f32 %v211_v7, %v185_v3 }
 0x11b   :  { %454 = vrot.lane.b32.xlu1 %v212_v8, %s2987_s15 }
 0x11e   :  { %v240_v10 = vpop.f32.mrf.mxu2 }
 0x11f   :  { %v241_v11 = vadd.f32 %v240_v10, %v186_v9 }
 0x120   :  { %v214_v12 = vpop.f32.mrf.mxu1 }
 0x121   :  { %654 = vrot.lane.b32.xlu2 %v241_v11, %s2988_s16  ;;  %458 = vrot.lane.b32.xlu0 %v241_v11, %s2987_s15  ;;  %v215_v14 = vadd.f32 %v214_v12, %v185_v3 }
 0x122   :  { %2511 = vmatpush.xpose.msk.msra.mxu0 %vm278_vm1, %v241_v11 }
 0x123   :  { %652 = vrot.lane.b32.xlu1 %v238_v13, %s2988_s16 }
 0x126   :  { %2512 = vmatpush.xpose.msk.msra.mxu0 %vm278_vm1, %v238_v13  ;;  %v243_v15 = vpop.f32.mrf.mxu2 }
 0x127   :  { %v272_v16 = vpop.f32.mrf.mxu3  ;;  %v244_v26 = vadd.f32 %v243_v15, %v186_v9 }
 0x128   :  { %v217_v17 = vpop.f32.mrf.mxu1  ;;  %v273_v20 = vadd.f32 %v272_v16, %v187_v19 }
 0x129   :  { %v218_v18 = vadd.f32 %v217_v17, %v185_v3  ;;  %2513 = vmatmul.msk.f32.vlgmr.msra.gmra.mxu0 %vm278_vm1, %v209_v5  ;;  %456 = vrot.lane.b32.xlu0 %v238_v13, %s2987_s15 }
 0x12a   :  { %491 = vrot.lane.b32.xlu2 %v215_v14, %s2987_s15 }
 0x12b   :  { %493 = vrot.lane.b32.xlu1 %v218_v18, %s2987_s15 }
 0x12e   :  { %v246_v21 = vpop.f32.mrf.mxu2 }
 0x12f   :  { %v247_v22 = vadd.f32 %v246_v21, %v186_v9  ;;  %v275_v23 = vpop.f32.mrf.mxu3 }
 0x130   :  { %v276_v24 = vadd.f32 %v275_v23, %v187_v19  ;;  %v266_v27 = vpop.f32.mrf.mxu1 }
 0x131   :  { %2514 = vmatmul.msk.f32.gmra.mxu0 %vm278_vm1, %v212_v8  ;;  %648 = vrot.lane.b32.xlu0 %v209_v5, %s2988_s16  ;;  %v267_v29 = vadd.f32 %v266_v27, %v187_v19 }
 0x132   :  { %2515 = vmatpush.xpose.msk.msrb.mxu0 %vm278_vm1, %v247_v22  ;;  %443 = vmatpush.msra.mxu2 %v276_v24  ;;  %v3141_v25 = vpack.i.bf16 %v273_v20, %v276_v24 }
 0x133   :  { %497 = vrot.lane.b32.xlu2 %v247_v22, %s2987_s15  ;;  %846 = vrot.lane.b32.xlu1 %v241_v11, %s2989_s19 }
 0x134   :  { %444 = vmatpush.msra.mxu2 %v273_v20 }
 0x136   :  { %2516 = vmatpush.xpose.msk.msrb.mxu0 %vm278_vm1, %v244_v26  ;;  %v269_v28 = vpop.f32.mrf.mxu2 }
 0x137   :  { %v270_v30 = vadd.f32 %v269_v28, %v187_v19 }
 0x139   :  { %2517 = vmatmul.msk.f32.vlgmr.msrb.gmra.mxu0 %vm278_vm1, %v215_v14  ;;  %414 = vmatpush.msrb.mxu1 %v270_v30  ;;  %v3147_v31 = vpack.i.bf16 %v267_v29, %v270_v30 }
 0x13a   :  { %495 = vrot.lane.b32.xlu0 %v244_v26, %s2987_s15 }
 0x13b   :  { %650 = vrot.lane.b32.xlu2 %v212_v8, %s2988_s16  ;;  %415 = vmatpush.msrb.mxu1 %v267_v29 }
 0x13c   :  { %687 = vrot.lane.b32.xlu1 %v215_v14, %s2988_s16 }
 0x141   :  { %2518 = vmatmul.msk.f32.gmra.mxu0 %vm278_vm1, %v218_v18 }
 0x142   :  { %693 = vrot.lane.b32.xlu0 %v247_v22, %s2988_s16 }
 0x143   :  { %691 = vrot.lane.b32.xlu2 %v244_v26, %s2988_s16 }
 0x144   :  { %842 = vrot.lane.b32.xlu1 %v212_v8, %s2989_s19 }
 0x14a   :  { %844 = vrot.lane.b32.xlu0 %v238_v13, %s2989_s19 }
 0x14b   :  { %840 = vrot.lane.b32.xlu2 %v209_v5, %s2989_s19 }
 0x14c   :  { %879 = vrot.lane.b32.xlu1 %v215_v14, %s2989_s19 }
 0x152   :  { %689 = vrot.lane.b32.xlu0 %v218_v18, %s2988_s16 }
 0x153   :  { %885 = vrot.lane.b32.xlu2 %v247_v22, %s2989_s19 }
 0x154   :  { %2654 = vrot.lane.b32.xlu1 %v3141_v25, %s2987_s15 }
 0x15a   :  { %883 = vrot.lane.b32.xlu0 %v244_v26, %s2989_s19 }
 0x15b   :  { %881 = vrot.lane.b32.xlu2 %v218_v18, %s2989_s19 }
 0x163   :  { %2659 = vrot.lane.b32.xlu2 %v3147_v31, %s2987_s15 }
 0x17b   :  { %v655_v32 = vpop.permute.xlu2 %654 }
 0x184   :  { %v492_v33 = vpop.permute.xlu2 %491 }
 0x185   :  { %v453_v34 = vpop.permute.xlu1 %452 }
 0x18d   :  { %v498_v35 = vpop.permute.xlu2 %497  ;;  %v455_v36 = vpop.permute.xlu1 %454 }
 0x18e   :  { %2527 = vmatpush.xpose.msk.msra.mxu0 %vm278_vm1, %v498_v35 }
 0x193   :  { %v459_v37 = vpop.permute.xlu0 %458 }
 0x194   :  { %2523 = vmatpush.xpose.msk.msrb.mxu3 %vm278_vm1, %v459_v37 }
 0x195   :  { %v651_v38 = vpop.permute.xlu2 %650  ;;  %v653_v39 = vpop.permute.xlu1 %652 }
 0x19b   :  { %v457_v40 = vpop.permute.xlu0 %456 }
 0x19c   :  { %2524 = vmatpush.xpose.msk.msrb.mxu3 %vm278_vm1, %v457_v40 }
 0x19d   :  { %v692_v41 = vpop.permute.xlu2 %691  ;;  %v494_v42 = vpop.permute.xlu1 %493 }
 0x19f   :  { %2525 = vmatmul.msk.f32.vlgmr.msrb.gmra.mxu3 %vm278_vm1, %v453_v34 }
 0x1a0   :  { %2535 = vmatpush.xpose.msk.msra.mxu3 %vm278_vm1, %v655_v32 }
 0x1a3   :  { %v649_v43 = vpop.permute.xlu0 %648 }
 0x1a4   :  { %2536 = vmatpush.xpose.msk.msra.mxu3 %vm278_vm1, %v653_v39 }
 0x1a5   :  { %v841_v44 = vpop.permute.xlu2 %840  ;;  %v847_v45 = vpop.permute.xlu1 %846 }
 0x1a6   :  { %v308_v46 = vpop.f32.mrf.mxu0 }
 0x1a7   :  { %2526 = vmatmul.msk.f32.gmra.mxu3 %vm278_vm1, %v455_v36  ;;  %v350_v47 = vsel %vm349_vm2, %v308_v46, -inf }
 0x1a8   :  { %2547 = vmatpush.xpose.msk.msrb.mxu3 %vm278_vm1, %v847_v45  ;;  %351 = vmax.xlane.f32.xlu0 %v350_v47 }
 0x1ac   :  { %v496_v48 = vpop.permute.xlu0 %495 }
 0x1ad   :  { %v886_v49 = vpop.permute.xlu2 %885  ;;  %2528 = vmatpush.xpose.msk.msra.mxu0 %vm278_vm1, %v496_v48 }
 0x1ae   :  { %v688_v50 = vpop.permute.xlu1 %687  ;;  %v311_v51 = vpop.f32.mrf.mxu0 }
 0x1af   :  { %2537 = vmatmul.msk.f32.vlgmr.msra.gmra.mxu3 %vm278_vm1, %v649_v43  ;;  %v353_v52 = vsel %vm349_vm2, %v311_v51, -inf }
 0x1b0   :  { %2529 = vmatmul.msk.f32.vlgmr.msra.gmra.mxu0 %vm278_vm1, %v492_v33  ;;  %354 = vmax.xlane.f32.xlu1 %v353_v52 }
 0x1b4   :  { %v694_v53 = vpop.permute.xlu0 %693 }
 0x1b5   :  { %v882_v54 = vpop.permute.xlu2 %881  ;;  %2539 = vmatpush.xpose.msk.msrb.mxu0 %vm278_vm1, %v694_v53 }
 0x1b6   :  { %v843_v55 = vpop.permute.xlu1 %842  ;;  %v343_v57 = vpop.f32.mrf.mxu0 }
 0x1b7   :  { %2538 = vmatmul.msk.f32.gmra.mxu3 %vm278_vm1, %v651_v38  ;;  %v356_v58 = vsel %vm349_vm2, %v343_v57, -inf }
 0x1b8   :  { %2530 = vmatmul.msk.f32.gmra.mxu0 %vm278_vm1, %v494_v42  ;;  %357 = vmax.xlane.f32.xlu2 %v356_v58 }
 0x1b9   :  { %2540 = vmatpush.xpose.msk.msrb.mxu0 %vm278_vm1, %v692_v41 }
 0x1bc   :  { %v845_v60 = vpop.permute.xlu0 %844 }
 0x1bd   :  { %2551 = vmatpush.xpose.msk.msra.mxu0 %vm278_vm1, %v886_v49  ;;  %v2660_v61 = vpop.permute.xlu2 %2659  ;;  %2548 = vmatpush.xpose.msk.msrb.mxu3 %vm278_vm1, %v845_v60 }
 0x1be   :  { %v2661_v63 = vunpack.i.l.bf16 %v2660_v61  ;;  %v880_v0 = vpop.permute.xlu1 %879  ;;  %v346_v2 = vpop.f32.mrf.mxu0  ;;  %v2662_v4 = vunpack.i.h.bf16 %v2660_v61 }
 0x1bf   :  { %v359_v3 = vsel %vm349_vm2, %v346_v2, -inf }
 0x1c0   :  { %602 = vmatpush.msra.mxu1 %v2661_v63  ;;  %2541 = vmatmul.msk.f32.vlgmr.msrb.gmra.mxu0 %vm278_vm1, %v688_v50 }
 0x1c1   :  { %2549 = vmatmul.msk.f32.vlgmr.msrb.gmra.mxu3 %vm278_vm1, %v841_v44  ;;  %360 = vmax.xlane.f32.xlu0 %v359_v3 }
 0x1c2   :  { %603 = vmatpush.msra.mxu1 %v2662_v4 }
 0x1c4   :  { %v690_v5 = vpop.permute.xlu0 %689 }
 0x1c6   :  { %v2655_v6 = vpop.permute.xlu1 %2654 }
 0x1c7   :  { %v2656_v7 = vunpack.i.l.bf16 %v2655_v6  ;;  %v2657_v8 = vunpack.i.h.bf16 %v2655_v6 }
 0x1c8   :  { %2542 = vmatmul.msk.f32.gmra.mxu0 %vm278_vm1, %v690_v5 }
 0x1c9   :  { %2550 = vmatmul.msk.f32.gmra.mxu3 %vm278_vm1, %v843_v55  ;;  %639 = vmatpush.msrb.mxu2 %v2656_v7 }
 0x1cb   :  { %640 = vmatpush.msrb.mxu2 %v2657_v8 }
 0x1cc   :  { %v884_v9 = vpop.permute.xlu0 %883 }
 0x1cd   :  { %2552 = vmatpush.xpose.msk.msra.mxu0 %vm278_vm1, %v884_v9 }
 0x1d0   :  { %2553 = vmatmul.msk.f32.vlgmr.msra.gmra.mxu0 %vm278_vm1, %v880_v0 }
 0x1d8   :  { %2554 = vmatmul.msk.f32.gmra.mxu0 %vm278_vm1, %v882_v54 }
 0x21b   :  { %v352_v10 = vpop.xlane.xlu0 %351 }
 0x21c   :  { %v362_v11 = vsub.f32 %v308_v46, %v352_v10 }
 0x21e   :  { %v366_v12 = vmul.f32 1.442695, %v362_v11 }
 0x220   :  { %2724 = vpow2.f32 %v366_v12 }
 0x222   :  { %v3195_v13 = vpop.f32.mrf.mxu3 }
 0x223   :  { %v355_v14 = vpop.xlane.xlu1 %354  ;;  %v530_v15 = vsel %vm349_vm2, %v3195_v13, -inf }
 0x224   :  { %v363_v16 = vsub.f32 %v311_v51, %v355_v14  ;;  %531 = vmax.xlane.f32.xlu2 %v530_v15 }
 0x226   :  { %v3199_v17 = vpop.eup %2724  ;;  %v368_v18 = vmul.f32 1.442695, %v363_v16 }
 0x227   :  { %v374_v19 = vsel %vm349_vm2, %v3199_v17, 0.0 }
 0x228   :  { %2726 = vpow2.f32 %v368_v18  ;;  %375 = vadd.xlane.f32.xlu0 %v374_v19 }
 0x22a   :  { %v488_v20 = vpop.f32.mrf.mxu3 }
 0x22b   :  { %v358_v21 = vpop.xlane.xlu2 %357  ;;  %v533_v22 = vsel %vm349_vm2, %v488_v20, -inf }
 0x22c   :  { %534 = vmax.xlane.f32.xlu1 %v533_v22  ;;  %v364_v23 = vsub.f32 %v343_v57, %v358_v21 }
 0x22d   :  { %v3204_v24 = vpop.f32.mrf.mxu0 }
 0x22e   :  { %v3206_v26 = vpop.eup %2726  ;;  %v536_v27 = vsel %vm349_vm2, %v3204_v24, -inf  ;;  %v370_v29 = vmul.f32 1.442695, %v364_v23 }
 0x22f   :  { %537 = vmax.xlane.f32.xlu2 %v536_v27  ;;  %v377_v28 = vsel %vm349_vm2, %v3206_v26, 0.0 }
 0x230   :  { %378 = vadd.xlane.f32.xlu0 %v377_v28  ;;  %2728 = vpow2.f32 %v370_v29 }
 0x232   :  { %v3212_v30 = vpop.f32.mrf.mxu3 }
 0x233   :  { %v726_v36 = vsel %vm349_vm2, %v3212_v30, -inf }
 0x234   :  { %v361_v32 = vpop.xlane.xlu0 %360 }
 0x235   :  { %v365_v33 = vsub.f32 %v346_v2, %v361_v32  ;;  %v3214_v34 = vpop.f32.mrf.mxu0 }
 0x236   :  { %v539_v35 = vsel %vm349_vm2, %v3214_v34, -inf  ;;  %v3222_v39 = vpop.eup %2728 }
 0x237   :  { %540 = vmax.xlane.f32.xlu1 %v539_v35  ;;  %v372_v37 = vmul.f32 1.442695, %v365_v33  ;;  %v380_v42 = vsel %vm349_vm2, %v3222_v39, 0.0 }
 0x238   :  { %727 = vmax.xlane.f32.xlu0 %v726_v36 }
 0x239   :  { %2730 = vpow2.f32 %v372_v37 }
 0x23a   :  { %v3220_v38 = vpop.f32.mrf.mxu3 }
 0x23b   :  { %v729_v40 = vsel %vm349_vm2, %v3220_v38, -inf }
 0x23c   :  { %730 = vmax.xlane.f32.xlu2 %v729_v40 }
 0x23d   :  { %v3226_v41 = vpop.f32.mrf.mxu0 }
 0x23e   :  { %v732_v43 = vsel %vm349_vm2, %v3226_v41, -inf }
 0x23f   :  { %381 = vadd.xlane.f32.xlu1 %v380_v42  ;;  %v3232_v44 = vpop.eup %2730 }
 0x240   :  { %733 = vmax.xlane.f32.xlu0 %v732_v43  ;;  %v383_v47 = vsel %vm349_vm2, %v3232_v44, 0.0 }
 0x244   :  { %v3240_v48 = vpop.f32.mrf.mxu3 }
 0x245   :  { %v3234_v45 = vpop.f32.mrf.mxu0  ;;  %v918_v51 = vsel %vm349_vm2, %v3240_v48, -inf }
 0x246   :  { %v735_v46 = vsel %vm349_vm2, %v3234_v45, -inf }
 0x247   :  { %736 = vmax.xlane.f32.xlu2 %v735_v46  ;;  %384 = vadd.xlane.f32.xlu1 %v383_v47 }
 0x24c   :  { %v3248_v52 = vpop.f32.mrf.mxu3 }
 0x24d   :  { %v3242_v49 = vpop.f32.mrf.mxu0  ;;  %v921_v55 = vsel %vm349_vm2, %v3248_v52, -inf }
 0x24e   :  { %v924_v50 = vsel %vm349_vm2, %v3242_v49, -inf }
 0x24f   :  { %925 = vmax.xlane.f32.xlu2 %v924_v50  ;;  %919 = vmax.xlane.f32.xlu1 %v918_v51 }
 0x255   :  { %v3250_v53 = vpop.f32.mrf.mxu0 }
 0x256   :  { %v927_v54 = vsel %vm349_vm2, %v3250_v53, -inf }
 0x257   :  { %928 = vmax.xlane.f32.xlu2 %v927_v54  ;;  %922 = vmax.xlane.f32.xlu1 %v921_v55 }
 0x26f   :  { %2664 = vrot.lane.b32.xlu2 %v3147_v31, %s2988_s16 }
 0x297   :  { %v532_v57 = vpop.xlane.xlu2 %531 }
 0x298   :  { %v542_v58 = vsub.f32 %v3195_v13, %v532_v57 }
 0x29a   :  { %v546_v60 = vmul.f32 1.442695, %v542_v58 }
 0x29b   :  { %v376_v61 = vpop.xlane.xlu0 %375 }
 0x29c   :  { %2732 = vpow2.f32 %v546_v60 }
 0x29d   :  { %2734 = vrcp.f32 %v376_v61 }
 0x29f   :  { %v535_v63 = vpop.xlane.xlu1 %534 }
 0x2a0   :  { %v543_v0 = vsub.f32 %v488_v20, %v535_v63 }
 0x2a2   :  { %v3259_v2 = vpop.eup %2732  ;;  %v548_v3 = vmul.f32 1.442695, %v543_v0  ;;  %v538_v4 = vpop.xlane.xlu2 %537 }
 0x2a3   :  { %v2735_v5 = vpop.eup %2734  ;;  %v544_v6 = vsub.f32 %v3204_v24, %v538_v4  ;;  %v379_v7 = vpop.xlane.xlu0 %378  ;;  %v554_v8 = vsel %vm349_vm2, %v3259_v2, 0.0 }
 0x2a4   :  { %v390_v9 = vmul.f32 %v2735_v5, %v3199_v17  ;;  %2736 = vpow2.f32 %v548_v3  ;;  %555 = vadd.xlane.f32.xlu0 %v554_v8 }
 0x2a5   :  { %v550_v10 = vmul.f32 1.442695, %v544_v6  ;;  %2738 = vrcp.f32 %v379_v7 }
 0x2a6   :  { %2519 = vmatmul.msk.f32.vlgmr.msrb.gmra.mxu1 %vm349_vm2, %v390_v9 }
 0x2a7   :  { %2740 = vpow2.f32 %v550_v10 }
 0x2aa   :  { %v3266_v11 = vpop.eup %2736  ;;  %v541_v12 = vpop.xlane.xlu1 %540 }
 0x2ab   :  { %v2739_v13 = vpop.eup %2738  ;;  %v728_v14 = vpop.xlane.xlu0 %727  ;;  %v557_v15 = vsel %vm349_vm2, %v3266_v11, 0.0  ;;  %v545_v19 = vsub.f32 %v3214_v34, %v541_v12 }
 0x2ac   :  { %v738_v16 = vsub.f32 %v3212_v30, %v728_v14  ;;  %558 = vadd.xlane.f32.xlu0 %v557_v15  ;;  %v391_v17 = vmul.f32 %v2739_v13, %v3206_v26 }
 0x2ad   :  { %v3272_v18 = vpop.eup %2740  ;;  %v552_v22 = vmul.f32 1.442695, %v545_v19 }
 0x2ae   :  { %v742_v20 = vmul.f32 1.442695, %v738_v16  ;;  %2520 = vmatmul.msk.f32.gmra.mxu1 %vm349_vm2, %v391_v17  ;;  %v560_v21 = vsel %vm349_vm2, %v3272_v18, 0.0 }
 0x2af   :  { %561 = vadd.xlane.f32.xlu1 %v560_v21  ;;  %v731_v23 = vpop.xlane.xlu2 %730 }
 0x2b0   :  { %2742 = vpow2.f32 %v742_v20  ;;  %v739_v29 = vsub.f32 %v3220_v38, %v731_v23 }
 0x2b2   :  { %v382_v24 = vpop.xlane.xlu1 %381  ;;  %v744_v34 = vmul.f32 1.442695, %v739_v29 }
 0x2b3   :  { %2744 = vrcp.f32 %v382_v24  ;;  %v734_v27 = vpop.xlane.xlu0 %733 }
 0x2b4   :  { %v740_v28 = vsub.f32 %v3226_v41, %v734_v27  ;;  %2746 = vpow2.f32 %v552_v22 }
 0x2b6   :  { %v3279_v26 = vpop.eup %2742  ;;  %v746_v30 = vmul.f32 1.442695, %v740_v28 }
 0x2b7   :  { %v750_v32 = vsel %vm349_vm2, %v3279_v26, 0.0 }
 0x2b8   :  { %2748 = vpow2.f32 %v746_v30  ;;  %751 = vadd.xlane.f32.xlu0 %v750_v32 }
 0x2b9   :  { %v2745_v33 = vpop.eup %2744 }
 0x2ba   :  { %v392_v35 = vmul.f32 %v2745_v33, %v3222_v39  ;;  %v737_v36 = vpop.xlane.xlu2 %736  ;;  %v385_v37 = vpop.xlane.xlu1 %384 }
 0x2bb   :  { %2750 = vrcp.f32 %v385_v37  ;;  %v3285_v40 = vpop.eup %2746  ;;  %v741_v55 = vsub.f32 %v3234_v45, %v737_v36 }
 0x2bc   :  { %2521 = vmatmul.msk.f32.vlgmr.msra.gmra.mxu2 %vm349_vm2, %v392_v35  ;;  %2752 = vpow2.f32 %v744_v34  ;;  %v563_v38 = vsel %vm349_vm2, %v3285_v40, 0.0 }
 0x2bd   :  { %v748_v58 = vmul.f32 1.442695, %v741_v55 }
 0x2be   :  { %v3288_v41 = vpop.eup %2748 }
 0x2bf   :  { %v756_v42 = vsel %vm349_vm2, %v3288_v41, 0.0 }
 0x2c0   :  { %564 = vadd.xlane.f32.xlu0 %v563_v38  ;;  %757 = vadd.xlane.f32.xlu2 %v756_v42 }
 0x2c1   :  { %v2751_v43 = vpop.eup %2750 }
 0x2c2   :  { %v926_v39 = vpop.xlane.xlu2 %925  ;;  %v920_v46 = vpop.xlane.xlu1 %919  ;;  %v393_v47 = vmul.f32 %v2751_v43, %v3232_v44 }
 0x2c3   :  { %v930_v50 = vsub.f32 %v3240_v48, %v920_v46  ;;  %v3296_v51 = vpop.eup %2752  ;;  %v932_v10 = vsub.f32 %v3242_v49, %v926_v39 }
 0x2c4   :  { %2522 = vmatmul.msk.f32.gmra.mxu2 %vm349_vm2, %v393_v47  ;;  %v753_v57 = vsel %vm349_vm2, %v3296_v51, 0.0 }
 0x2c5   :  { %v934_v54 = vmul.f32 1.442695, %v930_v50  ;;  %v938_v12 = vmul.f32 1.442695, %v932_v10 }
 0x2c7   :  { %2754 = vpow2.f32 %v934_v54 }
 0x2c8   :  { %2669 = vrot.lane.b32.xlu1 %v3141_v25, %s2988_s16  ;;  %754 = vadd.xlane.f32.xlu0 %v753_v57  ;;  %2756 = vpow2.f32 %v748_v58 }
 0x2ca   :  { %v929_v60 = vpop.xlane.xlu2 %928  ;;  %v923_v48 = vpop.xlane.xlu1 %922 }
 0x2cb   :  { %v933_v44 = vsub.f32 %v3250_v53, %v929_v60  ;;  %v931_v0 = vsub.f32 %v3248_v52, %v923_v48 }
 0x2cd   :  { %v940_v61 = vmul.f32 1.442695, %v933_v44  ;;  %v3305_v63 = vpop.eup %2754  ;;  %v936_v3 = vmul.f32 1.442695, %v931_v0 }
 0x2ce   :  { %v942_v45 = vsel %vm349_vm2, %v3305_v63, 0.0  ;;  %v3312_v6 = vpop.eup %2756 }
 0x2cf   :  { %2758 = vpow2.f32 %v940_v61  ;;  %v759_v8 = vsel %vm349_vm2, %v3312_v6, 0.0 }
 0x2d0   :  { %2674 = vrot.lane.b32.xlu1 %v3147_v31, %s2989_s19  ;;  %943 = vadd.xlane.f32.xlu0 %v942_v45  ;;  %2760 = vpow2.f32 %v936_v3 }
 0x2d1   :  { %2762 = vpow2.f32 %v938_v12 }
 0x2d2   :  { %v2665_v4 = vpop.permute.xlu2 %2664 }
 0x2d3   :  { %v2666_v5 = vunpack.i.l.bf16 %v2665_v4  ;;  %v2667_v7 = vunpack.i.h.bf16 %v2665_v4 }
 0x2d5   :  { %v3314_v53 = vpop.eup %2758  ;;  %796 = vmatpush.msrb.mxu1 %v2666_v5 }
 0x2d6   :  { %v951_v52 = vsel %vm349_vm2, %v3314_v53, 0.0  ;;  %v3320_v31 = vpop.eup %2760 }
 0x2d7   :  { %797 = vmatpush.msrb.mxu1 %v2667_v7  ;;  %952 = vadd.xlane.f32.xlu2 %v951_v52  ;;  %v945_v9 = vsel %vm349_vm2, %v3320_v31, 0.0  ;;  %v3327_v13 = vpop.eup %2762 }
 0x2d8   :  { %760 = vadd.xlane.f32.xlu0 %v759_v8  ;;  %v948_v14 = vsel %vm349_vm2, %v3327_v13, 0.0 }
 0x2e0   :  { %946 = vadd.xlane.f32.xlu0 %v945_v9 }
 0x2f4   :  { %2679 = vrot.lane.b32.xlu0 %v3141_v25, %s2989_s19 }
 0x2fa   :  { %949 = vadd.xlane.f32.xlu1 %v948_v14 }
 0x317   :  { %v556_v15 = vpop.xlane.xlu0 %555 }
 0x318   :  { %2764 = vrcp.f32 %v556_v15 }
 0x31e   :  { %v2765_v16 = vpop.eup %2764 }
 0x31f   :  { %v570_v17 = vmul.f32 %v2765_v16, %v3259_v2  ;;  %v559_v19 = vpop.xlane.xlu0 %558  ;;  %v1110_v16 = vld [vmem:[#allocation5 + $0x78] sm:$0xff] }
 0x320   :  { %2766 = vrcp.f32 %v559_v19  ;;  %1112 = vmatpush.msra.mxu3 %v1110_v16 }
 0x321   :  { %2531 = vmatmul.msk.f32.vlgmr.msra.gmra.mxu1 %vm349_vm2, %v570_v17  ;;  %v1109_v17 = vld [vmem:[#allocation5 + $0x70] sm:$0xff] }
 0x322   :  { %v562_v49 = vpop.xlane.xlu1 %561  ;;  %1113 = vmatpush.msra.mxu3 %v1109_v17 }
 0x323   :  { %2768 = vrcp.f32 %v562_v49  ;;  %v3355_v45 = vpop.f32.mrf.mxu1  ;;  %v1108_v49 = vld [vmem:[#allocation5 + $0x68] sm:$0xff] }
 0x324   :  { %1114 = vmatpush.msra.mxu3 %v1108_v49 }
 0x326   :  { %v2767_v20 = vpop.eup %2766 }
 0x327   :  { %v571_v25 = vmul.f32 %v2767_v20, %v3266_v11  ;;  %v1107_v20 = vld [vmem:[#allocation5 + $0x60] sm:$0xff] }
 0x328   :  { %1115 = vmatpush.msra.mxu3 %v1107_v20 }
 0x329   :  { %v2769_v21 = vpop.eup %2768  ;;  %2532 = vmatmul.msk.f32.gmra.mxu1 %vm349_vm2, %v571_v25  ;;  %v1106_v25 = vld [vmem:[#allocation5 + $0x58] sm:$0xff] }
 0x32a   :  { %v572_v22 = vmul.f32 %v2769_v21, %v3272_v18  ;;  %v1105_v21 = vld [vmem:[#allocation5 + $0x50] sm:$0xff]  ;;  %1116 = vmatpush.msra.mxu3 %v1106_v25 }
 0x32b   :  { %v752_v23 = vpop.xlane.xlu0 %751  ;;  %v3357_v3 = vpop.f32.mrf.mxu1 }
 0x32c   :  { %2770 = vrcp.f32 %v752_v23  ;;  %2533 = vmatmul.msk.f32.vlgmr.msrb.gmra.mxu2 %vm349_vm2, %v572_v22  ;;  %1117 = vmatpush.msra.mxu3 %v1105_v21  ;;  %v1104_v22 = vld [vmem:[#allocation5 + $0x48] sm:$0xff]  ;;  %v1103_v23 = vld [vmem:[#allocation5 + $0x40] sm:$0xff] }
 0x32e   :  { %1118 = vmatpush.msra.mxu3 %v1104_v22  ;;  %v1288_v22 = vld [vmem:[#allocation2 + $0x2e8] sm:$0xff] }
 0x32f   :  { %1300 = vmatpush.msrb.mxu0 %v1288_v22 }
 0x330   :  { %1119 = vmatpush.msra.mxu3 %v1103_v23  ;;  %v1289_v23 = vld [vmem:[#allocation2 + $0x2f0] sm:$0xff] }
 0x332   :  { %v2771_v24 = vpop.eup %2770 }
 0x333   :  { %v766_v2 = vmul.f32 %v2771_v24, %v3279_v26  ;;  %v565_v27 = vpop.xlane.xlu0 %564  ;;  %v758_v28 = vpop.xlane.xlu2 %757  ;;  %v1102_v24 = vld [vmem:[#allocation5 + $0x38] sm:$0xff] }
 0x334   :  { %2772 = vrcp.f32 %v565_v27  ;;  %1120 = vmatpush.msra.mxu3 %v1102_v24  ;;  %v1100_v27 = vld [vmem:[#allocation5 + $0x28] sm:$0xff]  ;;  %v1290_v24 = vld [vmem:[#allocation2 + $0x2f8] sm:$0xff] }
 0x335   :  { %2543 = vmatmul.msk.f32.vlgmr.msrb.gmra.mxu1 %vm349_vm2, %v766_v2  ;;  %2774 = vrcp.f32 %v758_v28  ;;  %v1101_v2 = vld [vmem:[#allocation5 + $0x30] sm:$0xff]  ;;  %v1099_v28 = vld [vmem:[#allocation5 + $0x20] sm:$0xff] }
 0x336   :  { %1121 = vmatpush.msra.mxu3 %v1101_v2  ;;  %v1285_v2 = vld [vmem:[#allocation2 + $0x2d0] sm:$0xff] }
 0x337   :  { %1301 = vmatpush.msrb.mxu0 %v1285_v2 }
 0x338   :  { %1122 = vmatpush.msra.mxu3 %v1100_v27  ;;  %v1286_v27 = vld [vmem:[#allocation2 + $0x2d8] sm:$0xff] }
 0x33a   :  { %v2670_v29 = vpop.permute.xlu1 %2669  ;;  %v2773_v30 = vpop.eup %2772  ;;  %1123 = vmatpush.msra.mxu3 %v1099_v28  ;;  %v1287_v28 = vld [vmem:[#allocation2 + $0x2e0] sm:$0xff] }
 0x33b   :  { %v2671_v11 = vunpack.i.l.bf16 %v2670_v29  ;;  %v755_v32 = vpop.xlane.xlu0 %754  ;;  %v573_v18 = vmul.f32 %v2773_v30, %v3285_v40  ;;  %v2672_v33 = vunpack.i.h.bf16 %v2670_v29  ;;  %v2775_v34 = vpop.eup %2774  ;;  %v1098_v29 = vld [vmem:[#allocation5 + $0x18] sm:$0xff]  ;;  %v1097_v30 = vld [vmem:[#allocation5 + $0x10] sm:$0xff] }
 0x33c   :  { %2776 = vrcp.f32 %v755_v32  ;;  %v768_v42 = vmul.f32 %v2775_v34, %v3288_v41  ;;  %1124 = vmatpush.msra.mxu3 %v1098_v29  ;;  %v1095_v32 = vld [vmem:[#allocation5] sm:$0xff] }
 0x33d   :  { %831 = vmatpush.msra.mxu2 %v2671_v11  ;;  %v1096_v11 = vld [vmem:[#allocation5 + $0x8] sm:$0xff] }
 0x33e   :  { %2534 = vmatmul.msk.f32.gmra.mxu2 %vm349_vm2, %v573_v18  ;;  %1125 = vmatpush.msra.mxu3 %v1097_v30 }
 0x33f   :  { %832 = vmatpush.msra.mxu2 %v2672_v33  ;;  %v3359_v4 = vpop.f32.mrf.mxu2 }
 0x340   :  { %1126 = vmatpush.msra.mxu3 %v1096_v11 }
 0x342   :  { %v2777_v26 = vpop.eup %2776  ;;  %v2675_v35 = vpop.permute.xlu1 %2674  ;;  %1127 = vmatpush.msra.mxu3 %v1095_v32 }
 0x343   :  { %v2676_v36 = vunpack.i.l.bf16 %v2675_v35  ;;  %v944_v37 = vpop.xlane.xlu0 %943  ;;  %v767_v38 = vmul.f32 %v2777_v26, %v3296_v51  ;;  %v2677_v43 = vunpack.i.h.bf16 %v2675_v35 }
 0x344   :  { %2778 = vrcp.f32 %v944_v37 }
 0x345   :  { %2544 = vmatmul.msk.f32.gmra.mxu1 %vm349_vm2, %v767_v38 }
 0x346   :  { %2545 = vmatmul.msk.f32.vlgmr.msra.gmra.mxu2 %vm349_vm2, %v768_v42  ;;  %988 = vmatpush.msra.mxu1 %v2676_v36 }
 0x347   :  { %v3361_v52 = vpop.f32.mrf.mxu2 }
 0x348   :  { %989 = vmatpush.msra.mxu1 %v2677_v43 }
 0x34a   :  { %v2779_v40 = vpop.eup %2778  ;;  %v953_v44 = vpop.xlane.xlu2 %952  ;;  %1329 = vmatpush.msrb.mxu1 %v1289_v23 }
 0x34b   :  { %v958_v39 = vmul.f32 %v2779_v40, %v3305_v63  ;;  %v761_v46 = vpop.xlane.xlu0 %760 }
 0x34c   :  { %2780 = vrcp.f32 %v761_v46  ;;  %1330 = vmatpush.msrb.mxu1 %v1286_v27 }
 0x34d   :  { %2555 = vmatmul.msk.f32.vlgmr.msra.gmra.mxu1 %vm349_vm2, %v958_v39 }
 0x352   :  { %v2781_v47 = vpop.eup %2780 }
 0x353   :  { %v947_v50 = vpop.xlane.xlu0 %946  ;;  %v769_v51 = vmul.f32 %v2781_v47, %v3312_v6 }
 0x354   :  { %2782 = vrcp.f32 %v947_v50 }
 0x355   :  { %2546 = vmatmul.msk.f32.gmra.mxu2 %vm349_vm2, %v769_v51 }
 0x35a   :  { %v2783_v41 = vpop.eup %2782 }
 0x35b   :  { %v959_v54 = vmul.f32 %v2783_v41, %v3320_v31 }
 0x35d   :  { %2556 = vmatmul.msk.f32.gmra.mxu1 %vm349_vm2, %v959_v54 }
 0x366   :  { %v2680_v55 = vpop.permute.xlu0 %2679 }
 0x367   :  { %v2681_v57 = vunpack.i.l.bf16 %v2680_v55  ;;  %v2682_v58 = vunpack.i.h.bf16 %v2680_v55 }
 0x369   :  { %1023 = vmatpush.msrb.mxu2 %v2681_v57 }
 0x36b   :  { %1024 = vmatpush.msrb.mxu2 %v2682_v58 }
 0x36d   :  { %v950_v60 = vpop.xlane.xlu1 %949  ;;  %1358 = vmatpush.msra.mxu2 %v1290_v24 }
 0x36e   :  { %2784 = vrcp.f32 %v950_v60 }
 0x36f   :  { %2786 = vrcp.f32 %v953_v44  ;;  %1359 = vmatpush.msra.mxu2 %v1287_v28 }
 0x374   :  { %v2785_v48 = vpop.eup %2784 }
 0x375   :  { %v960_v61 = vmul.f32 %v2785_v48, %v3327_v13  ;;  %v2787_v63 = vpop.eup %2786 }
 0x376   :  { %v961_v0 = vmul.f32 %v2787_v63, %v3314_v53  ;;  %v3393_v63 = vld [vmem:[%s3790_s6] sm:$0x7] }
 0x377   :  { %2557 = vmatmul.msk.f32.vlgmr.msrb.gmra.mxu2 %vm349_vm2, %v960_v61 }
 0x37f   :  { %2558 = vmatmul.msk.f32.gmra.mxu2 %vm349_vm2, %v961_v0  ;;  %v1111_v0 = vperm.slane %v3393_v63, 0 }
 0x39e   :  { %v605_v5 = vpop.f32.mrf.mxu1 }
 0x3a6   :  { %v608_v6 = vpop.f32.mrf.mxu1 }
 0x3a7   :  { %v2683_v7 = vpack.i.bf16 %v608_v6, %v605_v5 }
 0x3a9   :  { %2684 = vrot.lane.b32.xlu0 %v2683_v7, %s2989_s19 }
 0x3af   :  { %v642_v8 = vpop.f32.mrf.mxu2 }
 0x3b1   :  { %1040 = vrot.lane.b32.xlu0 %v642_v8, %s2989_s19 }
 0x3b2   :  { %v799_v31 = vpop.f32.mrf.mxu1 }
 0x3b3   :  { %1052 = vrot.lane.b32.xlu2 %v799_v31, %s2988_s16 }
 0x3c1   :  { %v645_v53 = vpop.f32.mrf.mxu2 }
 0x3c2   :  { %v802_v9 = vpop.f32.mrf.mxu1 }
 0x3c3   :  { %1054 = vrot.lane.b32.xlu1 %v802_v9, %s2988_s16 }
 0x3c9   :  { %v834_v10 = vpop.f32.mrf.mxu2 }
 0x3ca   :  { %1056 = vrot.lane.b32.xlu2 %v834_v10, %s2988_s16  ;;  %v991_v12 = vpop.f32.mrf.mxu1 }
 0x3cb   :  { %1068 = vrot.lane.b32.xlu0 %v991_v12, %s2987_s15  ;;  %v2990_v12 = vmov 128.0  }
 0x3cc   :  { %2788 = vrcp.f32 %v2990_v12  ;;  %v1250_v12 = vld [vmem:[#allocation2 + $0x1b8] sm:$0xff] }
 0x3d2   :  { %1042 = vrot.lane.b32.xlu2 %v645_v53, %s2989_s19 }
 0x3d8   :  { %v837_v14 = vpop.f32.mrf.mxu2 }
 0x3da   :  { %v994_v13 = vpop.f32.mrf.mxu1 }
 0x3db   :  { %1070 = vrot.lane.b32.xlu0 %v994_v13, %s2987_s15  ;;  %v2789_v13 = vpop.eup %2788 }
 0x3dc   :  { %vm1158_vm5 = vweird.f32 %v2789_v13 }
 0x3fa   :  { %v1026_v15 = vpop.f32.mrf.mxu2 }
 0x3fb   :  { %1072 = vrot.lane.b32.xlu0 %v1026_v15, %s2987_s15 }
 0x402   :  { %v1029_v19 = vpop.f32.mrf.mxu2 }
 0x403   :  { %1058 = vrot.lane.b32.xlu0 %v837_v14, %s2988_s16  ;;  %1074 = vrot.lane.b32.xlu1 %v1029_v19, %s2987_s15 }
 0x40d   :  { %v1053_v35 = vpop.permute.xlu2 %1052 }
 0x41b   :  { %v2685_v18 = vpop.permute.xlu0 %2684 }
 0x41c   :  { %v2686_v34 = vunpack.i.l.bf16 %v2685_v18  ;;  %v2687_v42 = vunpack.i.h.bf16 %v2685_v18 }
 0x41e   :  { %v1080_v26 = vsel %vm278_vm1, %v3355_v45, %v2686_v34  ;;  %v1081_v40 = vsel %vm278_vm1, %v3357_v3, %v2687_v42  ;;  %v1280_v42 = vld [vmem:[#allocation2 + $0x2a8] sm:$0xff] }
 0x41f   :  { %v1085_v37 = vsel %vm1084_vm3, %v1080_v26, %v1053_v35  ;;  %v1282_v35 = vld [vmem:[#allocation2 + $0x2b8] sm:$0xff] }
 0x420   :  { %1302 = vmatpush.msrb.mxu0 %v1282_v35 }
 0x423   :  { %v1041_v33 = vpop.permute.xlu0 %1040 }
 0x424   :  { %v1057_v50 = vpop.permute.xlu2 %1056  ;;  %v1082_v51 = vsel %vm278_vm1, %v3359_v4, %v1041_v33 }
 0x425   :  { %v1087_v54 = vsel %vm1084_vm3, %v1082_v51, %v1057_v50  ;;  %v1274_v50 = vld [vmem:[#allocation2 + $0x278] sm:$0xff]  ;;  %v1275_v51 = vld [vmem:[#allocation2 + $0x280] sm:$0xff] }
 0x42c   :  { %v1043_v57 = vpop.permute.xlu2 %1042 }
 0x42d   :  { %v1083_v58 = vsel %vm278_vm1, %v3361_v52, %v1043_v57  ;;  %v1267_v57 = vld [vmem:[#allocation2 + $0x240] sm:$0xff] }
 0x435   :  { %v1055_v43 = vpop.permute.xlu1 %1054 }
 0x436   :  { %v1086_v39 = vsel %vm1084_vm3, %v1081_v40, %v1055_v43  ;;  %v1281_v43 = vld [vmem:[#allocation2 + $0x2b0] sm:$0xff]  ;;  %v1276_v40 = vld [vmem:[#allocation2 + $0x288] sm:$0xff] }
 0x43d   :  { %v1069_v36 = vpop.permute.xlu0 %1068 }
 0x43e   :  { %v1090_v38 = vsel %vm1089_vm4, %v1085_v37, %v1069_v36  ;;  %v1283_v36 = vld [vmem:[#allocation2 + $0x2c0] sm:$0xff]  ;;  %v1284_v37 = vld [vmem:[#allocation2 + $0x2c8] sm:$0xff] }
 0x43f   :  { %1128 = vmatmul.f32.vlgmr.msra.gmra.mxu3 %v1090_v38  ;;  %1331 = vmatpush.msrb.mxu1 %v1283_v36  ;;  %v1279_v38 = vld [vmem:[#allocation2 + $0x2a0] sm:$0xff] }
 0x440   :  { %1360 = vmatpush.msra.mxu2 %v1284_v37  ;;  %1303 = vmatpush.msrb.mxu0 %v1279_v38 }
 0x441   :  { %1332 = vmatpush.msrb.mxu1 %v1280_v42 }
 0x442   :  { %1361 = vmatpush.msra.mxu2 %v1281_v43  ;;  %1304 = vmatpush.msrb.mxu0 %v1276_v40 }
 0x44d   :  { %v1071_v46 = vpop.permute.xlu0 %1070 }
 0x44e   :  { %v1091_v47 = vsel %vm1089_vm4, %v1086_v39, %v1071_v46  ;;  %v1277_v39 = vld [vmem:[#allocation2 + $0x290] sm:$0xff]  ;;  %v1278_v46 = vld [vmem:[#allocation2 + $0x298] sm:$0xff] }
 0x44f   :  { %1131 = vmatmul.f32.gmra.mxu3 %v1091_v47  ;;  %1333 = vmatpush.msrb.mxu1 %v1277_v39  ;;  %v1273_v47 = vld [vmem:[#allocation2 + $0x270] sm:$0xff] }
 0x450   :  { %1362 = vmatpush.msra.mxu2 %v1278_v46  ;;  %1305 = vmatpush.msrb.mxu0 %v1273_v47 }
 0x451   :  { %1334 = vmatpush.msrb.mxu1 %v1274_v50 }
 0x452   :  { %1363 = vmatpush.msra.mxu2 %v1275_v51 }
 0x46d   :  { %v1073_v41 = vpop.permute.xlu0 %1072 }
 0x46e   :  { %v1092_v55 = vsel %vm1089_vm4, %v1087_v54, %v1073_v41  ;;  %v1270_v41 = vld [vmem:[#allocation2 + $0x258] sm:$0xff]  ;;  %v1271_v54 = vld [vmem:[#allocation2 + $0x260] sm:$0xff] }
 0x46f   :  { %1134 = vmatmul.f32.gmra.mxu3 %v1092_v55  ;;  %v1272_v55 = vld [vmem:[#allocation2 + $0x268] sm:$0xff]  ;;  %1306 = vmatpush.msrb.mxu0 %v1270_v41 }
 0x470   :  { %1335 = vmatpush.msrb.mxu1 %v1271_v54  ;;  %1364 = vmatpush.msra.mxu2 %v1272_v55 }
 0x471   :  { %1307 = vmatpush.msrb.mxu0 %v1267_v57 }
 0x475   :  { %v1059_v60 = vpop.permute.xlu0 %1058  ;;  %v1075_v44 = vpop.permute.xlu1 %1074 }
 0x476   :  { %v1088_v48 = vsel %vm1084_vm3, %v1083_v58, %v1059_v60  ;;  %v1268_v58 = vld [vmem:[#allocation2 + $0x248] sm:$0xff]  ;;  %v1269_v60 = vld [vmem:[#allocation2 + $0x250] sm:$0xff] }
 0x477   :  { %v1093_v61 = vsel %vm1089_vm4, %v1088_v48, %v1075_v44  ;;  %1336 = vmatpush.msrb.mxu1 %v1268_v58  ;;  %1365 = vmatpush.msra.mxu2 %v1269_v60  ;;  %v1264_v44 = vld [vmem:[#allocation2 + $0x228] sm:$0xff]  ;;  %v1265_v48 = vld [vmem:[#allocation2 + $0x230] sm:$0xff] }
 0x478   :  { %1137 = vmatmul.f32.gmra.mxu3 %v1093_v61  ;;  %v1266_v61 = vld [vmem:[#allocation2 + $0x238] sm:$0xff]  ;;  %1308 = vmatpush.msrb.mxu0 %v1264_v44 }
 0x479   :  { %1337 = vmatpush.msrb.mxu1 %v1265_v48  ;;  %1366 = vmatpush.msra.mxu2 %v1266_v61 }
 0x4c2   :  { %v1129_v45 = vpop.f32.mrf.mxu3 }
 0x4c3   :  { %v1130_v3 = vadd.f32 %v1129_v45, %v1111_v0  ;;  %v1262_v45 = vld [vmem:[#allocation2 + $0x218] sm:$0xff] }
 0x4c4   :  { %1338 = vmatpush.msrb.mxu1 %v1262_v45 }
 0x4c5   :  { %v1141_v4 = vadd.f32 %v1130_v3, %v3104_v56  ;;  %v1154_v56 = vmul.f32 128.0, %v2789_v13  ;;  %v1263_v3 = vld [vmem:[#allocation2 + $0x220] sm:$0xff] }
 0x4c6   :  { %1367 = vmatpush.msra.mxu2 %v1263_v3 }
 0x4c7   :  { %1145 = vadd.xlane.f32.xlu2 %v1141_v4  ;;  %v1155_v14 = vsub.f32 1.0, %v1154_v56  ;;  %v1246_v56 = vld [vmem:[#allocation2 + $0x198] sm:$0xff] }
 0x4c9   :  { %v1156_v15 = vmul.f32 %v2789_v13, %v1155_v14  ;;  %v1247_v14 = vld [vmem:[#allocation2 + $0x1a0] sm:$0xff] }
 0x4cb   :  { %v1157_v16 = vadd.f32 %v2789_v13, %v1156_v15  ;;  %v1248_v15 = vld [vmem:[#allocation2 + $0x1a8] sm:$0xff] }
 0x4d2   :  { %v1132_v5 = vpop.f32.mrf.mxu3 }
 0x4d3   :  { %v1133_v6 = vadd.f32 %v1132_v5, %v1111_v0  ;;  %v1259_v5 = vld [vmem:[#allocation2 + $0x200] sm:$0xff] }
 0x4d4   :  { %1339 = vmatpush.msrb.mxu1 %v1259_v5 }
 0x4d5   :  { %v1142_v7 = vadd.f32 %v1133_v6, %v3108_v59  ;;  %v3400_v59 = vsel %vm1158_vm5, %v2789_v13, %v1157_v16  ;;  %v1260_v6 = vld [vmem:[#allocation2 + $0x208] sm:$0xff]  ;;  %v1251_v13 = vld [vmem:[#allocation2 + $0x1c0] sm:$0xff] }
 0x4d6   :  { %1368 = vmatpush.msra.mxu2 %v1260_v6  ;;  %v1243_v16 = vld [vmem:[#allocation2 + $0x180] sm:$0xff] }
 0x4d7   :  { %1147 = vadd.xlane.f32.xlu0 %v1142_v7 }
 0x4f2   :  { %v1135_v52 = vpop.f32.mrf.mxu3 }
 0x4f3   :  { %v1136_v8 = vadd.f32 %v1135_v52, %v1111_v0  ;;  %v1256_v52 = vld [vmem:[#allocation2 + $0x1e8] sm:$0xff] }
 0x4f4   :  { %1340 = vmatpush.msrb.mxu1 %v1256_v52 }
 0x4f5   :  { %v1143_v31 = vadd.f32 %v1136_v8, %v3112_v62  ;;  %v1257_v8 = vld [vmem:[#allocation2 + $0x1f0] sm:$0xff] }
 0x4f6   :  { %1369 = vmatpush.msra.mxu2 %v1257_v8 }
 0x4f7   :  { %1149 = vadd.xlane.f32.xlu1 %v1143_v31 }
 0x4fb   :  { %v1138_v53 = vpop.f32.mrf.mxu3 }
 0x4fc   :  { %v1139_v9 = vadd.f32 %v1138_v53, %v1111_v0  ;;  %v1261_v0 = vld [vmem:[#allocation2 + $0x210] sm:$0xff] }
 0x4fd   :  { %1309 = vmatpush.msrb.mxu0 %v1261_v0  ;;  %v1253_v53 = vld [vmem:[#allocation2 + $0x1d0] sm:$0xff] }
 0x4fe   :  { %v1144_v10 = vadd.f32 %v1139_v9, %v3117_v1  ;;  %v1254_v9 = vld [vmem:[#allocation2 + $0x1d8] sm:$0xff]  ;;  %1341 = vmatpush.msrb.mxu1 %v1253_v53 }
 0x4ff   :  { %1370 = vmatpush.msra.mxu2 %v1254_v9 }
 0x500   :  { %1151 = vadd.xlane.f32.xlu2 %v1144_v10  ;;  %1342 = vmatpush.msrb.mxu1 %v1250_v12  ;;  %v2559_v12 = vld [vmem:[%s3788_s4 + $0x3] sm:$0x7] }
 0x501   :  { %1371 = vmatpush.msra.mxu2 %v1251_v13  ;;  %v1294_v13 = vperm.slane %v2559_v12, 0 }
 0x502   :  { %1343 = vmatpush.msrb.mxu1 %v1247_v14 }
 0x503   :  { %1372 = vmatpush.msra.mxu2 %v1248_v15 }
 0x53a   :  { %v1146_v17 = vpop.xlane.xlu2 %1145 }
 0x53b   :  { %v1160_v19 = vmul.f32 %v3400_v59, %v1146_v17  ;;  %v1244_v17 = vld [vmem:[#allocation2 + $0x188] sm:$0xff] }
 0x53c   :  { %1344 = vmatpush.msrb.mxu1 %v1244_v17 }
 0x53d   :  { %v3403_v62 = vsub.f32 %v1141_v4, %v1160_v19  ;;  %v1258_v4 = vld [vmem:[#allocation2 + $0x1f8] sm:$0xff]  ;;  %v1245_v19 = vld [vmem:[#allocation2 + $0x190] sm:$0xff] }
 0x53e   :  { %1310 = vmatpush.msrb.mxu0 %v1258_v4  ;;  %1373 = vmatpush.msra.mxu2 %v1245_v19 }
 0x53f   :  { %v1168_v49 = vmul.f32 %v3403_v62, %v3403_v62 }
 0x541   :  { %1172 = vadd.xlane.f32.xlu0 %v1168_v49 }
 0x54a   :  { %v1148_v1 = vpop.xlane.xlu0 %1147 }
 0x54b   :  { %v1161_v20 = vmul.f32 %v3400_v59, %v1148_v1 }
 0x54d   :  { %v3408_v25 = vsub.f32 %v1142_v7, %v1161_v20  ;;  %v1255_v7 = vld [vmem:[#allocation2 + $0x1e0] sm:$0xff] }
 0x54e   :  { %1311 = vmatpush.msrb.mxu0 %v1255_v7 }
 0x54f   :  { %v1169_v21 = vmul.f32 %v3408_v25, %v3408_v25 }
 0x551   :  { %1174 = vadd.xlane.f32.xlu1 %v1169_v21 }
 0x56a   :  { %v1150_v29 = vpop.xlane.xlu1 %1149 }
 0x56b   :  { %v1162_v30 = vmul.f32 %v3400_v59, %v1150_v29 }
 0x56d   :  { %v3413_v11 = vsub.f32 %v1143_v31, %v1162_v30  ;;  %v1252_v31 = vld [vmem:[#allocation2 + $0x1c8] sm:$0xff] }
 0x56e   :  { %1312 = vmatpush.msrb.mxu0 %v1252_v31 }
 0x56f   :  { %v1170_v32 = vmul.f32 %v3413_v11, %v3413_v11 }
 0x571   :  { %1176 = vadd.xlane.f32.xlu2 %v1170_v32  ;;  %v1232_v32 = vperm.slane %v3393_v63, 1 }
 0x573   :  { %v1152_v18 = vpop.xlane.xlu2 %1151 }
 0x574   :  { %v1163_v33 = vmul.f32 %v3400_v59, %v1152_v18 }
 0x576   :  { %v3418_v34 = vsub.f32 %v1144_v10, %v1163_v33  ;;  %v1249_v10 = vld [vmem:[#allocation2 + $0x1b0] sm:$0xff]  ;;  %v1237_v33 = vperm.slane %v3393_v63, 2 }
 0x577   :  { %1313 = vmatpush.msrb.mxu0 %v1249_v10 }
 0x578   :  { %v1171_v26 = vmul.f32 %v3418_v34, %v3418_v34 }
 0x579   :  { %1314 = vmatpush.msrb.mxu0 %v1246_v56  ;;  %v1295_v56 = vperm.slane %v2559_v12, 1 }
 0x57a   :  { %1178 = vadd.xlane.f32.xlu0 %v1171_v26 }
 0x57b   :  { %1315 = vmatpush.msrb.mxu0 %v1243_v16 }
 0x5b4   :  { %v1173_v49 = vpop.xlane.xlu0 %1172 }
 0x5b5   :  { %v1180_v1 = vmul.f32 %v1173_v49, %v3400_v59 }
 0x5b7   :  { %v1184_v20 = vadd.f32 1e-05, %v1180_v1  ;;  %v1296_v1 = vperm.slane %v2559_v12, 2 }
 0x5b9   :  { %2790 = vrsqrt.f32 %v1184_v20  ;;  %vm1194_vm7 = vweird.f32 %v1184_v20 }
 0x5bf   :  { %v2791_v21 = vpop.eup %2790 }
 0x5c0   :  { %v1189_v22 = vmul.f32 %v2791_v21, %v1184_v20  ;;  %vm1195_vm6 = vweird.f32 %v2791_v21 }
 0x5c1   :  { %vm1196_vm8 = vmor %vm1194_vm7, %vm1195_vm6 }
 0x5c2   :  { %v1190_v23 = vmul.f32 %v2791_v21, %v1189_v22 }
 0x5c4   :  { %v1191_v24 = vmul.f32 0.5, %v1190_v23  ;;  %v1175_v2 = vpop.xlane.xlu1 %1174 }
 0x5c5   :  { %v1181_v27 = vmul.f32 %v1175_v2, %v3400_v59 }
 0x5c6   :  { %v1192_v28 = vsub.f32 1.5, %v1191_v24 }
 0x5c7   :  { %v1185_v29 = vadd.f32 1e-05, %v1181_v27 }
 0x5c8   :  { %v1193_v30 = vmul.f32 %v2791_v21, %v1192_v28 }
 0x5c9   :  { %2792 = vrsqrt.f32 %v1185_v29  ;;  %vm1204_vm10 = vweird.f32 %v1185_v29 }
 0x5ca   :  { %v1197_v18 = vsel %vm1196_vm8, %v2791_v21, %v1193_v30 }
 0x5cb   :  { %v1228_v26 = vmul.f32 %v1197_v18, %v3403_v62 }
 0x5cd   :  { %v1233_v35 = vmul.f32 %v1232_v32, %v1228_v26 }
 0x5cf   :  { %v2793_v36 = vpop.eup %2792  ;;  %v3427_v37 = vadd.f32 %v1237_v33, %v1233_v35 }
 0x5d0   :  { %v1199_v38 = vmul.f32 %v2793_v36, %v1185_v29  ;;  %vm1205_vm9 = vweird.f32 %v2793_v36 }
 0x5d1   :  { %1316 = vmatmul.f32.vlgmr.msrb.gmra.mxu0 %v3427_v37  ;;  %1345 = vmatmul.f32.vlgmr.msrb.gmra.mxu1 %v3427_v37  ;;  %vm1206_vm11 = vmor %vm1204_vm10, %vm1205_vm9 }
 0x5d2   :  { %v1200_v42 = vmul.f32 %v2793_v36, %v1199_v38  ;;  %1374 = vmatmul.f32.vlgmr.msra.gmra.mxu2 %v3427_v37 }
 0x5d4   :  { %v1201_v43 = vmul.f32 0.5, %v1200_v42 }
 0x5d6   :  { %v1202_v40 = vsub.f32 1.5, %v1201_v43 }
 0x5d8   :  { %v1203_v39 = vmul.f32 %v2793_v36, %v1202_v40 }
 0x5da   :  { %v1207_v63 = vsel %vm1206_vm11, %v2793_v36, %v1203_v39 }
 0x5db   :  { %v1229_v62 = vmul.f32 %v1207_v63, %v3408_v25 }
 0x5dd   :  { %v1234_v46 = vmul.f32 %v1232_v32, %v1229_v62 }
 0x5df   :  { %v3433_v47 = vadd.f32 %v1237_v33, %v1234_v46 }
 0x5e1   :  { %1319 = vmatmul.f32.gmra.mxu0 %v3433_v47  ;;  %1348 = vmatmul.f32.gmra.mxu1 %v3433_v47 }
 0x5e2   :  { %1377 = vmatmul.f32.gmra.mxu2 %v3433_v47 }
 0x5e4   :  { %v1177_v50 = vpop.xlane.xlu2 %1176 }
 0x5e5   :  { %v1182_v51 = vmul.f32 %v1177_v50, %v3400_v59 }
 0x5e7   :  { %v1186_v41 = vadd.f32 1e-05, %v1182_v51 }
 0x5e9   :  { %2794 = vrsqrt.f32 %v1186_v41  ;;  %vm1214_vm13 = vweird.f32 %v1186_v41 }
 0x5ed   :  { %v1179_v54 = vpop.xlane.xlu0 %1178 }
 0x5ee   :  { %v1183_v55 = vmul.f32 %v1179_v54, %v3400_v59 }
 0x5ef   :  { %v2795_v57 = vpop.eup %2794 }
 0x5f0   :  { %v1209_v58 = vmul.f32 %v2795_v57, %v1186_v41  ;;  %v1187_v25 = vadd.f32 1e-05, %v1183_v55  ;;  %vm1215_vm12 = vweird.f32 %v2795_v57 }
 0x5f1   :  { %vm1216_vm14 = vmor %vm1214_vm13, %vm1215_vm12 }
 0x5f2   :  { %v1210_v60 = vmul.f32 %v2795_v57, %v1209_v58  ;;  %2796 = vrsqrt.f32 %v1187_v25  ;;  %vm1224_vm0 = vweird.f32 %v1187_v25 }
 0x5f4   :  { %v1211_v44 = vmul.f32 0.5, %v1210_v60 }
 0x5f6   :  { %v1212_v48 = vsub.f32 1.5, %v1211_v44 }
 0x5f8   :  { %v2797_v61 = vpop.eup %2796  ;;  %v1213_v0 = vmul.f32 %v2795_v57, %v1212_v48 }
 0x5f9   :  { %v1219_v45 = vmul.f32 %v2797_v61, %v1187_v25  ;;  %vm1225_vm15 = vweird.f32 %v2797_v61 }
 0x5fa   :  { %v1217_v3 = vsel %vm1216_vm14, %v2795_v57, %v1213_v0  ;;  %vm1226_vm5 = vmor %vm1224_vm0, %vm1225_vm15 }
 0x5fb   :  { %v1230_v4 = vmul.f32 %v1217_v3, %v3413_v11  ;;  %v1220_v5 = vmul.f32 %v2797_v61, %v1219_v45 }
 0x5fd   :  { %v1221_v6 = vmul.f32 0.5, %v1220_v5  ;;  %v1235_v7 = vmul.f32 %v1232_v32, %v1230_v4 }
 0x5ff   :  { %v1222_v52 = vsub.f32 1.5, %v1221_v6  ;;  %v3441_v8 = vadd.f32 %v1237_v33, %v1235_v7 }
 0x601   :  { %v1223_v31 = vmul.f32 %v2797_v61, %v1222_v52  ;;  %1322 = vmatmul.f32.gmra.mxu0 %v3441_v8  ;;  %1351 = vmatmul.f32.gmra.mxu1 %v3441_v8 }
 0x602   :  { %1380 = vmatmul.f32.gmra.mxu2 %v3441_v8 }
 0x603   :  { %v1227_v53 = vsel %vm1226_vm5, %v2797_v61, %v1223_v31 }
 0x604   :  { %v1231_v9 = vmul.f32 %v1227_v53, %v3418_v34 }
 0x606   :  { %v1236_v11 = vmul.f32 %v1232_v32, %v1231_v9 }
 0x608   :  { %v3447_v10 = vadd.f32 %v1237_v33, %v1236_v11 }
 0x60a   :  { %1325 = vmatmul.f32.gmra.mxu0 %v3447_v10  ;;  %1354 = vmatmul.f32.gmra.mxu1 %v3447_v10 }
 0x60b   :  { %1383 = vmatmul.f32.gmra.mxu2 %v3447_v10 }
 0x64e   :  { %v1317_v14 = vpop.f32.mrf.mxu0  ;;  %v1346_v15 = vpop.f32.mrf.mxu1 }
 0x64f   :  { %v1318_v16 = vadd.f32 %v1317_v14, %v1294_v13  ;;  %v1347_v17 = vadd.f32 %v1346_v15, %v1295_v56 }
 0x651   :  { %1559 = vrot.lane.b32.xlu0 %v1318_v16, %s2987_s15  ;;  %1563 = vrot.lane.b32.xlu2 %v1347_v17, %s2987_s15 }
 0x655   :  { %v1375_v34 = vpop.f32.mrf.mxu2 }
 0x656   :  { %v1376_v22 = vadd.f32 %v1375_v34, %v1296_v1 }
 0x659   :  { %1759 = vrot.lane.b32.xlu2 %v1347_v17, %s2988_s16 }
 0x65e   :  { %v1349_v19 = vpop.f32.mrf.mxu1  ;;  %v1320_v20 = vpop.f32.mrf.mxu0 }
 0x65f   :  { %v1350_v49 = vadd.f32 %v1349_v19, %v1295_v56  ;;  %v1321_v24 = vadd.f32 %v1320_v20, %v1294_v13 }
 0x661   :  { %1761 = vrot.lane.b32.xlu0 %v1350_v49, %s2988_s16  ;;  %1565 = vrot.lane.b32.xlu1 %v1350_v49, %s2987_s15 }
 0x662   :  { %2560 = vmatpush.xpose.msk.msrb.mxu3 %vm278_vm1, %v1350_v49 }
 0x665   :  { %v1378_v21 = vpop.f32.mrf.mxu2 }
 0x666   :  { %v1379_v23 = vadd.f32 %v1378_v21, %v1296_v1  ;;  %2561 = vmatpush.xpose.msk.msrb.mxu3 %vm278_vm1, %v1347_v17 }
 0x668   :  { %1521 = vmatpush.msra.mxu1 %v1379_v23  ;;  %v3462_v2 = vpack.i.bf16 %v1376_v22, %v1379_v23 }
 0x669   :  { %2562 = vmatmul.msk.f32.vlgmr.msrb.gmra.mxu3 %vm278_vm1, %v1318_v16  ;;  %1755 = vrot.lane.b32.xlu1 %v1318_v16, %s2988_s16 }
 0x66a   :  { %1757 = vrot.lane.b32.xlu0 %v1321_v24, %s2988_s16  ;;  %1522 = vmatpush.msra.mxu1 %v1376_v22 }
 0x671   :  { %2563 = vmatmul.msk.f32.gmra.mxu3 %vm278_vm1, %v1321_v24  ;;  %1561 = vrot.lane.b32.xlu1 %v1321_v24, %s2987_s15 }
 0x67e   :  { %v1323_v27 = vpop.f32.mrf.mxu0  ;;  %v1352_v28 = vpop.f32.mrf.mxu1 }
 0x67f   :  { %v1324_v29 = vadd.f32 %v1323_v27, %v1294_v13  ;;  %v1353_v30 = vadd.f32 %v1352_v28, %v1295_v56 }
 0x681   :  { %1598 = vrot.lane.b32.xlu0 %v1324_v29, %s2987_s15  ;;  %1602 = vrot.lane.b32.xlu1 %v1353_v30, %s2987_s15 }
 0x685   :  { %v1381_v32 = vpop.f32.mrf.mxu2 }
 0x686   :  { %v1382_v35 = vadd.f32 %v1381_v32, %v1296_v1 }
 0x687   :  { %v1355_v18 = vpop.f32.mrf.mxu1  ;;  %v1326_v42 = vpop.f32.mrf.mxu0 }
 0x688   :  { %v1356_v33 = vadd.f32 %v1355_v18, %v1295_v56  ;;  %v1327_v43 = vadd.f32 %v1326_v42, %v1294_v13 }
 0x689   :  { %1798 = vrot.lane.b32.xlu0 %v1353_v30, %s2988_s16 }
 0x68a   :  { %1604 = vrot.lane.b32.xlu2 %v1356_v33, %s2987_s15  ;;  %2564 = vmatpush.xpose.msk.msra.mxu0 %vm278_vm1, %v1356_v33 }
 0x68b   :  { %1800 = vrot.lane.b32.xlu1 %v1356_v33, %s2988_s16 }
 0x68e   :  { %v1384_v26 = vpop.f32.mrf.mxu2  ;;  %2565 = vmatpush.xpose.msk.msra.mxu0 %vm278_vm1, %v1353_v30 }
 0x68f   :  { %v1385_v36 = vadd.f32 %v1384_v26, %v1296_v1 }
 0x691   :  { %1550 = vmatpush.msrb.mxu2 %v1385_v36  ;;  %2566 = vmatmul.msk.f32.vlgmr.msra.gmra.mxu0 %vm278_vm1, %v1324_v29  ;;  %v3477_v38 = vpack.i.bf16 %v1382_v35, %v1385_v36 }
 0x692   :  { %1947 = vrot.lane.b32.xlu0 %v1318_v16, %s2989_s19  ;;  %1953 = vrot.lane.b32.xlu2 %v1350_v49, %s2989_s19 }
 0x693   :  { %1951 = vrot.lane.b32.xlu1 %v1347_v17, %s2989_s19  ;;  %1551 = vmatpush.msrb.mxu2 %v1382_v35 }
 0x699   :  { %2567 = vmatmul.msk.f32.gmra.mxu0 %vm278_vm1, %v1327_v43 }
 0x69a   :  { %1992 = vrot.lane.b32.xlu0 %v1356_v33, %s2989_s19  ;;  %1600 = vrot.lane.b32.xlu2 %v1327_v43, %s2987_s15 }
 0x69b   :  { %1796 = vrot.lane.b32.xlu1 %v1327_v43, %s2988_s16 }
 0x6a2   :  { %1988 = vrot.lane.b32.xlu0 %v1327_v43, %s2989_s19  ;;  %1794 = vrot.lane.b32.xlu2 %v1324_v29, %s2988_s16 }
 0x6a3   :  { %1990 = vrot.lane.b32.xlu1 %v1353_v30, %s2989_s19 }
 0x6aa   :  { %2694 = vrot.lane.b32.xlu0 %v3477_v38, %s2987_s15  ;;  %1949 = vrot.lane.b32.xlu2 %v1321_v24, %s2989_s19 }
 0x6ab   :  { %2689 = vrot.lane.b32.xlu1 %v3462_v2, %s2987_s15  ;;  %v1564_v39 = vpop.permute.xlu2 %1563 }
 0x6b2   :  { %1986 = vrot.lane.b32.xlu2 %v1324_v29, %s2989_s19 }
 0x6b3   :  { %v1760_v50 = vpop.permute.xlu2 %1759 }
 0x6c3   :  { %v1560_v40 = vpop.permute.xlu0 %1559 }
 0x6d3   :  { %v1566_v63 = vpop.permute.xlu1 %1565  ;;  %v1762_v62 = vpop.permute.xlu0 %1761 }
 0x6d4   :  { %2572 = vmatpush.xpose.msk.msra.mxu3 %vm278_vm1, %v1566_v63 }
 0x6d8   :  { %2573 = vmatpush.xpose.msk.msra.mxu3 %vm278_vm1, %v1564_v39 }
 0x6db   :  { %v1756_v46 = vpop.permute.xlu1 %1755  ;;  %2574 = vmatmul.msk.f32.vlgmr.msra.gmra.mxu3 %vm278_vm1, %v1560_v40 }
 0x6dc   :  { %2584 = vmatpush.xpose.msk.msrb.mxu3 %vm278_vm1, %v1762_v62  ;;  %v1758_v54 = vpop.permute.xlu0 %1757 }
 0x6e0   :  { %2585 = vmatpush.xpose.msk.msrb.mxu3 %vm278_vm1, %v1760_v50 }
 0x6e3   :  { %v1562_v51 = vpop.permute.xlu1 %1561 }
 0x6e4   :  { %v1605_v41 = vpop.permute.xlu2 %1604  ;;  %2575 = vmatmul.msk.f32.gmra.mxu3 %vm278_vm1, %v1562_v51 }
 0x6e5   :  { %2576 = vmatpush.xpose.msk.msrb.mxu0 %vm278_vm1, %v1605_v41 }
 0x6ec   :  { %v1416_v55 = vpop.f32.mrf.mxu3  ;;  %v1954_v57 = vpop.permute.xlu2 %1953  ;;  %2586 = vmatmul.msk.f32.vlgmr.msrb.gmra.mxu3 %vm278_vm1, %v1756_v46 }
 0x6ed   :  { %2596 = vmatpush.xpose.msk.msra.mxu3 %vm278_vm1, %v1954_v57  ;;  %v1457_v58 = vsel %vm349_vm2, %v1416_v55, -inf }
 0x6ee   :  { %1458 = vmax.xlane.f32.xlu1 %v1457_v58 }
 0x6f3   :  { %v1599_v25 = vpop.permute.xlu0 %1598  ;;  %v1603_v60 = vpop.permute.xlu1 %1602 }
 0x6f4   :  { %v1419_v44 = vpop.f32.mrf.mxu3  ;;  %2577 = vmatpush.xpose.msk.msrb.mxu0 %vm278_vm1, %v1603_v60  ;;  %2587 = vmatmul.msk.f32.gmra.mxu3 %vm278_vm1, %v1758_v54  ;;  %v1601_v61 = vpop.permute.xlu2 %1600 }
 0x6f5   :  { %v1460_v48 = vsel %vm349_vm2, %v1419_v44, -inf }
 0x6f6   :  { %1461 = vmax.xlane.f32.xlu2 %v1460_v48 }
 0x6f7   :  { %2578 = vmatmul.msk.f32.vlgmr.msrb.gmra.mxu0 %vm278_vm1, %v1599_v25 }
 0x6fb   :  { %v1799_v0 = vpop.permute.xlu0 %1798 }
 0x6fc   :  { %v1795_v3 = vpop.permute.xlu2 %1794 }
 0x6fd   :  { %v1801_v45 = vpop.permute.xlu1 %1800 }
 0x6fe   :  { %2588 = vmatpush.xpose.msk.msra.mxu0 %vm278_vm1, %v1801_v45 }
 0x6ff   :  { %2579 = vmatmul.msk.f32.gmra.mxu0 %vm278_vm1, %v1601_v61 }
 0x702   :  { %2589 = vmatpush.xpose.msk.msra.mxu0 %vm278_vm1, %v1799_v0 }
 0x704   :  { %v1948_v4 = vpop.permute.xlu0 %1947  ;;  %v1950_v52 = vpop.permute.xlu2 %1949 }
 0x705   :  { %v1952_v5 = vpop.permute.xlu1 %1951 }
 0x706   :  { %2597 = vmatpush.xpose.msk.msra.mxu3 %vm278_vm1, %v1952_v5 }
 0x707   :  { %2699 = vrot.lane.b32.xlu1 %v3462_v2, %s2988_s16  ;;  %2590 = vmatmul.msk.f32.vlgmr.msra.gmra.mxu0 %vm278_vm1, %v1795_v3 }
 0x709   :  { %2598 = vmatmul.msk.f32.vlgmr.msra.gmra.mxu3 %vm278_vm1, %v1948_v4 }
 0x70c   :  { %v1993_v6 = vpop.permute.xlu0 %1992  ;;  %v1987_v56 = vpop.permute.xlu2 %1986 }
 0x70d   :  { %2600 = vmatpush.xpose.msk.msrb.mxu0 %vm278_vm1, %v1993_v6  ;;  %v1797_v7 = vpop.permute.xlu1 %1796 }
 0x70e   :  { %v1451_v31 = vpop.f32.mrf.mxu0 }
 0x70f   :  { %2591 = vmatmul.msk.f32.gmra.mxu0 %vm278_vm1, %v1797_v7  ;;  %v1463_v53 = vsel %vm349_vm2, %v1451_v31, -inf }
 0x710   :  { %1464 = vmax.xlane.f32.xlu0 %v1463_v53 }
 0x711   :  { %2599 = vmatmul.msk.f32.gmra.mxu3 %vm278_vm1, %v1950_v52 }
 0x714   :  { %v1989_v9 = vpop.permute.xlu0 %1988 }
 0x715   :  { %v1991_v11 = vpop.permute.xlu1 %1990 }
 0x716   :  { %2601 = vmatpush.xpose.msk.msrb.mxu0 %vm278_vm1, %v1991_v11  ;;  %v1454_v12 = vpop.f32.mrf.mxu0 }
 0x717   :  { %v1466_v13 = vsel %vm349_vm2, %v1454_v12, -inf }
 0x718   :  { %1467 = vmax.xlane.f32.xlu2 %v1466_v13 }
 0x719   :  { %2602 = vmatmul.msk.f32.vlgmr.msrb.gmra.mxu0 %vm278_vm1, %v1987_v56 }
 0x71c   :  { %v2695_v14 = vpop.permute.xlu0 %2694 }
 0x71d   :  { %v2696_v15 = vunpack.i.l.bf16 %v2695_v14  ;;  %v2690_v16 = vpop.permute.xlu1 %2689  ;;  %v2697_v34 = vunpack.i.h.bf16 %v2695_v14 }
 0x71e   :  { %v2691_v17 = vunpack.i.l.bf16 %v2690_v16  ;;  %v2692_v19 = vunpack.i.h.bf16 %v2690_v16 }
 0x71f   :  { %1746 = vmatpush.msra.mxu2 %v2696_v15 }
 0x720   :  { %1709 = vmatpush.msrb.mxu1 %v2691_v17 }
 0x721   :  { %1747 = vmatpush.msra.mxu2 %v2697_v34  ;;  %2603 = vmatmul.msk.f32.gmra.mxu0 %vm278_vm1, %v1989_v9 }
 0x722   :  { %1710 = vmatpush.msrb.mxu1 %v2692_v19 }
 0x75e   :  { %v3525_v49 = vpop.f32.mrf.mxu3 }
 0x75f   :  { %v1637_v1 = vsel %vm349_vm2, %v3525_v49, -inf }
 0x760   :  { %1638 = vmax.xlane.f32.xlu1 %v1637_v1 }
 0x761   :  { %v1459_v20 = vpop.xlane.xlu1 %1458 }
 0x762   :  { %v1469_v21 = vsub.f32 %v1416_v55, %v1459_v20 }
 0x764   :  { %v1473_v22 = vmul.f32 1.442695, %v1469_v21 }
 0x766   :  { %2798 = vpow2.f32 %v1473_v22 }
 0x767   :  { %v3529_v23 = vpop.f32.mrf.mxu3 }
 0x768   :  { %v1640_v24 = vsel %vm349_vm2, %v3529_v23, -inf }
 0x769   :  { %v1462_v27 = vpop.xlane.xlu2 %1461  ;;  %1641 = vmax.xlane.f32.xlu0 %v1640_v24 }
 0x76a   :  { %v1470_v29 = vsub.f32 %v1419_v44, %v1462_v27 }
 0x76c   :  { %v3533_v28 = vpop.eup %2798  ;;  %v1475_v32 = vmul.f32 1.442695, %v1470_v29 }
 0x76d   :  { %v1481_v30 = vsel %vm349_vm2, %v3533_v28, 0.0 }
 0x76e   :  { %1482 = vadd.xlane.f32.xlu2 %v1481_v30  ;;  %2800 = vpow2.f32 %v1475_v32 }
 0x76f   :  { %v3537_v18 = vpop.f32.mrf.mxu3 }
 0x770   :  { %v1833_v26 = vsel %vm349_vm2, %v3537_v18, -inf }
 0x774   :  { %v3539_v33 = vpop.f32.mrf.mxu0  ;;  %v3545_v36 = vpop.eup %2800 }
 0x775   :  { %v1643_v35 = vsel %vm349_vm2, %v3539_v33, -inf  ;;  %v1484_v40 = vsel %vm349_vm2, %v3545_v36, 0.0 }
 0x776   :  { %1834 = vmax.xlane.f32.xlu2 %v1833_v26  ;;  %1644 = vmax.xlane.f32.xlu1 %v1643_v35 }
 0x777   :  { %v3547_v42 = vpop.f32.mrf.mxu3 }
 0x778   :  { %v1836_v63 = vsel %vm349_vm2, %v3547_v42, -inf }
 0x77c   :  { %v3549_v43 = vpop.f32.mrf.mxu0 }
 0x77d   :  { %v1646_v39 = vsel %vm349_vm2, %v3549_v43, -inf }
 0x77e   :  { %1485 = vadd.xlane.f32.xlu2 %v1484_v40  ;;  %1647 = vmax.xlane.f32.xlu0 %v1646_v39 }
 0x77f   :  { %1837 = vmax.xlane.f32.xlu1 %v1836_v63 }
 0x783   :  { %v1465_v62 = vpop.xlane.xlu0 %1464 }
 0x784   :  { %v1471_v46 = vsub.f32 %v1451_v31, %v1465_v62  ;;  %v3557_v50 = vpop.f32.mrf.mxu0  ;;  %v2700_v31 = vpop.permute.xlu1 %2699 }
 0x785   :  { %v1839_v51 = vsel %vm349_vm2, %v3557_v50, -inf  ;;  %v2701_v21 = vunpack.i.l.bf16 %v2700_v31  ;;  %v2702_v24 = vunpack.i.h.bf16 %v2700_v31 }
 0x786   :  { %v1477_v41 = vmul.f32 1.442695, %v1471_v46  ;;  %1840 = vmax.xlane.f32.xlu2 %v1839_v51 }
 0x788   :  { %2802 = vpow2.f32 %v1477_v41 }
 0x78b   :  { %v1468_v54 = vpop.xlane.xlu2 %1467 }
 0x78c   :  { %v1472_v55 = vsub.f32 %v1454_v12, %v1468_v54  ;;  %v3561_v57 = vpop.f32.mrf.mxu0  ;;  %v3577_v3 = vpop.f32.mrf.mxu3 }
 0x78d   :  { %v1842_v58 = vsel %vm349_vm2, %v3561_v57, -inf  ;;  %v2025_v6 = vsel %vm349_vm2, %v3577_v3, -inf }
 0x78e   :  { %v3565_v25 = vpop.eup %2802  ;;  %v1479_v60 = vmul.f32 1.442695, %v1472_v55  ;;  %1843 = vmax.xlane.f32.xlu1 %v1842_v58 }
 0x78f   :  { %v1487_v44 = vsel %vm349_vm2, %v3565_v25, 0.0 }
 0x790   :  { %2804 = vpow2.f32 %v1479_v60  ;;  %1488 = vadd.xlane.f32.xlu0 %v1487_v44 }
 0x794   :  { %v3585_v7 = vpop.f32.mrf.mxu3 }
 0x795   :  { %v2028_v52 = vsel %vm349_vm2, %v3585_v7, -inf }
 0x796   :  { %v3569_v48 = vpop.eup %2804  ;;  %v3571_v61 = vpop.f32.mrf.mxu0 }
 0x797   :  { %v2031_v0 = vsel %vm349_vm2, %v3571_v61, -inf  ;;  %v1490_v45 = vsel %vm349_vm2, %v3569_v48, 0.0 }
 0x798   :  { %2032 = vmax.xlane.f32.xlu1 %v2031_v0  ;;  %1491 = vadd.xlane.f32.xlu0 %v1490_v45 }
 0x79e   :  { %v3579_v4 = vpop.f32.mrf.mxu0 }
 0x79f   :  { %v2034_v5 = vsel %vm349_vm2, %v3579_v4, -inf }
 0x7a0   :  { %2035 = vmax.xlane.f32.xlu1 %v2034_v5  ;;  %2026 = vmax.xlane.f32.xlu0 %v2025_v6 }
 0x7a8   :  { %2029 = vmax.xlane.f32.xlu0 %v2028_v52 }
 0x7d3   :  { %v1639_v53 = vpop.xlane.xlu1 %1638 }
 0x7d4   :  { %v1649_v9 = vsub.f32 %v3525_v49, %v1639_v53 }
 0x7d6   :  { %v1653_v11 = vmul.f32 1.442695, %v1649_v9 }
 0x7d8   :  { %2806 = vpow2.f32 %v1653_v11 }
 0x7dc   :  { %v1642_v12 = vpop.xlane.xlu0 %1641 }
 0x7dd   :  { %v1650_v13 = vsub.f32 %v3529_v23, %v1642_v12 }
 0x7de   :  { %v3591_v56 = vpop.eup %2806 }
 0x7df   :  { %v1655_v14 = vmul.f32 1.442695, %v1650_v13  ;;  %v1661_v15 = vsel %vm349_vm2, %v3591_v56, 0.0 }
 0x7e0   :  { %1662 = vadd.xlane.f32.xlu2 %v1661_v15 }
 0x7e1   :  { %2808 = vpow2.f32 %v1655_v14  ;;  %v1483_v16 = vpop.xlane.xlu2 %1482 }
 0x7e2   :  { %2810 = vrcp.f32 %v1483_v16 }
 0x7e7   :  { %v3595_v17 = vpop.eup %2808 }
 0x7e8   :  { %v2811_v34 = vpop.eup %2810  ;;  %v1664_v19 = vsel %vm349_vm2, %v3595_v17, 0.0 }
 0x7e9   :  { %v1497_v49 = vmul.f32 %v2811_v34, %v3533_v28  ;;  %v1835_v1 = vpop.xlane.xlu2 %1834  ;;  %1665 = vadd.xlane.f32.xlu2 %v1664_v19  ;;  %v1645_v20 = vpop.xlane.xlu1 %1644 }
 0x7ea   :  { %v1845_v22 = vsub.f32 %v3537_v18, %v1835_v1  ;;  %v1651_v23 = vsub.f32 %v3539_v33, %v1645_v20 }
 0x7eb   :  { %2568 = vmatmul.msk.f32.vlgmr.msra.gmra.mxu1 %vm349_vm2, %v1497_v49 }
 0x7ec   :  { %v1849_v27 = vmul.f32 1.442695, %v1845_v22  ;;  %v1657_v29 = vmul.f32 1.442695, %v1651_v23  ;;  %1903 = vmatpush.msra.mxu1 %v2701_v21 }
 0x7ee   :  { %2812 = vpow2.f32 %v1849_v27  ;;  %1904 = vmatpush.msra.mxu1 %v2702_v24 }
 0x7ef   :  { %2814 = vpow2.f32 %v1657_v29 }
 0x7f1   :  { %v1486_v30 = vpop.xlane.xlu2 %1485  ;;  %v1648_v32 = vpop.xlane.xlu0 %1647 }
 0x7f2   :  { %2816 = vrcp.f32 %v1486_v30  ;;  %v1652_v28 = vsub.f32 %v3549_v43, %v1648_v32  ;;  %v1838_v26 = vpop.xlane.xlu1 %1837 }
 0x7f3   :  { %v1846_v33 = vsub.f32 %v3547_v42, %v1838_v26 }
 0x7f4   :  { %v3604_v35 = vpop.eup %2812  ;;  %v1659_v18 = vmul.f32 1.442695, %v1652_v28 }
 0x7f5   :  { %v3607_v40 = vpop.eup %2814  ;;  %v1857_v39 = vsel %vm349_vm2, %v3604_v35, 0.0  ;;  %v1851_v46 = vmul.f32 1.442695, %v1846_v33 }
 0x7f6   :  { %2818 = vpow2.f32 %v1659_v18  ;;  %1858 = vadd.xlane.f32.xlu2 %v1857_v39  ;;  %v1667_v63 = vsel %vm349_vm2, %v3607_v40, 0.0 }
 0x7f7   :  { %1668 = vadd.xlane.f32.xlu0 %v1667_v63  ;;  %2820 = vpow2.f32 %v1851_v46 }
 0x7f8   :  { %v2817_v62 = vpop.eup %2816 }
 0x7f9   :  { %v1841_v43 = vpop.xlane.xlu2 %1840  ;;  %v1498_v51 = vmul.f32 %v2817_v62, %v3545_v36 }
 0x7fa   :  { %v1847_v41 = vsub.f32 %v3557_v50, %v1841_v43 }
 0x7fb   :  { %2569 = vmatmul.msk.f32.gmra.mxu1 %vm349_vm2, %v1498_v51 }
 0x7fc   :  { %v3616_v42 = vpop.eup %2818  ;;  %v1853_v54 = vmul.f32 1.442695, %v1847_v41 }
 0x7fd   :  { %v1670_v55 = vsel %vm349_vm2, %v3616_v42, 0.0  ;;  %v3620_v58 = vpop.eup %2820 }
 0x7fe   :  { %2822 = vpow2.f32 %v1853_v54  ;;  %1671 = vadd.xlane.f32.xlu2 %v1670_v55  ;;  %v1860_v50 = vsel %vm349_vm2, %v3620_v58, 0.0 }
 0x801   :  { %v1844_v52 = vpop.xlane.xlu1 %1843 }
 0x802   :  { %v1848_v1 = vsub.f32 %v3561_v57, %v1844_v52 }
 0x803   :  { %v1489_v60 = vpop.xlane.xlu0 %1488 }
 0x804   :  { %v3622_v44 = vpop.eup %2822  ;;  %2824 = vrcp.f32 %v1489_v60  ;;  %v1855_v21 = vmul.f32 1.442695, %v1848_v1 }
 0x805   :  { %v1863_v36 = vsel %vm349_vm2, %v3622_v44, 0.0 }
 0x806   :  { %1864 = vadd.xlane.f32.xlu0 %v1863_v36  ;;  %1861 = vadd.xlane.f32.xlu2 %v1860_v50 }
 0x80a   :  { %v2825_v0 = vpop.eup %2824 }
 0x80b   :  { %v1499_v45 = vmul.f32 %v2825_v0, %v3565_v25  ;;  %v1492_v5 = vpop.xlane.xlu0 %1491  ;;  %v2033_v25 = vpop.xlane.xlu1 %2032 }
 0x80c   :  { %2826 = vrcp.f32 %v1492_v5 }
 0x80d   :  { %2570 = vmatmul.msk.f32.vlgmr.msrb.gmra.mxu2 %vm349_vm2, %v1499_v45 }
 0x812   :  { %v2827_v6 = vpop.eup %2826 }
 0x813   :  { %v2027_v31 = vpop.xlane.xlu0 %2026  ;;  %v1500_v53 = vmul.f32 %v2827_v6, %v3569_v48  ;;  %v2039_v48 = vsub.f32 %v3571_v61, %v2033_v25  ;;  %v2036_v19 = vpop.xlane.xlu1 %2035 }
 0x814   :  { %v2037_v9 = vsub.f32 %v3577_v3, %v2027_v31  ;;  %v2040_v61 = vsub.f32 %v3579_v4, %v2036_v19 }
 0x815   :  { %2571 = vmatmul.msk.f32.gmra.mxu2 %vm349_vm2, %v1500_v53  ;;  %v2045_v16 = vmul.f32 1.442695, %v2039_v48 }
 0x816   :  { %v2041_v11 = vmul.f32 1.442695, %v2037_v9  ;;  %v2047_v20 = vmul.f32 1.442695, %v2040_v61 }
 0x818   :  { %2828 = vpow2.f32 %v2041_v11 }
 0x81a   :  { %2709 = vrot.lane.b32.xlu0 %v3462_v2, %s2989_s19 }
 0x81b   :  { %v2030_v12 = vpop.xlane.xlu0 %2029 }
 0x81c   :  { %v2038_v13 = vsub.f32 %v3585_v7, %v2030_v12 }
 0x81e   :  { %v2043_v14 = vmul.f32 1.442695, %v2038_v13  ;;  %2704 = vrot.lane.b32.xlu2 %v3477_v38, %s2988_s16  ;;  %v3638_v15 = vpop.eup %2828 }
 0x81f   :  { %v2049_v3 = vsel %vm349_vm2, %v3638_v15, 0.0 }
 0x820   :  { %2830 = vpow2.f32 %v2043_v14  ;;  %2050 = vadd.xlane.f32.xlu1 %v2049_v3 }
 0x821   :  { %2832 = vpow2.f32 %v2045_v16 }
 0x822   :  { %2834 = vpow2.f32 %v2047_v20 }
 0x823   :  { %2836 = vpow2.f32 %v1855_v21 }
 0x826   :  { %v3643_v34 = vpop.eup %2830 }
 0x827   :  { %v2052_v2 = vsel %vm349_vm2, %v3643_v34, 0.0  ;;  %v3647_v7 = vpop.eup %2832 }
 0x828   :  { %2053 = vadd.xlane.f32.xlu1 %v2052_v2  ;;  %v2055_v49 = vsel %vm349_vm2, %v3647_v7, 0.0  ;;  %v3653_v22 = vpop.eup %2834 }
 0x829   :  { %v3655_v23 = vpop.eup %2836  ;;  %v2058_v24 = vsel %vm349_vm2, %v3653_v22, 0.0 }
 0x82a   :  { %v1866_v27 = vsel %vm349_vm2, %v3655_v23, 0.0 }
 0x830   :  { %2056 = vadd.xlane.f32.xlu1 %v2055_v49 }
 0x844   :  { %2059 = vadd.xlane.f32.xlu0 %v2058_v24 }
 0x847   :  { %1867 = vadd.xlane.f32.xlu2 %v1866_v27 }
 0x849   :  { %2714 = vrot.lane.b32.xlu1 %v3477_v38, %s2989_s19 }
 0x853   :  { %v1663_v57 = vpop.xlane.xlu2 %1662 }
 0x854   :  { %2838 = vrcp.f32 %v1663_v57  ;;  %v2217_v57 = vld [vmem:[#allocation5 + $0xf8] sm:$0xff] }
 0x855   :  { %2219 = vmatpush.msrb.mxu3 %v2217_v57 }
 0x85a   :  { %v2839_v4 = vpop.eup %2838 }
 0x85b   :  { %v1677_v29 = vmul.f32 %v2839_v4, %v3591_v56  ;;  %v2216_v4 = vld [vmem:[#allocation5 + $0xf0] sm:$0xff] }
 0x85c   :  { %v1666_v30 = vpop.xlane.xlu2 %1665  ;;  %2220 = vmatpush.msrb.mxu3 %v2216_v4 }
 0x85d   :  { %2840 = vrcp.f32 %v1666_v30  ;;  %2580 = vmatmul.msk.f32.vlgmr.msrb.gmra.mxu1 %vm349_vm2, %v1677_v29  ;;  %v2215_v29 = vld [vmem:[#allocation5 + $0xe8] sm:$0xff]  ;;  %v2214_v30 = vld [vmem:[#allocation5 + $0xe0] sm:$0xff] }
 0x85e   :  { %2221 = vmatpush.msrb.mxu3 %v2215_v29 }
 0x860   :  { %2222 = vmatpush.msrb.mxu3 %v2214_v30 }
 0x863   :  { %v2841_v32 = vpop.eup %2840 }
 0x864   :  { %v1678_v28 = vmul.f32 %v2841_v32, %v3595_v17  ;;  %v2213_v32 = vld [vmem:[#allocation5 + $0xd8] sm:$0xff] }
 0x865   :  { %2223 = vmatpush.msrb.mxu3 %v2213_v32 }
 0x866   :  { %2581 = vmatmul.msk.f32.gmra.mxu1 %vm349_vm2, %v1678_v28  ;;  %v2212_v28 = vld [vmem:[#allocation5 + $0xd0] sm:$0xff] }
 0x867   :  { %2224 = vmatpush.msrb.mxu3 %v2212_v28 }
 0x869   :  { %v1859_v26 = vpop.xlane.xlu2 %1858 }
 0x86a   :  { %2842 = vrcp.f32 %v1859_v26  ;;  %v1669_v18 = vpop.xlane.xlu0 %1668  ;;  %v2211_v26 = vld [vmem:[#allocation5 + $0xc8] sm:$0xff] }
 0x86b   :  { %2844 = vrcp.f32 %v1669_v18  ;;  %v2210_v18 = vld [vmem:[#allocation5 + $0xc0] sm:$0xff]  ;;  %2225 = vmatpush.msrb.mxu3 %v2211_v26 }
 0x86d   :  { %2226 = vmatpush.msrb.mxu3 %v2210_v18  ;;  %v2358_v18 = vld [vmem:[#allocation7 + $0x78] sm:$0xff] }
 0x86e   :  { %2360 = vmatpush.msra.mxu0 %v2358_v18 }
 0x870   :  { %v2843_v33 = vpop.eup %2842 }
 0x871   :  { %v2845_v38 = vpop.eup %2844  ;;  %v1873_v39 = vmul.f32 %v2843_v33, %v3604_v35  ;;  %v1672_v63 = vpop.xlane.xlu2 %1671  ;;  %v2209_v33 = vld [vmem:[#allocation5 + $0xb8] sm:$0xff] }
 0x872   :  { %v1679_v56 = vmul.f32 %v2845_v38, %v3607_v40  ;;  %2846 = vrcp.f32 %v1672_v63  ;;  %2227 = vmatpush.msrb.mxu3 %v2209_v33  ;;  %v2207_v63 = vld [vmem:[#allocation5 + $0xa8] sm:$0xff]  ;;  %v2357_v33 = vld [vmem:[#allocation7 + $0x70] sm:$0xff] }
 0x873   :  { %2592 = vmatmul.msk.f32.vlgmr.msra.gmra.mxu1 %vm349_vm2, %v1873_v39  ;;  %v2208_v39 = vld [vmem:[#allocation5 + $0xb0] sm:$0xff]  ;;  %2361 = vmatpush.msra.mxu0 %v2357_v33 }
 0x874   :  { %2582 = vmatmul.msk.f32.vlgmr.msra.gmra.mxu2 %vm349_vm2, %v1679_v56  ;;  %2228 = vmatpush.msrb.mxu3 %v2208_v39  ;;  %v2206_v56 = vld [vmem:[#allocation5 + $0xa0] sm:$0xff] }
 0x876   :  { %2229 = vmatpush.msrb.mxu3 %v2207_v63 }
 0x878   :  { %v2847_v62 = vpop.eup %2846  ;;  %2230 = vmatpush.msrb.mxu3 %v2206_v56 }
 0x879   :  { %v1865_v17 = vpop.xlane.xlu0 %1864  ;;  %v1862_v46 = vpop.xlane.xlu2 %1861  ;;  %v1680_v43 = vmul.f32 %v2847_v62, %v3616_v42  ;;  %v2205_v62 = vld [vmem:[#allocation5 + $0x98] sm:$0xff] }
 0x87a   :  { %2848 = vrcp.f32 %v1862_v46  ;;  %v2204_v46 = vld [vmem:[#allocation5 + $0x90] sm:$0xff]  ;;  %2231 = vmatpush.msrb.mxu3 %v2205_v62  ;;  %v2356_v62 = vld [vmem:[#allocation7 + $0x68] sm:$0xff] }
 0x87b   :  { %2850 = vrcp.f32 %v1865_v17  ;;  %2362 = vmatpush.msra.mxu0 %v2356_v62 }
 0x87c   :  { %2583 = vmatmul.msk.f32.gmra.mxu2 %vm349_vm2, %v1680_v43  ;;  %2232 = vmatpush.msrb.mxu3 %v2204_v46  ;;  %v2203_v43 = vld [vmem:[#allocation5 + $0x88] sm:$0xff]  ;;  %v2354_v46 = vld [vmem:[#allocation7 + $0x58] sm:$0xff] }
 0x87e   :  { %2233 = vmatpush.msrb.mxu3 %v2203_v43  ;;  %v2353_v43 = vld [vmem:[#allocation7 + $0x50] sm:$0xff] }
 0x880   :  { %v2849_v51 = vpop.eup %2848 }
 0x881   :  { %v2705_v41 = vpop.permute.xlu2 %2704  ;;  %v2851_v35 = vpop.eup %2850  ;;  %v1874_v40 = vmul.f32 %v2849_v51, %v3620_v58 }
 0x882   :  { %v2706_v54 = vunpack.i.l.bf16 %v2705_v41  ;;  %v2707_v55 = vunpack.i.h.bf16 %v2705_v41  ;;  %v1875_v60 = vmul.f32 %v2851_v35, %v3622_v44  ;;  %v2202_v41 = vld [vmem:[#allocation5 + $0x80] sm:$0xff] }
 0x883   :  { %2593 = vmatmul.msk.f32.gmra.mxu1 %vm349_vm2, %v1874_v40  ;;  %2234 = vmatpush.msrb.mxu3 %v2202_v41  ;;  %v2351_v41 = vld [vmem:[#allocation7 + $0x40] sm:$0xff] }
 0x884   :  { %1938 = vmatpush.msrb.mxu2 %v2706_v54 }
 0x886   :  { %1939 = vmatpush.msrb.mxu2 %v2707_v55 }
 0x887   :  { %2594 = vmatmul.msk.f32.vlgmr.msrb.gmra.mxu2 %vm349_vm2, %v1875_v60 }
 0x88c   :  { %v2710_v42 = vpop.permute.xlu0 %2709 }
 0x88d   :  { %v2711_v36 = vunpack.i.l.bf16 %v2710_v42  ;;  %v2712_v50 = vunpack.i.h.bf16 %v2710_v42 }
 0x88f   :  { %2095 = vmatpush.msrb.mxu1 %v2711_v36 }
 0x890   :  { %v3691_v61 = vpop.f32.mrf.mxu2 }
 0x891   :  { %2096 = vmatpush.msrb.mxu1 %v2712_v50 }
 0x893   :  { %v2051_v0 = vpop.xlane.xlu1 %2050 }
 0x894   :  { %2852 = vrcp.f32 %v2051_v0 }
 0x898   :  { %v3694_v1 = vpop.f32.mrf.mxu2 }
 0x89a   :  { %v2853_v45 = vpop.eup %2852 }
 0x89b   :  { %v2065_v5 = vmul.f32 %v2853_v45, %v3638_v15  ;;  %v2054_v58 = vpop.xlane.xlu1 %2053  ;;  %v3683_v15 = vpop.f32.mrf.mxu1 }
 0x89c   :  { %2854 = vrcp.f32 %v2054_v58 }
 0x89d   :  { %2604 = vmatmul.msk.f32.vlgmr.msrb.gmra.mxu1 %vm349_vm2, %v2065_v5 }
 0x8a2   :  { %v2855_v6 = vpop.eup %2854 }
 0x8a3   :  { %v2066_v44 = vmul.f32 %v2855_v6, %v3643_v34  ;;  %v2057_v52 = vpop.xlane.xlu1 %2056  ;;  %v3687_v16 = vpop.f32.mrf.mxu1 }
 0x8a5   :  { %2605 = vmatmul.msk.f32.gmra.mxu1 %vm349_vm2, %v2066_v44 }
 0x8b7   :  { %v2060_v13 = vpop.xlane.xlu0 %2059 }
 0x8ba   :  { %v1868_v31 = vpop.xlane.xlu2 %1867 }
 0x8bb   :  { %2856 = vrcp.f32 %v1868_v31  ;;  %v2715_v53 = vpop.permute.xlu1 %2714 }
 0x8bc   :  { %v2716_v9 = vunpack.i.l.bf16 %v2715_v53  ;;  %v2717_v11 = vunpack.i.h.bf16 %v2715_v53  ;;  %2858 = vrcp.f32 %v2057_v52 }
 0x8bd   :  { %2860 = vrcp.f32 %v2060_v13 }
 0x8be   :  { %2130 = vmatpush.msra.mxu2 %v2716_v9 }
 0x8c0   :  { %2131 = vmatpush.msra.mxu2 %v2717_v11 }
 0x8c1   :  { %v2857_v12 = vpop.eup %2856 }
 0x8c2   :  { %v1876_v25 = vmul.f32 %v2857_v12, %v3655_v23  ;;  %v2859_v14 = vpop.eup %2858 }
 0x8c3   :  { %v2067_v48 = vmul.f32 %v2859_v14, %v3647_v7  ;;  %v2861_v3 = vpop.eup %2860 }
 0x8c4   :  { %2595 = vmatmul.msk.f32.gmra.mxu2 %vm349_vm2, %v1876_v25  ;;  %v2068_v34 = vmul.f32 %v2861_v3, %v3653_v22  ;;  %v3725_v3 = vld [vmem:[%s3790_s6 + $0x4] sm:$0x7] }
 0x8cc   :  { %2606 = vmatmul.msk.f32.vlgmr.msra.gmra.mxu2 %vm349_vm2, %v2067_v48 }
 0x8d4   :  { %2607 = vmatmul.msk.f32.gmra.mxu2 %vm349_vm2, %v2068_v34 }
 0x8da   :  { %v1712_v2 = vpop.f32.mrf.mxu1 }
 0x8e3   :  { %v1715_v19 = vpop.f32.mrf.mxu1 }
 0x8e4   :  { %v2718_v49 = vpack.i.bf16 %v1715_v19, %v1712_v2 }
 0x8e6   :  { %2719 = vrot.lane.b32.xlu2 %v2718_v49, %s2989_s19 }
 0x8f0   :  { %v1906_v20 = vpop.f32.mrf.mxu1 }
 0x8f1   :  { %2159 = vrot.lane.b32.xlu1 %v1906_v20, %s2988_s16 }
 0x8f7   :  { %v1749_v7 = vpop.f32.mrf.mxu2 }
 0x8ff   :  { %v1752_v23 = vpop.f32.mrf.mxu2 }
 0x900   :  { %v1909_v21 = vpop.f32.mrf.mxu1 }
 0x901   :  { %2161 = vrot.lane.b32.xlu1 %v1909_v21, %s2988_s16 }
 0x909   :  { %2147 = vrot.lane.b32.xlu1 %v1749_v7, %s2989_s19 }
 0x90a   :  { %v1941_v22 = vpop.f32.mrf.mxu2 }
 0x90b   :  { %2163 = vrot.lane.b32.xlu0 %v1941_v22, %s2988_s16 }
 0x911   :  { %2149 = vrot.lane.b32.xlu1 %v1752_v23, %s2989_s19 }
 0x91a   :  { %v2098_v24 = vpop.f32.mrf.mxu1 }
 0x91b   :  { %2175 = vrot.lane.b32.xlu2 %v2098_v24, %s2987_s15 }
 0x922   :  { %v2101_v27 = vpop.f32.mrf.mxu1 }
 0x923   :  { %2177 = vrot.lane.b32.xlu2 %v2101_v27, %s2987_s15 }
 0x940   :  { %v2720_v35 = vpop.permute.xlu2 %2719 }
 0x941   :  { %v2721_v54 = vunpack.i.l.bf16 %v2720_v35  ;;  %v2722_v50 = vunpack.i.h.bf16 %v2720_v35  ;;  %v2350_v35 = vld [vmem:[#allocation7 + $0x38] sm:$0xff] }
 0x943   :  { %v2187_v55 = vsel %vm278_vm1, %v3683_v15, %v2721_v54  ;;  %v2188_v45 = vsel %vm278_vm1, %v3687_v16, %v2722_v50  ;;  %v2218_v16 = vperm.slane %v3725_v3, 0  ;;  %v2349_v54 = vld [vmem:[#allocation7 + $0x30] sm:$0xff]  ;;  %v2343_v50 = vld [vmem:[#allocation7] sm:$0xff] }
 0x947   :  { %v1944_v38 = vpop.f32.mrf.mxu2 }
 0x94f   :  { %v2133_v17 = vpop.f32.mrf.mxu2 }
 0x950   :  { %2179 = vrot.lane.b32.xlu2 %v2133_v17, %s2987_s15  ;;  %v2355_v17 = vld [vmem:[#allocation7 + $0x60] sm:$0xff] }
 0x951   :  { %2363 = vmatpush.msra.mxu0 %v2355_v17 }
 0x953   :  { %2364 = vmatpush.msra.mxu0 %v2354_v46 }
 0x955   :  { %2365 = vmatpush.msra.mxu0 %v2353_v43 }
 0x957   :  { %v2136_v51 = vpop.f32.mrf.mxu2 }
 0x958   :  { %2181 = vrot.lane.b32.xlu1 %v2136_v51, %s2987_s15  ;;  %2165 = vrot.lane.b32.xlu2 %v1944_v38, %s2988_s16  ;;  %v2352_v51 = vld [vmem:[#allocation7 + $0x48] sm:$0xff] }
 0x959   :  { %2366 = vmatpush.msra.mxu0 %v2352_v51 }
 0x95b   :  { %2367 = vmatpush.msra.mxu0 %v2351_v41 }
 0x95d   :  { %2368 = vmatpush.msra.mxu0 %v2350_v35  ;;  %v2342_v35 = vld [vmem:[%s3792_s8] sm:$0x7]  ;;  %s2991_s8 = smov [#allocation8]  }
 0x95e   :  { %s2491_s25 = sshll.u32 %s2991_s8, 4  ;;  %s2492_s25 = int_to_ptr.vmem [resolvable:$true] %s2491_s25 }
 0x95f   :  { %2369 = vmatpush.msra.mxu0 %v2349_v54  ;;  %v2359_v54 = vperm.slane %v2342_v35, 0 }
 0x963   :  { %v2160_v40 = vpop.permute.xlu1 %2159 }
 0x964   :  { %v2191_v60 = vsel %vm1084_vm3, %v2187_v55, %v2160_v40  ;;  %v2348_v40 = vld [vmem:[#allocation7 + $0x28] sm:$0xff]  ;;  %v2347_v55 = vld [vmem:[#allocation7 + $0x20] sm:$0xff] }
 0x965   :  { %2370 = vmatpush.msra.mxu0 %v2348_v40 }
 0x967   :  { %2371 = vmatpush.msra.mxu0 %v2347_v55 }
 0x973   :  { %v2162_v0 = vpop.permute.xlu1 %2161 }
 0x974   :  { %v2192_v5 = vsel %vm1084_vm3, %v2188_v45, %v2162_v0 }
 0x975   :  { %v2176_v42 = vpop.permute.xlu2 %2175 }
 0x976   :  { %v2195_v36 = vsel %vm1089_vm4, %v2191_v60, %v2176_v42  ;;  %v2346_v60 = vld [vmem:[#allocation7 + $0x18] sm:$0xff]  ;;  %v2345_v42 = vld [vmem:[#allocation7 + $0x10] sm:$0xff] }
 0x977   :  { %2235 = vmatmul.f32.vlgmr.msrb.gmra.mxu3 %v2195_v36  ;;  %2372 = vmatpush.msra.mxu0 %v2346_v60  ;;  %v2344_v36 = vld [vmem:[#allocation7 + $0x8] sm:$0xff] }
 0x979   :  { %2373 = vmatpush.msra.mxu0 %v2345_v42 }
 0x97b   :  { %v2148_v44 = vpop.permute.xlu1 %2147  ;;  %2374 = vmatpush.msra.mxu0 %v2344_v36 }
 0x97c   :  { %v2189_v52 = vsel %vm278_vm1, %v3691_v61, %v2148_v44 }
 0x97d   :  { %v2178_v58 = vpop.permute.xlu2 %2177  ;;  %v2164_v31 = vpop.permute.xlu0 %2163  ;;  %2375 = vmatpush.msra.mxu0 %v2343_v50 }
 0x97e   :  { %v2196_v6 = vsel %vm1089_vm4, %v2192_v5, %v2178_v58  ;;  %v2193_v53 = vsel %vm1084_vm3, %v2189_v52, %v2164_v31 }
 0x97f   :  { %2238 = vmatmul.f32.gmra.mxu3 %v2196_v6 }
 0x983   :  { %v2150_v12 = vpop.permute.xlu1 %2149 }
 0x984   :  { %v2190_v13 = vsel %vm278_vm1, %v3694_v1, %v2150_v12 }
 0x9aa   :  { %v2180_v9 = vpop.permute.xlu2 %2179 }
 0x9ab   :  { %v2197_v11 = vsel %vm1089_vm4, %v2193_v53, %v2180_v9 }
 0x9ac   :  { %2241 = vmatmul.f32.gmra.mxu3 %v2197_v11 }
 0x9b2   :  { %v2166_v25 = vpop.permute.xlu2 %2165 }
 0x9b3   :  { %v2194_v14 = vsel %vm1084_vm3, %v2190_v13, %v2166_v25 }
 0x9ca   :  { %v2182_v15 = vpop.permute.xlu1 %2181 }
 0x9cb   :  { %v2198_v48 = vsel %vm1089_vm4, %v2194_v14, %v2182_v15  ;;  %v2332_v14 = vperm.slane %v3725_v3, 1 }
 0x9cc   :  { %2244 = vmatmul.f32.gmra.mxu3 %v2198_v48 }
 0x9fa   :  { %v2236_v34 = vpop.f32.mrf.mxu3 }
 0x9fb   :  { %v2237_v2 = vadd.f32 %v2236_v34, %v2218_v16 }
 0x9fd   :  { %v2248_v19 = vadd.f32 %v2237_v2, %v3427_v37 }
 0x9ff   :  { %2252 = vadd.xlane.f32.xlu2 %v2248_v19 }
 0xa02   :  { %v2239_v49 = vpop.f32.mrf.mxu3 }
 0xa03   :  { %v2240_v61 = vadd.f32 %v2239_v49, %v2218_v16 }
 0xa05   :  { %v2249_v1 = vadd.f32 %v2240_v61, %v3433_v47 }
 0xa07   :  { %2254 = vadd.xlane.f32.xlu0 %v2249_v1 }
 0xa2f   :  { %v2242_v20 = vpop.f32.mrf.mxu3 }
 0xa30   :  { %v2243_v7 = vadd.f32 %v2242_v20, %v2218_v16 }
 0xa32   :  { %v2250_v21 = vadd.f32 %v2243_v7, %v3441_v8 }
 0xa34   :  { %2256 = vadd.xlane.f32.xlu1 %v2250_v21 }
 0xa4f   :  { %v2245_v23 = vpop.f32.mrf.mxu3 }
 0xa50   :  { %v2246_v22 = vadd.f32 %v2245_v23, %v2218_v16  ;;  %v2337_v16 = vperm.slane %v3725_v3, 2 }
 0xa52   :  { %v2251_v24 = vadd.f32 %v2246_v22, %v3447_v10 }
 0xa54   :  { %2258 = vadd.xlane.f32.xlu2 %v2251_v24 }
 0xa72   :  { %v2253_v27 = vpop.xlane.xlu2 %2252 }
 0xa73   :  { %v2260_v57 = vmul.f32 %v2253_v27, %v3400_v59 }
 0xa75   :  { %v3733_v37 = vsub.f32 %v2248_v19, %v2260_v57 }
 0xa77   :  { %v2268_v4 = vmul.f32 %v3733_v37, %v3733_v37 }
 0xa79   :  { %2272 = vadd.xlane.f32.xlu0 %v2268_v4 }
 0xa7a   :  { %v2255_v47 = vpop.xlane.xlu0 %2254 }
 0xa7b   :  { %v2261_v29 = vmul.f32 %v2255_v47, %v3400_v59 }
 0xa7d   :  { %v3738_v30 = vsub.f32 %v2249_v1, %v2261_v29 }
 0xa7f   :  { %v2269_v8 = vmul.f32 %v3738_v30, %v3738_v30 }
 0xa81   :  { %2274 = vadd.xlane.f32.xlu1 %v2269_v8 }
 0xaa7   :  { %v2257_v10 = vpop.xlane.xlu1 %2256 }
 0xaa8   :  { %v2262_v32 = vmul.f32 %v2257_v10, %v3400_v59 }
 0xaaa   :  { %v3743_v28 = vsub.f32 %v2250_v21, %v2262_v32 }
 0xaac   :  { %v2270_v26 = vmul.f32 %v3743_v28, %v3743_v28 }
 0xaae   :  { %2276 = vadd.xlane.f32.xlu2 %v2270_v26 }
 0xac7   :  { %v2259_v38 = vpop.xlane.xlu2 %2258 }
 0xac8   :  { %v2263_v39 = vmul.f32 %v2259_v38, %v3400_v59 }
 0xaca   :  { %v3748_v63 = vsub.f32 %v2251_v24, %v2263_v39 }
 0xacc   :  { %v2271_v56 = vmul.f32 %v3748_v63, %v3748_v63 }
 0xace   :  { %2278 = vadd.xlane.f32.xlu0 %v2271_v56 }
 0xaec   :  { %v2273_v0 = vpop.xlane.xlu0 %2272 }
 0xaed   :  { %v2280_v45 = vmul.f32 %v2273_v0, %v3400_v59 }
 0xaef   :  { %v2284_v5 = vadd.f32 1e-05, %v2280_v45 }
 0xaf1   :  { %2862 = vrsqrt.f32 %v2284_v5  ;;  %vm2294_vm2 = vweird.f32 %v2284_v5 }
 0xaf4   :  { %v2275_v58 = vpop.xlane.xlu1 %2274 }
 0xaf5   :  { %v2281_v6 = vmul.f32 %v2275_v58, %v3400_v59 }
 0xaf7   :  { %v2863_v44 = vpop.eup %2862  ;;  %v2285_v52 = vadd.f32 1e-05, %v2281_v6 }
 0xaf8   :  { %v2289_v31 = vmul.f32 %v2863_v44, %v2284_v5  ;;  %vm2295_vm1 = vweird.f32 %v2863_v44 }
 0xaf9   :  { %2864 = vrsqrt.f32 %v2285_v52  ;;  %vm2296_vm3 = vmor %vm2294_vm2, %vm2295_vm1  ;;  %vm2304_vm6 = vweird.f32 %v2285_v52 }
 0xafa   :  { %v2290_v53 = vmul.f32 %v2863_v44, %v2289_v31 }
 0xafc   :  { %v2291_v9 = vmul.f32 0.5, %v2290_v53 }
 0xafe   :  { %v2292_v11 = vsub.f32 1.5, %v2291_v9 }
 0xaff   :  { %v2865_v12 = vpop.eup %2864 }
 0xb00   :  { %v2293_v25 = vmul.f32 %v2863_v44, %v2292_v11  ;;  %v2299_v13 = vmul.f32 %v2865_v12, %v2285_v52  ;;  %vm2305_vm4 = vweird.f32 %v2865_v12 }
 0xb01   :  { %vm2306_vm7 = vmor %vm2304_vm6, %vm2305_vm4 }
 0xb02   :  { %v2297_v15 = vsel %vm2296_vm3, %v2863_v44, %v2293_v25  ;;  %v2300_v48 = vmul.f32 %v2865_v12, %v2299_v13 }
 0xb03   :  { %v2328_v34 = vmul.f32 %v2297_v15, %v3733_v37 }
 0xb04   :  { %v2301_v2 = vmul.f32 0.5, %v2300_v48 }
 0xb05   :  { %v2333_v19 = vmul.f32 %v2332_v14, %v2328_v34 }
 0xb06   :  { %v2302_v49 = vsub.f32 1.5, %v2301_v2 }
 0xb07   :  { %v2338_v61 = vadd.f32 %v2337_v16, %v2333_v19 }
 0xb08   :  { %v2303_v1 = vmul.f32 %v2865_v12, %v2302_v49 }
 0xb09   :  { %2376 = vmatmul.f32.vlgmr.msra.gmra.mxu0 %v2338_v61 }
 0xb0a   :  { %v2307_v20 = vsel %vm2306_vm7, %v2865_v12, %v2303_v1 }
 0xb0b   :  { %v2329_v7 = vmul.f32 %v2307_v20, %v3738_v30 }
 0xb0d   :  { %v2334_v21 = vmul.f32 %v2332_v14, %v2329_v7 }
 0xb0f   :  { %v2339_v23 = vadd.f32 %v2337_v16, %v2334_v21 }
 0xb11   :  { %2379 = vmatmul.f32.gmra.mxu0 %v2339_v23 }
 0xb21   :  { %v2277_v22 = vpop.xlane.xlu2 %2276 }
 0xb22   :  { %v2282_v3 = vmul.f32 %v2277_v22, %v3400_v59 }
 0xb24   :  { %v2286_v24 = vadd.f32 1e-05, %v2282_v3 }
 0xb26   :  { %2866 = vrsqrt.f32 %v2286_v24  ;;  %vm2314_vm9 = vweird.f32 %v2286_v24 }
 0xb2c   :  { %v2867_v27 = vpop.eup %2866 }
 0xb2d   :  { %v2309_v57 = vmul.f32 %v2867_v27, %v2286_v24  ;;  %vm2315_vm8 = vweird.f32 %v2867_v27 }
 0xb2e   :  { %vm2316_vm10 = vmor %vm2314_vm9, %vm2315_vm8 }
 0xb2f   :  { %v2310_v37 = vmul.f32 %v2867_v27, %v2309_v57 }
 0xb31   :  { %v2311_v4 = vmul.f32 0.5, %v2310_v37 }
 0xb33   :  { %v2312_v47 = vsub.f32 1.5, %v2311_v4 }
 0xb35   :  { %v2313_v29 = vmul.f32 %v2867_v27, %v2312_v47  ;;  %v2473_v47 = vperm.slane %v2342_v35, 1 }
 0xb37   :  { %v2317_v8 = vsel %vm2316_vm10, %v2867_v27, %v2313_v29 }
 0xb38   :  { %v2330_v30 = vmul.f32 %v2317_v8, %v3743_v28 }
 0xb3a   :  { %v2335_v10 = vmul.f32 %v2332_v14, %v2330_v30  ;;  %v2478_v30 = vperm.slane %v2342_v35, 2 }
 0xb3c   :  { %v2340_v32 = vadd.f32 %v2337_v16, %v2335_v10 }
 0xb3e   :  { %2382 = vmatmul.f32.gmra.mxu0 %v2340_v32 }
 0xb41   :  { %v2279_v26 = vpop.xlane.xlu0 %2278 }
 0xb42   :  { %v2283_v18 = vmul.f32 %v2279_v26, %v3400_v59 }
 0xb44   :  { %v2287_v33 = vadd.f32 1e-05, %v2283_v18 }
 0xb46   :  { %2868 = vrsqrt.f32 %v2287_v33  ;;  %vm2324_vm12 = vweird.f32 %v2287_v33 }
 0xb4c   :  { %v2869_v38 = vpop.eup %2868 }
 0xb4d   :  { %v2319_v39 = vmul.f32 %v2869_v38, %v2287_v33  ;;  %vm2325_vm11 = vweird.f32 %v2869_v38 }
 0xb4e   :  { %vm2326_vm13 = vmor %vm2324_vm12, %vm2325_vm11 }
 0xb4f   :  { %v2320_v56 = vmul.f32 %v2869_v38, %v2319_v39 }
 0xb51   :  { %v2321_v62 = vmul.f32 0.5, %v2320_v56 }
 0xb53   :  { %v2322_v17 = vsub.f32 1.5, %v2321_v62 }
 0xb55   :  { %v2323_v46 = vmul.f32 %v2869_v38, %v2322_v17 }
 0xb57   :  { %v2327_v43 = vsel %vm2326_vm13, %v2869_v38, %v2323_v46 }
 0xb58   :  { %v2331_v28 = vmul.f32 %v2327_v43, %v3748_v63 }
 0xb5a   :  { %v2336_v51 = vmul.f32 %v2332_v14, %v2331_v28 }
 0xb5c   :  { %v2341_v41 = vadd.f32 %v2337_v16, %v2336_v51 }
 0xb5e   :  { %2385 = vmatmul.f32.gmra.mxu0 %v2341_v41 }
 0xb86   :  { %v2377_v40 = vpop.f32.mrf.mxu0 }
 0xb87   :  { %v2378_v55 = vadd.f32 %v2377_v40, %v2359_v54 }
 0xb89   :  { %v2389_v60 = vmax.f32 %v2378_v55, 0.0 }
 0xb8b   :  { %2393 = vadd.xlane.f32.xlu1 %v2389_v60 }
 0xb8e   :  { %v2380_v42 = vpop.f32.mrf.mxu0 }
 0xb8f   :  { %v2381_v36 = vadd.f32 %v2380_v42, %v2359_v54 }
 0xb91   :  { %v2390_v50 = vmax.f32 %v2381_v36, 0.0 }
 0xb93   :  { %2395 = vadd.xlane.f32.xlu2 %v2390_v50 }
 0xbbb   :  { %v2383_v0 = vpop.f32.mrf.mxu0 }
 0xbbc   :  { %v2384_v45 = vadd.f32 %v2383_v0, %v2359_v54 }
 0xbbe   :  { %v2391_v5 = vmax.f32 %v2384_v45, 0.0 }
 0xbc0   :  { %2397 = vadd.xlane.f32.xlu0 %v2391_v5 }
 0xbdb   :  { %v2386_v63 = vpop.f32.mrf.mxu0 }
 0xbdc   :  { %v2387_v58 = vadd.f32 %v2386_v63, %v2359_v54 }
 0xbde   :  { %v2392_v6 = vmax.f32 %v2387_v58, 0.0 }
 0xbe0   :  { %2399 = vadd.xlane.f32.xlu1 %v2392_v6 }
 0xbfe   :  { %v2394_v44 = vpop.xlane.xlu1 %2393 }
 0xbff   :  { %v2401_v52 = vmul.f32 %v2394_v44, %v3400_v59 }
 0xc01   :  { %v2405_v31 = vsub.f32 %v2389_v60, %v2401_v52 }
 0xc03   :  { %v2409_v53 = vmul.f32 %v2405_v31, %v2405_v31 }
 0xc05   :  { %2413 = vadd.xlane.f32.xlu2 %v2409_v53 }
 0xc06   :  { %v2396_v9 = vpop.xlane.xlu2 %2395 }
 0xc07   :  { %v2402_v11 = vmul.f32 %v2396_v9, %v3400_v59 }
 0xc09   :  { %v2406_v12 = vsub.f32 %v2390_v50, %v2402_v11 }
 0xc0b   :  { %v2410_v25 = vmul.f32 %v2406_v12, %v2406_v12 }
 0xc0d   :  { %2415 = vadd.xlane.f32.xlu0 %v2410_v25 }
 0xc33   :  { %v2398_v13 = vpop.xlane.xlu0 %2397 }
 0xc34   :  { %v2403_v14 = vmul.f32 %v2398_v13, %v3400_v59 }
 0xc36   :  { %v2407_v15 = vsub.f32 %v2391_v5, %v2403_v14 }
 0xc38   :  { %v2411_v48 = vmul.f32 %v2407_v15, %v2407_v15 }
 0xc3a   :  { %2417 = vadd.xlane.f32.xlu1 %v2411_v48 }
 0xc53   :  { %v2400_v16 = vpop.xlane.xlu1 %2399 }
 0xc54   :  { %v2404_v34 = vmul.f32 %v2400_v16, %v3400_v59 }
 0xc56   :  { %v3769_v2 = vsub.f32 %v2392_v6, %v2404_v34 }
 0xc58   :  { %v2412_v19 = vmul.f32 %v3769_v2, %v3769_v2 }
 0xc5a   :  { %2419 = vadd.xlane.f32.xlu2 %v2412_v19 }
 0xc78   :  { %v2414_v49 = vpop.xlane.xlu2 %2413 }
 0xc79   :  { %v2421_v61 = vmul.f32 %v2414_v49, %v3400_v59 }
 0xc7b   :  { %v2425_v1 = vadd.f32 1e-05, %v2421_v61 }
 0xc7d   :  { %2870 = vrsqrt.f32 %v2425_v1  ;;  %vm2435_vm15 = vweird.f32 %v2425_v1 }
 0xc80   :  { %v2416_v20 = vpop.xlane.xlu0 %2415 }
 0xc81   :  { %v2422_v7 = vmul.f32 %v2416_v20, %v3400_v59 }
 0xc83   :  { %v2871_v21 = vpop.eup %2870  ;;  %v2426_v23 = vadd.f32 1e-05, %v2422_v7 }
 0xc84   :  { %v2430_v22 = vmul.f32 %v2871_v21, %v2425_v1  ;;  %vm2436_vm14 = vweird.f32 %v2871_v21 }
 0xc85   :  { %2872 = vrsqrt.f32 %v2426_v23  ;;  %vm2437_vm0 = vmor %vm2435_vm15, %vm2436_vm14  ;;  %vm2445_vm1 = vweird.f32 %v2426_v23 }
 0xc86   :  { %v2431_v3 = vmul.f32 %v2871_v21, %v2430_v22 }
 0xc88   :  { %v2432_v24 = vmul.f32 0.5, %v2431_v3 }
 0xc8a   :  { %v2433_v27 = vsub.f32 1.5, %v2432_v24 }
 0xc8b   :  { %v2873_v57 = vpop.eup %2872 }
 0xc8c   :  { %v2434_v37 = vmul.f32 %v2871_v21, %v2433_v27  ;;  %v2440_v4 = vmul.f32 %v2873_v57, %v2426_v23  ;;  %vm2446_vm5 = vweird.f32 %v2873_v57 }
 0xc8d   :  { %vm2447_vm2 = vmor %vm2445_vm1, %vm2446_vm5 }
 0xc8e   :  { %v2438_v29 = vsel %vm2437_vm0, %v2871_v21, %v2434_v37  ;;  %v2441_v8 = vmul.f32 %v2873_v57, %v2440_v4 }
 0xc8f   :  { %v2469_v10 = vmul.f32 %v2438_v29, %v2405_v31 }
 0xc90   :  { %v2442_v32 = vmul.f32 0.5, %v2441_v8 }
 0xc91   :  { %v2474_v26 = vmul.f32 %v2473_v47, %v2469_v10 }
 0xc92   :  { %v2443_v18 = vsub.f32 1.5, %v2442_v32 }
 0xc93   :  { %v2479_v33 = vadd.f32 %v2478_v30, %v2474_v26 }
 0xc94   :  { %v2444_v38 = vmul.f32 %v2873_v57, %v2443_v18 }
 0xc95   :  { %2483 = vst [vmem:[#allocation8] sm:$0xff] %v2479_v33 }
 0xc96   :  { %v2448_v39 = vsel %vm2447_vm2, %v2873_v57, %v2444_v38 }
 0xc97   :  { %v2470_v56 = vmul.f32 %v2448_v39, %v2406_v12 }
 0xc99   :  { %v2475_v62 = vmul.f32 %v2473_v47, %v2470_v56 }
 0xc9b   :  { %v2480_v17 = vadd.f32 %v2478_v30, %v2475_v62 }
 0xc9d   :  { %2484 = vst [vmem:[#allocation8 + $0x8] sm:$0xff] %v2480_v17 }
 0xcad   :  { %v2418_v46 = vpop.xlane.xlu1 %2417 }
 0xcae   :  { %v2423_v43 = vmul.f32 %v2418_v46, %v3400_v59 }
 0xcb0   :  { %v2427_v28 = vadd.f32 1e-05, %v2423_v43 }
 0xcb2   :  { %2874 = vrsqrt.f32 %v2427_v28  ;;  %vm2455_vm4 = vweird.f32 %v2427_v28 }
 0xcb8   :  { %v2875_v51 = vpop.eup %2874 }
 0xcb9   :  { %v2450_v41 = vmul.f32 %v2875_v51, %v2427_v28  ;;  %vm2456_vm3 = vweird.f32 %v2875_v51 }
 0xcba   :  { %vm2457_vm6 = vmor %vm2455_vm4, %vm2456_vm3 }
 0xcbb   :  { %v2451_v35 = vmul.f32 %v2875_v51, %v2450_v41 }
 0xcbd   :  { %v2452_v54 = vmul.f32 0.5, %v2451_v35 }
 0xcbf   :  { %v2453_v40 = vsub.f32 1.5, %v2452_v54 }
 0xcc1   :  { %v2454_v55 = vmul.f32 %v2875_v51, %v2453_v40 }
 0xcc3   :  { %v2458_v60 = vsel %vm2457_vm6, %v2875_v51, %v2454_v55 }
 0xcc4   :  { %v2471_v42 = vmul.f32 %v2458_v60, %v2407_v15 }
 0xcc6   :  { %v2476_v36 = vmul.f32 %v2473_v47, %v2471_v42 }
 0xcc8   :  { %v2481_v50 = vadd.f32 %v2478_v30, %v2476_v36 }
 0xcca   :  { %2485 = vst [vmem:[#allocation8 + $0x10] sm:$0xff] %v2481_v50 }
 0xccd   :  { %v2420_v0 = vpop.xlane.xlu2 %2419 }
 0xcce   :  { %v2424_v45 = vmul.f32 %v2420_v0, %v3400_v59 }
 0xcd0   :  { %v2428_v5 = vadd.f32 1e-05, %v2424_v45 }
 0xcd2   :  { %2876 = vrsqrt.f32 %v2428_v5  ;;  %vm2465_vm8 = vweird.f32 %v2428_v5 }
 0xcd8   :  { %v2877_v63 = vpop.eup %2876 }
 0xcd9   :  { %v2460_v58 = vmul.f32 %v2877_v63, %v2428_v5  ;;  %vm2466_vm7 = vweird.f32 %v2877_v63 }
 0xcda   :  { %vm2467_vm9 = vmor %vm2465_vm8, %vm2466_vm7 }
 0xcdb   :  { %v2461_v6 = vmul.f32 %v2877_v63, %v2460_v58 }
 0xcdd   :  { %v2462_v44 = vmul.f32 0.5, %v2461_v6 }
 0xcdf   :  { %v2463_v52 = vsub.f32 1.5, %v2462_v44 }
 0xce1   :  { %v2464_v31 = vmul.f32 %v2877_v63, %v2463_v52 }
 0xce3   :  { %v2468_v53 = vsel %vm2467_vm9, %v2877_v63, %v2464_v31 }
 0xce4   :  { %v2472_v9 = vmul.f32 %v2468_v53, %v3769_v2 }
 0xce6   :  { %v2477_v59 = vmul.f32 %v2473_v47, %v2472_v9 }
 0xce8   :  { %v2482_v11 = vadd.f32 %v2478_v30, %v2477_v59 }
 0xcea   :  { %2486 = vst [vmem:[#allocation8 + $0x18] sm:$0xff] %v2482_v11 }
 0xceb   :  { %2499 = dma.vmem_to_hbm [thread:$0]  %s2492_s25, 512, %s2494_s27, [#allocation4], %s2981_s17, %s2981_s17, %s2982_s18  }
 0xcec   :  { %2978 = dma.done.wait [#allocation4], 512  }
 0xced   :  { %2979 = vsyncadd [#allocation4], 4294966784 }
 0xcee   :  { %2504 = vsyncpa [#allocation3], 1 }
 0xcef   :  { %2505 = vsyncpa [#allocation6], 1 }
 0xcf0   :  { %2506 = vsyncpa [#allocation4], 1 }

</bundles_post_ra>
